<compile_context>
chip_gen: v7x
topology: tpu7x:2x2x1
jax: 0.10.0
libtpu: 0.0.40
codegen_flags: <defaults>
</compile_context>

<pallas_src>
import jax
import jax.numpy as jnp
from jax.experimental import pallas as pl
from jax.experimental.pallas import tpu as pltpu

TILE_N = 1024  # output-hidden tile width (lanes); multiple of 128


def _mlp_kernel(d_ref, w1_ref, b1_ref, w2_ref, b2_ref, w3_ref, out_ref):
    j = pl.program_id(0)

    # fc_1 + LeakyReLU(0.1). Recomputed per grid step (tiny) so the grid axis is
    # order-free and can be sharded across TensorCores (v7x megacore).
    z1 = jnp.dot(d_ref[...].astype(jnp.bfloat16), w1_ref[...],
                 preferred_element_type=jnp.float32)
    z1 = z1 + b1_ref[...]
    z1 = jnp.where(z1 > 0, z1, 0.1 * z1).astype(jnp.bfloat16)

    # fc_2 on this output-hidden tile. w2 is stored transposed (out_hidden, in_hidden)
    # so the streamed row slab is one contiguous DMA; contract last dims (A @ B^T).
    z2 = jax.lax.dot_general(
        z1, w2_ref[...],
        dimension_numbers=(((1,), (1,)), ((), ())),
        preferred_element_type=jnp.float32)
    z2 = z2 + b2_ref[j]                       # resident b2, tile picked by j
    z2 = jnp.where(z2 > 0, z2, 0.1 * z2)

    # fc_3 partial contribution of this tile; cross-tile sum + b3 happen in the
    # wrapper (keeps the grid axis "parallel"). dropout(0.3) is identity in eval.
    out_ref[0] = jax.lax.dot_general(
        z2.astype(jnp.bfloat16), w3_ref[j],   # resident lane-dense w3 tile
        dimension_numbers=(((1,), (1,)), ((), ())),
        preferred_element_type=jnp.float32)


def cvx_knapsack_forward(d, params, *, tile_n=TILE_N):
    """Eval-mode forward of Cvx_KnapsackNet: returns cost_vec (batch, num_resources)."""
    w1, b1, w2, b2, w3, b3 = params
    batch, context_size = d.shape
    hidden = w2.shape[0]
    num_resources = w3.shape[1]

    # bf16 weights halve the HBM traffic (the kernel is bandwidth-bound on w2);
    # biases and all accumulation stay f32.
    w1b = w1.astype(jnp.bfloat16)
    w2b = w2.T.astype(jnp.bfloat16)          # (out_hidden, in_hidden): contiguous row slabs
    w3b = w3.T.astype(jnp.bfloat16)          # lane-dense (num_resources, hidden)

    # Pad the output-hidden axis to a multiple of tile_n with zeros (no-op math).
    hidden_pad = pl.cdiv(hidden, tile_n) * tile_n
    pad = hidden_pad - hidden
    if pad:
        w2b = jnp.pad(w2b, ((0, pad), (0, 0)))
        b2p = jnp.pad(b2, ((0, 0), (0, pad)))
        w3b = jnp.pad(w3b, ((0, 0), (0, pad)))
    else:
        b2p = b2
    n_tiles = hidden_pad // tile_n

    # Reshape b2 / w3 so each grid step selects its tile by indexing the leading
    # axis of a fully resident VMEM array (no per-step DMAs for these operands).
    b2r = b2p.reshape(1, n_tiles, tile_n).transpose(1, 0, 2)               # (n_tiles, 1, tile_n)
    w3r = w3b.reshape(num_resources, n_tiles, tile_n).transpose(1, 0, 2)   # (n_tiles, R, tile_n)

    flops = 2 * batch * (context_size * hidden + hidden * hidden + hidden * num_resources)
    bytes_accessed = (w2b.size * 2 + w1b.size * 2 + w3r.size * 2            # bf16
                      + (b1.size + b2r.size + d.size) * 4                    # f32
                      + n_tiles * batch * num_resources * 4)                 # partials out

    partials = pl.pallas_call(
        _mlp_kernel,
        out_shape=jax.ShapeDtypeStruct((n_tiles, batch, num_resources), jnp.float32),
        grid=(n_tiles,),
        in_specs=[
            pl.BlockSpec((batch, context_size), lambda j: (0, 0)),           # d (resident)
            pl.BlockSpec((context_size, hidden), lambda j: (0, 0)),          # w1 bf16 (resident)
            pl.BlockSpec((1, hidden), lambda j: (0, 0)),                     # b1 (resident)
            pl.BlockSpec((tile_n, hidden), lambda j: (j, 0)),                # w2^T row slab (streamed)
            pl.BlockSpec((n_tiles, 1, tile_n), lambda j: (0, 0, 0)),         # b2 (resident)
            pl.BlockSpec((n_tiles, num_resources, tile_n), lambda j: (0, 0, 0)),  # w3 (resident)
        ],
        out_specs=pl.BlockSpec((1, batch, num_resources), lambda j: (j, 0, 0)),
        compiler_params=pltpu.CompilerParams(
            dimension_semantics=("parallel",),   # order-free -> megacore-shardable on v7x
        ),
        cost_estimate=pl.CostEstimate(
            flops=flops, transcendentals=0, bytes_accessed=bytes_accessed),
    )(d, w1b, b1, w2b, b2r, w3r)

    # dropout(0.3) is identity in eval mode.
    return jnp.sum(partials, axis=0) + b3


def init_params(key, context_size, hidden_dim, num_resources):
    """Deterministic nn.Linear-style init (U[-1/sqrt(fan_in), 1/sqrt(fan_in)]).
    Weights are stored transposed: (in_features, out_features); biases (1, out)."""
    def linear(key, fan_in, fan_out):
        kw, kb = jax.random.split(key)
        bound = 1.0 / jnp.sqrt(fan_in)
        w = jax.random.uniform(kw, (fan_in, fan_out), jnp.float32, -bound, bound)
        b = jax.random.uniform(kb, (1, fan_out), jnp.float32, -bound, bound)
        return w, b

    k1, k2, k3 = jax.random.split(key, 3)
    w1, b1 = linear(k1, context_size, hidden_dim)
    w2, b2 = linear(k2, hidden_dim, hidden_dim)
    w3, b3 = linear(k3, hidden_dim, num_resources)
    return w1, b1, w2, b2, w3, b3


def build_constraint_system(weights, capacities, num_constraints, num_resources):
    """Plain-JAX glue reproducing A / b construction from __init__ (unused in eval forward)."""
    A1 = jnp.concatenate(
        [weights, jnp.eye(num_constraints), jnp.zeros(weights.shape)], axis=1)
    A2 = jnp.concatenate(
        [jnp.eye(num_resources),
         jnp.zeros((num_resources, num_constraints)),
         jnp.eye(num_resources)], axis=1)
    A = jnp.concatenate([A1, A2], axis=0)
    b = jnp.concatenate([capacities, jnp.ones(num_resources)])
    return A, b


if __name__ == "__main__":
    # Small, module-consistent shapes.
    batch = 2
    context_size = 2
    num_constraints = 4
    num_resources = 8
    hidden_dim = 1000 * context_size  # as in the module: self.hidden_dim = 1000 * context_size

    key = jax.random.PRNGKey(0)
    k_d, k_w, k_c, k_p = jax.random.split(key, 4)

    # knapsack problem data (only used for A/b glue; eval forward ignores them)
    weights = jax.random.uniform(k_w, (num_constraints, num_resources), jnp.float32)
    capacities = jax.random.uniform(k_c, (num_constraints,), jnp.float32) * num_resources
    A, b = build_constraint_system(weights, capacities, num_constraints, num_resources)

    # network parameters + input context
    params = init_params(k_p, context_size, hidden_dim, num_resources)
    d = jax.random.normal(k_d, (batch, context_size), jnp.float32)

    cost_vec = jax.block_until_ready(cvx_knapsack_forward(d, params))
    assert cost_vec.shape == (batch, num_resources)

    w1, b1, w2, b2, w3, b3 = params

    # Reference 1: exact mirror of the kernel numerics (bf16 weights/acts, f32 accumulate).
    w1b, w2b, w3b = (w1.astype(jnp.bfloat16), w2.astype(jnp.bfloat16),
                     w3.astype(jnp.bfloat16))
    z = jnp.dot(d.astype(jnp.bfloat16), w1b, preferred_element_type=jnp.float32) + b1
    z = jnp.where(z > 0, z, 0.1 * z).astype(jnp.bfloat16)
    z = jnp.dot(z, w2b, preferred_element_type=jnp.float32) + b2
    z = jnp.where(z > 0, z, 0.1 * z).astype(jnp.bfloat16)
    ref_bf16 = jnp.dot(z, w3b, preferred_element_type=jnp.float32) + b3
    assert jnp.allclose(cost_vec, ref_bf16, atol=1e-2, rtol=1e-2)

    # Reference 2: full-f32 module math (loose tolerance; bf16 weights expected).
    z = d @ w1 + b1
    z = jnp.where(z > 0, z, 0.1 * z)
    z = z @ w2 + b2
    z = jnp.where(z > 0, z, 0.1 * z)
    ref_f32 = z @ w3 + b3
    assert jnp.allclose(cost_vec, ref_f32, atol=5e-2, rtol=5e-2)

    print("KERNEL_OK")
</pallas_src>

<mosaic_0001>
module attributes {stable_mosaic.version = 11 : i64} {
  func.func @_mlp_kernel(%arg0: i32, %arg1: memref<2x2xf32, #tpu.memory_space<vmem>>, %arg2: memref<2x2000xbf16, #tpu.memory_space<vmem>>, %arg3: memref<1x2000xf32, #tpu.memory_space<vmem>>, %arg4: memref<1024x2000xbf16, #tpu.memory_space<vmem>>, %arg5: memref<2x1x1024xf32, #tpu.memory_space<vmem>>, %arg6: memref<2x8x1024xbf16, #tpu.memory_space<vmem>>, %arg7: memref<1x2x8xf32, #tpu.memory_space<vmem>>) attributes {dimension_semantics = [#tpu.dimension_semantics<parallel>], iteration_bounds = array<i64: 2>, scalar_prefetch = 0 : i64, scratch_operands = 0 : i64, tpu.core_type = #tpu.core_type<tc>, window_params = [{pipeline_mode = #tpu.pipeline_mode<synchronous>, transform_indices = @transform_0, window_bounds = array<i64: 2, 2>}, {pipeline_mode = #tpu.pipeline_mode<synchronous>, transform_indices = @transform_1, window_bounds = array<i64: 2, 2000>}, {pipeline_mode = #tpu.pipeline_mode<synchronous>, transform_indices = @transform_2, window_bounds = array<i64: 1, 2000>}, {transform_indices = @transform_3, window_bounds = array<i64: 1024, 2000>}, {pipeline_mode = #tpu.pipeline_mode<synchronous>, transform_indices = @transform_4, window_bounds = array<i64: 2, 1, 1024>}, {pipeline_mode = #tpu.pipeline_mode<synchronous>, transform_indices = @transform_5, window_bounds = array<i64: 2, 8, 1024>}, {transform_indices = @transform_6, window_bounds = array<i64: 1, 2, 8>}]} {
    %c0 = arith.constant 0 : index
    %c0_0 = arith.constant 0 : index
    %0 = vector.load %arg1[%c0, %c0_0] : memref<2x2xf32, #tpu.memory_space<vmem>>, vector<2x2xf32>
    %1 = arith.truncf %0 : vector<2x2xf32> to vector<2x2xbf16>
    %c0_1 = arith.constant 0 : index
    %c0_2 = arith.constant 0 : index
    %2 = vector.load %arg2[%c0_1, %c0_2] : memref<2x2000xbf16, #tpu.memory_space<vmem>>, vector<2x2000xbf16>
    %cst = arith.constant dense<0.000000e+00> : vector<2x2000xf32>
    %3 = tpu.matmul %1, %2, %cst {dimension_numbers = #tpu.dot_dimension_numbers<[1], [0], [0], [1], [0, 0, 1, 1], [], []>} : vector<2x2xbf16>, vector<2x2000xbf16>, vector<2x2000xf32> -> vector<2x2000xf32>
    %c0_3 = arith.constant 0 : index
    %c0_4 = arith.constant 0 : index
    %4 = vector.load %arg3[%c0_3, %c0_4] : memref<1x2000xf32, #tpu.memory_space<vmem>>, vector<1x2000xf32>
    %5 = vector.broadcast %4 : vector<1x2000xf32> to vector<2x2000xf32>
    %6 = arith.addf %3, %5 : vector<2x2000xf32>
    %cst_5 = arith.constant 0.000000e+00 : f32
    %7 = vector.broadcast %cst_5 : f32 to vector<2x2000xf32>
    %8 = arith.cmpf ogt, %6, %7 : vector<2x2000xf32>
    %cst_6 = arith.constant 1.000000e-01 : f32
    %9 = vector.broadcast %cst_6 : f32 to vector<2x2000xf32>
    %10 = arith.mulf %9, %6 : vector<2x2000xf32>
    %11 = arith.select %8, %6, %10 : vector<2x2000xi1>, vector<2x2000xf32>
    %12 = arith.truncf %11 : vector<2x2000xf32> to vector<2x2000xbf16>
    %c0_7 = arith.constant 0 : index
    %c0_8 = arith.constant 0 : index
    %13 = vector.load %arg4[%c0_7, %c0_8] : memref<1024x2000xbf16, #tpu.memory_space<vmem>>, vector<1024x2000xbf16>
    %cst_9 = arith.constant dense<0.000000e+00> : vector<2x1024xf32>
    %14 = tpu.matmul %12, %13, %cst_9 {dimension_numbers = #tpu.dot_dimension_numbers<[1], [1], [0], [0], [0, 0, 1, 0], [], []>} : vector<2x2000xbf16>, vector<1024x2000xbf16>, vector<2x1024xf32> -> vector<2x1024xf32>
    %15 = arith.index_cast %arg0 : i32 to index
    %c0_10 = arith.constant 0 : index
    %c0_11 = arith.constant 0 : index
    %16 = vector.load %arg5[%15, %c0_10, %c0_11] : memref<2x1x1024xf32, #tpu.memory_space<vmem>>, vector<1x1x1024xf32>
    %17 = vector.shape_cast %16 : vector<1x1x1024xf32> to vector<1x1024xf32>
    %18 = vector.broadcast %17 : vector<1x1024xf32> to vector<2x1024xf32>
    %19 = arith.addf %14, %18 : vector<2x1024xf32>
    %cst_12 = arith.constant 0.000000e+00 : f32
    %20 = vector.broadcast %cst_12 : f32 to vector<2x1024xf32>
    %21 = arith.cmpf ogt, %19, %20 : vector<2x1024xf32>
    %cst_13 = arith.constant 1.000000e-01 : f32
    %22 = vector.broadcast %cst_13 : f32 to vector<2x1024xf32>
    %23 = arith.mulf %22, %19 : vector<2x1024xf32>
    %24 = arith.select %21, %19, %23 : vector<2x1024xi1>, vector<2x1024xf32>
    %25 = arith.truncf %24 : vector<2x1024xf32> to vector<2x1024xbf16>
    %26 = arith.index_cast %arg0 : i32 to index
    %c0_14 = arith.constant 0 : index
    %c0_15 = arith.constant 0 : index
    %27 = vector.load %arg6[%26, %c0_14, %c0_15] : memref<2x8x1024xbf16, #tpu.memory_space<vmem>>, vector<1x8x1024xbf16>
    %28 = vector.shape_cast %27 : vector<1x8x1024xbf16> to vector<8x1024xbf16>
    %cst_16 = arith.constant dense<0.000000e+00> : vector<2x8xf32>
    %29 = tpu.matmul %25, %28, %cst_16 {dimension_numbers = #tpu.dot_dimension_numbers<[1], [1], [0], [0], [0, 0, 1, 0], [], []>} : vector<2x1024xbf16>, vector<8x1024xbf16>, vector<2x8xf32> -> vector<2x8xf32>
    %c0_17 = arith.constant 0 : index
    %c0_18 = arith.constant 0 : index
    %c0_19 = arith.constant 0 : index
    %30 = vector.load %arg7[%c0_17, %c0_18, %c0_19] : memref<1x2x8xf32, #tpu.memory_space<vmem>>, vector<1x2x8xf32>
    %31 = vector.shape_cast %30 : vector<1x2x8xf32> to vector<2x8xf32>
    %32 = vector.shape_cast %29 : vector<2x8xf32> to vector<1x2x8xf32>
    tpu.vector_store %arg7[%c0_17, %c0_18, %c0_19], %32 {strides = array<i32>} : memref<1x2x8xf32, #tpu.memory_space<vmem>>, vector<1x2x8xf32>,
    return
  }
  func.func @transform_0(%arg0: i32) -> (i32, i32) {
    %c0_i32 = arith.constant 0 : i32
    %c0_i32_0 = arith.constant 0 : i32
    %c0_i32_1 = arith.constant 0 : i32
    return %c0_i32, %c0_i32_0 : i32, i32
  }
  func.func @transform_1(%arg0: i32) -> (i32, i32) {
    %c0_i32 = arith.constant 0 : i32
    %c0_i32_0 = arith.constant 0 : i32
    %c0_i32_1 = arith.constant 0 : i32
    return %c0_i32, %c0_i32_0 : i32, i32
  }
  func.func @transform_2(%arg0: i32) -> (i32, i32) {
    %c0_i32 = arith.constant 0 : i32
    %c0_i32_0 = arith.constant 0 : i32
    %c0_i32_1 = arith.constant 0 : i32
    return %c0_i32, %c0_i32_0 : i32, i32
  }
  func.func @transform_3(%arg0: i32) -> (i32, i32) {
    %c0_i32 = arith.constant 0 : i32
    %c0_i32_0 = arith.constant 0 : i32
    return %arg0, %c0_i32 : i32, i32
  }
  func.func @transform_4(%arg0: i32) -> (i32, i32, i32) {
    %c0_i32 = arith.constant 0 : i32
    %c0_i32_0 = arith.constant 0 : i32
    %c0_i32_1 = arith.constant 0 : i32
    %c0_i32_2 = arith.constant 0 : i32
    return %c0_i32, %c0_i32_0, %c0_i32_1 : i32, i32, i32
  }
  func.func @transform_5(%arg0: i32) -> (i32, i32, i32) {
    %c0_i32 = arith.constant 0 : i32
    %c0_i32_0 = arith.constant 0 : i32
    %c0_i32_1 = arith.constant 0 : i32
    %c0_i32_2 = arith.constant 0 : i32
    return %c0_i32, %c0_i32_0, %c0_i32_1 : i32, i32, i32
  }
  func.func @transform_6(%arg0: i32) -> (i32, i32, i32) {
    %c0_i32 = arith.constant 0 : i32
    %c0_i32_0 = arith.constant 0 : i32
    %c0_i32_1 = arith.constant 0 : i32
    return %arg0, %c0_i32, %c0_i32_0 : i32, i32, i32
  }
}

</mosaic_0001>

<bundles_post_ra>
// kernel: tpu_custom_call.1
= control target key start
LH: loop header
LB: loop body
LE: loop exit
PB: predicated region body
PF: predicated region fallthrough
CT: control target
= control target key end

     0   :  { %11 = vsyncpa [#allocation3], 0  ;;  %s11774_s0 = inlined_call_operand.vmem [shape: f32[2,2], index: 0, kind: input, shape index: {}]   ;;  %s11775_s1 = inlined_call_operand.vmem [shape: bf16[2,2000], index: 1, kind: input, shape index: {}]   ;;  %s11776_s2 = inlined_call_operand.vmem [shape: f32[1,2000], index: 2, kind: input, shape index: {}]   ;;  %s11777_s3 = inlined_call_operand.vmem [shape: bf16[2048,2000], index: 3, kind: input, shape index: {}]   ;;  %s11778_s4 = inlined_call_operand.vmem [shape: f32[2,1,1024], index: 4, kind: input, shape index: {}]   ;;  %s11779_s5 = inlined_call_operand.vmem [shape: bf16[2,8,1024], index: 5, kind: input, shape index: {}]   ;;  %s11780_s6 = inlined_call_operand.hbm [shape: f32[2,2,8], index: 6, kind: output, shape index: {}]  }
   0x1   :  { %13 = vsyncpa [#allocation3 + $0x1], 0  ;;  %s10245_s21 = smov 0   ;;  %s10247_s22 = smov 0  }
   0x2   :  { %s10249_s23 = smov 0   ;;  %s10251_s24 = smov 0  }
   0x3 LB: > { %s10266_s25 = sadd.s32 4294967295, %s10205_s24   ;;  %s8826_s26 = sadd.s32 4294967294, %s10205_s24   ;;  %s10205_s24 = sphi %s10251_s24, %s11786_s24   ;;  %s10201_s23 = sphi %s10249_s23, %s11785_s23   ;;  %s10197_s22 = sphi %s10247_s22, %s11784_s22   ;;  %s10193_s21 = sphi %s10245_s21, %s11783_s21  }
   0x4   : > { %s10270_s27 = sadd.s32 1, %s10205_s24   ;;  %s157_s28 = sadd.s32 1, %s10201_s23 }
   0x5   : > { %s154_s29 = ssub.s32 %s10205_s24, %s10270_s27  ;;  %p167_p0 = scmp.ne.s32.totalorder %s10201_s23, %s10197_s22 }
   0x6   : > { %p155_p1 = scmp.eq.s32.totalorder %s154_s29, 0  ;;  %p168_p2 = scmp.eq.s32.totalorder %s10266_s25, 1 }
   0x7   : > { %p173_p3 = scmp.ne.s32.totalorder %s10197_s22, %s10193_s21  ;;  %p174_p4 = scmp.eq.s32.totalorder %s8826_s26, 1 }
   0x8   : > { %s10281_s30 = scalar_select %p155_p1, %s10201_s23, %s157_s28  }
   0x9   : > { %p10283_p5 = por %p168_p2, %p167_p0  ;;  %p10287_p6 = por %p174_p4, %p173_p3 }
   0xa   : > { %p8829_p7 = scmp.ge.s32.totalorder %s10205_s24, 1  ;;  %p217_p8 = scmp.lt.s32.totalorder %s10205_s24, 3 }
   0xc   : > { %p218_p9 = pnand %p8829_p7, %p217_p8 }
   0xd   : > { %v264_v0 = vlaneseq (!%p218_p9)  ;;  %v10207_v1 = vmov (!%p218_p9), 1966171168   ;;  %v10208_v3 = vmov (!%p218_p9), 0   ;;  %s8831_s9 = sshll.u32 (!%p218_p9), %s10266_s25, 7  ;;  %v258_v4 = vld [vmem:[%s11775_s1] sm:$0xff] (!%p218_p9)  ;;  %v259_v6 = vld [vmem:[%s11775_s1 + $0x8] sm:$0xff] (!%p218_p9) }
   0xe   : > { %221 = sbr.rel (%p218_p9) target bundleno = 2631 (0xa47), region = 44  ;;  %v348_v2 = vunpack.c.l.s4 (!%p218_p9), %v10207_v1  ;;  %529 = vmatprep.mubr.bf16.mxu1 (!%p218_p9), %v10208_v3  ;;  %693 = vmatprep.mubr.bf16.mxu0 (!%p218_p9), %v10208_v3  ;;  %p249_p10 = scmp.lt.s32.totalorder (!%p218_p9), %s8831_s9, 255  ;;  %v346_v7 = vcombine.high (!%p218_p9), %v258_v4, %v258_v4  ;;  %v395_v9 = vcombine.high (!%p218_p9), %v259_v6, %v259_v6  ;;  %vm448_vm0 = vcmask (!%p218_p9), 1040384   ;;  %v256_v17 = vld [vmem:[%s11774_s0] sm:$0x3] (!%p218_p9) }
   0xf   : > { %v10299_v5 = vshrl.u32 (!%p218_p9), %v264_v0, 7  ;;  %v10317_v27 = vpack.c.bf16 (!%p218_p9), %v256_v17, %v256_v17  ;;  %vm444_vm1 = vcmask (!%p218_p9), 15360   ;;  %vm7013_vm15 = vcmask (!%p218_p9), 654336   ;;  %s8850_s13 = sshll.u32 (!%p218_p9), %s10266_s25, 3  ;;  %s9957_s17 = sshll.u32 (!%p218_p9), %s10266_s25, 5 }
  0x10   : > { %v349_v8 = vunpack.c.0.s8 (!%p218_p9), %v348_v2  ;;  %s1914_s16 = scalar_lea.vmem (!%p218_p9), %s11778_s4, %s8850_s13  ;;  %s11696_s26 = scalar_lea.vmem (!%p218_p9), %s11779_s5, %s9957_s17 }
  0x11   : > { %s11732_s12 = scalar_lea.hbm (!%p218_p9), %s11780_s6, %s9957_s17  ;;  %s10209_s25 = smov (!%p218_p9), [#allocation2]  }
  0x12   : > { %v352_v10 = vsub.s32 (!%p218_p9), %v349_v8, %v10299_v5  ;;  %s10147_s15 = sshll.u32 (!%p218_p9), %s10209_s25, 4  ;;  %s10148_s15 = int_to_ptr.vmem [resolvable:$false] %s10147_s15 }
  0x14   : > { %v353_v11 = vrot.slane (!%p218_p9), %v258_v4, %v352_v10  ;;  %v360_v12 = vrot.slane (!%p218_p9), %v346_v7, %v352_v10  ;;  %v402_v13 = vrot.slane (!%p218_p9), %v259_v6, %v352_v10  ;;  %v409_v14 = vrot.slane (!%p218_p9), %v395_v9, %v352_v10 }
  0x15   : > { %s11788_s9 = smov (!%p249_p10, %s8831_s9), 255 }
  0x16   : > { %s9956_s14 = sshll.u32 %s11788_s9, 6  ;;  %v361_v15 = vcombine.high %v353_v11, %v353_v11  ;;  %v369_v16 = vrot.slane %v353_v11, %v352_v10  ;;  %v410_v18 = vcombine.high %v402_v13, %v402_v13  ;;  %v10308_v19 = vrot.slane %v402_v13, %v352_v10 }
  0x17   : > { %v411_v20 = vcombine.high %v409_v14, %v409_v14  ;;  %v362_v24 = vcombine.high %v360_v12, %v360_v12  ;;  %s10314_s19 = scalar_lea.vmem %s11777_s3, %s9956_s14  ;;  %v425_v34 = vrot.slane %v409_v14, %v352_v10  ;;  %v376_v37 = vrot.slane %v360_v12, %v352_v10 }
  0x18   : > { %v383_v21 = vrot.slane %v361_v15, %v352_v10  ;;  %v391_v22 = vcombine.high %v369_v16, %v369_v16  ;;  %v450_v23 = vsel %vm448_vm0, %v369_v16, 0  ;;  %v432_v25 = vrot.slane %v410_v18, %v352_v10  ;;  %v889_v30 = vld [vmem:[%s10314_s19] sm:$0xff] }
  0x19   : > { %v474_v28 = vsel %vm448_vm0, %v10308_v19, 0  ;;  %v439_v29 = vrot.slane %v411_v20, %v352_v10  ;;  %v897_v31 = vld [vmem:[%s10314_s19 + $0x40] sm:$0xff]  ;;  %v390_v33 = vrot.slane %v362_v24, %v352_v10  ;;  %v486_v35 = vsel %vm448_vm0, %v425_v34, 0 }
  0x1a   : > { %v393_v26 = vcombine.high %v383_v21, %v383_v21  ;;  %8834 = vmatprep.subr.msk.bf16.mxu1 %vm448_vm0, %v383_v21  ;;  %8842 = vmatprep.subr.msk.bf16.mxu0 %vm448_vm0, %v432_v25  ;;  %v456_v32 = vsel %vm448_vm0, %v391_v22, 0  ;;  %v8852_v36 = vcombine.high %v889_v30, %v897_v31  ;;  %v462_v38 = vsel %vm448_vm0, %v376_v37, 0  ;;  %v905_v40 = vld [vmem:[%s10314_s19 + $0x80] sm:$0xff] }
  0x1b   : > { %498 = vmatpush1.bf16.msra.mxu1 %v450_v23  ;;  %662 = vmatpush1.bf16.msra.mxu0 %v474_v28  ;;  %v394_v39 = vcombine.high %v390_v33, %v390_v33  ;;  %v913_v41 = vld [vmem:[%s10314_s19 + $0xc0] sm:$0xff]  ;;  %v8851_v42 = vcombine.low %v889_v30, %v897_v31  ;;  %v392_v44 = vcombine.high %v376_v37, %v376_v37 }
  0x1c   : > { %8836 = vmatprep.subr.msk.bf16.mxu1 %vm448_vm0, %v393_v26  ;;  %8846 = vmatprep.subr.msk.bf16.mxu0 %vm448_vm0, %v439_v29  ;;  %v8868_v43 = vcombine.high %v905_v40, %v913_v41  ;;  %v442_v46 = vcombine.high %v432_v25, %v432_v25  ;;  %v921_v47 = vld [vmem:[%s10314_s19 + $0x100] sm:$0xff]  ;;  %v8867_v49 = vcombine.low %v905_v40, %v913_v41 }
  0x1d   : > { %v468_v45 = vsel %vm448_vm0, %v392_v44, 0  ;;  %v929_v48 = vld [vmem:[%s10314_s19 + $0x140] sm:$0xff]  ;;  %v440_v51 = vcombine.high %v10308_v19, %v10308_v19  ;;  %v443_v53 = vcombine.high %v439_v29, %v439_v29  ;;  %v441_v58 = vcombine.high %v425_v34, %v425_v34 }
  0x1e   : > { %8835 = vmatmul.mubr.msk.bf16.vlgmr.msra.gmra.mrb[0].mxu1 %vm444_vm1, %v10317_v27  ;;  %8843 = vmatmul.mubr.msk.bf16.vlgmr.msra.gmra.mrb[0].mxu0 %vm444_vm1, %v10317_v27  ;;  %v8884_v50 = vcombine.high %v921_v47, %v929_v48  ;;  %v937_v54 = vld [vmem:[%s10314_s19 + $0x180] sm:$0xff]  ;;  %v8883_v56 = vcombine.low %v921_v47, %v929_v48 }
  0x1f   : > { %539 = vmatpush1.bf16.msra.mxu1 %v456_v32  ;;  %570 = vmatprep.mubr.bf16.mxu1 %v10208_v3  ;;  %v480_v52 = vsel %vm448_vm0, %v440_v51, 0  ;;  %v945_v55 = vld [vmem:[%s10314_s19 + $0x1c0] sm:$0xff]  ;;  %v492_v61 = vsel %vm448_vm0, %v441_v58, 0 }
  0x20   : > { %8838 = vmatprep.subr.msk.bf16.mxu1 %vm448_vm0, %v390_v33  ;;  %744 = vmatpush1.bf16.msra.mxu0 %v486_v35  ;;  %v8900_v57 = vcombine.high %v937_v54, %v945_v55  ;;  %v1145_v59 = vld [vmem:[%s10314_s19 + $0x800] sm:$0xff]  ;;  %v8899_v1 = vcombine.low %v937_v54, %v945_v55 }
  0x21   : > { %775 = vmatprep.mubr.bf16.mxu0 %v10208_v3  ;;  %7209 = vmatprep.subr.bf16.mxu0 %v8852_v36  ;;  %v1153_v60 = vld [vmem:[%s10314_s19 + $0x840] sm:$0xff] }
  0x22   : > { %v9108_v62 = vcombine.high %v1145_v59, %v1153_v60  ;;  %v953_v63 = vld [vmem:[%s10314_s19 + $0x200] sm:$0xff]  ;;  %v9107_v7 = vcombine.low %v1145_v59, %v1153_v60  ;;  %v10399_v60 = vld [vmem:[%s10314_s19 + $0x8] sm:$0xff] }
  0x23   : > { %v961_v0 = vld [vmem:[%s10314_s19 + $0x240] sm:$0xff] }
  0x24   : > { %v8916_v2 = vcombine.high %v953_v63, %v961_v0  ;;  %v1161_v4 = vld [vmem:[%s10314_s19 + $0x880] sm:$0xff]  ;;  %v8915_v11 = vcombine.low %v953_v63, %v961_v0 }
  0x25   : > { %v1169_v6 = vld [vmem:[%s10314_s19 + $0x8c0] sm:$0xff] }
  0x26   : > { %8837 = vmatmul.mubr.msk.bf16.vlgmr.msra.gmra.mrb[4].mxu1 %vm444_vm1, %v10317_v27  ;;  %8847 = vmatmul.mubr.msk.bf16.vlgmr.msra.gmra.mrb[4].mxu0 %vm444_vm1, %v10317_v27  ;;  %v969_v8 = vld [vmem:[%s10314_s19 + $0x280] sm:$0xff]  ;;  %v9124_v10 = vcombine.high %v1161_v4, %v1169_v6  ;;  %v9123_v14 = vcombine.low %v1161_v4, %v1169_v6 }
  0x27   : > { %580 = vmatpush1.bf16.msra.mxu1 %v462_v38  ;;  %611 = vmatprep.mubr.bf16.mxu1 %v10208_v3  ;;  %v977_v9 = vld [vmem:[%s10314_s19 + $0x2c0] sm:$0xff] }
  0x28   : > { %8840 = vmatprep.subr.msk.bf16.mxu1 %vm448_vm0, %v394_v39  ;;  %v1177_v12 = vld [vmem:[%s10314_s19 + $0x900] sm:$0xff]  ;;  %v8931_v18 = vcombine.low %v969_v8, %v977_v9 }
  0x29   : > { %7210 = vmatpush1.bf16.xpose.msra.mxu0 %v8851_v42  ;;  %v1185_v13 = vld [vmem:[%s10314_s19 + $0x940] sm:$0xff] }
  0x2a   : > { %7211 = vmatprep.subr.bf16.mxu0 %v8868_v43  ;;  %v985_v15 = vld [vmem:[%s10314_s19 + $0x300] sm:$0xff]  ;;  %v9140_v17 = vcombine.high %v1177_v12, %v1185_v13  ;;  %v9139_v22 = vcombine.low %v1177_v12, %v1185_v13 }
  0x2b   : > { %v993_v16 = vld [vmem:[%s10314_s19 + $0x340] sm:$0xff] }
  0x2c   : > { %v8948_v19 = vcombine.high %v985_v15, %v993_v16  ;;  %v1193_v20 = vld [vmem:[%s10314_s19 + $0x980] sm:$0xff]  ;;  %v8947_v26 = vcombine.low %v985_v15, %v993_v16 }
  0x2d   : > { %v1201_v21 = vld [vmem:[%s10314_s19 + $0x9c0] sm:$0xff] }
  0x2e   : > { %8839 = vmatmul.mubr.msk.bf16.vlgmr.msra.gmra.mrb[8].mxu1 %vm444_vm1, %v10317_v27  ;;  %v1001_v23 = vld [vmem:[%s10314_s19 + $0x380] sm:$0xff]  ;;  %v9156_v25 = vcombine.high %v1193_v20, %v1201_v21  ;;  %v9155_v30 = vcombine.low %v1193_v20, %v1201_v21 }
  0x2f   : > { %621 = vmatpush1.bf16.msra.mxu1 %v468_v45  ;;  %652 = vmatprep.mubr.bf16.mxu1 %v10208_v3  ;;  %v1009_v24 = vld [vmem:[%s10314_s19 + $0x3c0] sm:$0xff] }
  0x30   : > { %8844 = vmatprep.subr.msk.bf16.mxu1 %vm448_vm0, %v442_v46  ;;  %v1209_v28 = vld [vmem:[%s10314_s19 + $0xa00] sm:$0xff]  ;;  %v8963_v34 = vcombine.low %v1001_v23, %v1009_v24 }
  0x31   : > { %7212 = vmatpush1.bf16.xpose.msra.mxu0 %v8867_v49  ;;  %v1217_v29 = vld [vmem:[%s10314_s19 + $0xa40] sm:$0xff] }
  0x32   : > { %7213 = vmatprep.subr.bf16.mxu0 %v8884_v50  ;;  %v1017_v31 = vld [vmem:[%s10314_s19 + $0x400] sm:$0xff]  ;;  %v9172_v33 = vcombine.high %v1209_v28, %v1217_v29  ;;  %v9171_v38 = vcombine.low %v1209_v28, %v1217_v29 }
  0x33   : > { %v1025_v32 = vld [vmem:[%s10314_s19 + $0x440] sm:$0xff] }
  0x34   : > { %v8980_v35 = vcombine.high %v1017_v31, %v1025_v32  ;;  %v1225_v36 = vld [vmem:[%s10314_s19 + $0xa80] sm:$0xff]  ;;  %v8979_v42 = vcombine.low %v1017_v31, %v1025_v32 }
  0x35   : > { %v1233_v37 = vld [vmem:[%s10314_s19 + $0xac0] sm:$0xff] }
  0x36   : > { %8841 = vmatmul.mubr.msk.bf16.vlgmr.msra.gmra.mrb[12].mxu1 %vm444_vm1, %v10317_v27  ;;  %v1033_v39 = vld [vmem:[%s10314_s19 + $0x480] sm:$0xff]  ;;  %v9188_v41 = vcombine.high %v1225_v36, %v1233_v37  ;;  %v9187_v46 = vcombine.low %v1225_v36, %v1233_v37 }
  0x37   : > { %703 = vmatpush1.bf16.msra.mxu1 %v480_v52  ;;  %734 = vmatprep.mubr.bf16.mxu1 %v10208_v3  ;;  %v1041_v40 = vld [vmem:[%s10314_s19 + $0x4c0] sm:$0xff] }
  0x38   : > { %8848 = vmatprep.subr.msk.bf16.mxu1 %vm448_vm0, %v443_v53  ;;  %v8996_v43 = vcombine.high %v1033_v39, %v1041_v40  ;;  %v1241_v44 = vld [vmem:[%s10314_s19 + $0xb00] sm:$0xff]  ;;  %v8995_v50 = vcombine.low %v1033_v39, %v1041_v40 }
  0x39   : > { %7214 = vmatpush1.bf16.xpose.msra.mxu0 %v8883_v56  ;;  %v1249_v45 = vld [vmem:[%s10314_s19 + $0xb40] sm:$0xff] }
  0x3a   : > { %7215 = vmatprep.subr.bf16.mxu0 %v8900_v57  ;;  %v1049_v47 = vld [vmem:[%s10314_s19 + $0x500] sm:$0xff]  ;;  %v9204_v49 = vcombine.high %v1241_v44, %v1249_v45  ;;  %v9203_v54 = vcombine.low %v1241_v44, %v1249_v45 }
  0x3b   : > { %v1057_v48 = vld [vmem:[%s10314_s19 + $0x540] sm:$0xff] }
  0x3c   : > { %v9012_v51 = vcombine.high %v1049_v47, %v1057_v48  ;;  %v1257_v52 = vld [vmem:[%s10314_s19 + $0xb80] sm:$0xff]  ;;  %v9011_v58 = vcombine.low %v1049_v47, %v1057_v48 }
  0x3d   : > { %v1265_v53 = vld [vmem:[%s10314_s19 + $0xbc0] sm:$0xff] }
  0x3e   : > { %8845 = vmatmul.mubr.msk.bf16.vlgmr.msra.gmra.mrb[16].mxu1 %vm444_vm1, %v10317_v27  ;;  %v1065_v55 = vld [vmem:[%s10314_s19 + $0x580] sm:$0xff]  ;;  %v9220_v57 = vcombine.high %v1257_v52, %v1265_v53 }
  0x3f   : > { %785 = vmatpush1.bf16.msra.mxu1 %v492_v61  ;;  %816 = vmatprep.mubr.bf16.mxu1 %v10208_v3  ;;  %v8932_v3 = vcombine.high %v969_v8, %v977_v9  ;;  %v1073_v56 = vld [vmem:[%s10314_s19 + $0x5c0] sm:$0xff]  ;;  %v10402_v61 = vld [vmem:[%s10314_s19 + $0x48] sm:$0xff] }
  0x40   : > { %7537 = vmatprep.subr.bf16.mxu1 %v9108_v62  ;;  %v9028_v59 = vcombine.high %v1065_v55, %v1073_v56  ;;  %v8853_v62 = vcombine.low %v10399_v60, %v10402_v61  ;;  %v1273_v63 = vld [vmem:[%s10314_s19 + $0xc00] sm:$0xff]  ;;  %v8854_v37 = vcombine.high %v10399_v60, %v10402_v61 }
  0x41   : > { %7216 = vmatpush1.bf16.xpose.msra.mxu0 %v8899_v1  ;;  %v1281_v0 = vld [vmem:[%s10314_s19 + $0xc40] sm:$0xff]  ;;  %v9219_v1 = vcombine.low %v1257_v52, %v1265_v53 }
  0x42   : > { %7217 = vmatprep.subr.bf16.mxu0 %v8916_v2  ;;  %v1081_v2 = vld [vmem:[%s10314_s19 + $0x600] sm:$0xff]  ;;  %v9236_v6 = vcombine.high %v1273_v63, %v1281_v0 }
  0x43   : > { %v1089_v4 = vld [vmem:[%s10314_s19 + $0x640] sm:$0xff] }
  0x44   : > { %v9044_v8 = vcombine.high %v1081_v2, %v1089_v4  ;;  %v1289_v9 = vld [vmem:[%s10314_s19 + $0xc80] sm:$0xff] }
  0x45   : > { %v1105_v12 = vld [vmem:[%s10314_s19 + $0x6c0] sm:$0xff] }
  0x46   : > { %8849 = vmatmul.mubr.msk.bf16.vlgmr.msra.gmra.mrb[20].mxu1 %vm444_vm1, %v10317_v27  ;;  %v8964_v27 = vcombine.high %v1001_v23, %v1009_v24  ;;  %v1305_v16 = vld [vmem:[%s10314_s19 + $0xd00] sm:$0xff] }
  0x47   : > { %v1121_v20 = vld [vmem:[%s10314_s19 + $0x740] sm:$0xff] }
  0x48   : > { %7538 = vmatpush1.bf16.xpose.msra.mxu1 %v9107_v7  ;;  %v9027_v7 = vcombine.low %v1065_v55, %v1073_v56  ;;  %v1321_v24 = vld [vmem:[%s10314_s19 + $0xd80] sm:$0xff]  ;;  %v10443_v56 = vsub.s32 1, %v10299_v5 }
  0x49   : > { %7539 = vmatprep.subr.bf16.mxu1 %v9124_v10  ;;  %7218 = vmatpush1.bf16.xpose.msra.mxu0 %v8915_v11  ;;  %v1297_v10 = vld [vmem:[%s10314_s19 + $0xcc0] sm:$0xff]  ;;  %v9235_v11 = vcombine.low %v1273_v63, %v1281_v0 }
  0x4a   : > { %7219 = vmatprep.subr.bf16.mxu0 %v8932_v3  ;;  %v1097_v3 = vld [vmem:[%s10314_s19 + $0x680] sm:$0xff]  ;;  %v9252_v13 = vcombine.high %v1289_v9, %v1297_v10 }
  0x4b   : > { %v9060_v15 = vcombine.high %v1097_v3, %v1105_v12  ;;  %v1137_v28 = vld [vmem:[%s10314_s19 + $0x7c0] sm:$0xff] }
  0x4c   : > { %v1337_v32 = vld [vmem:[%s10314_s19 + $0xe00] sm:$0xff] }
  0x4d   : > { %v1361_v39 = vld [vmem:[%s10314_s19 + $0xec0] sm:$0xff] }
  0x4e   : > { %v1393_v47 = vld [vmem:[%s10314_s19 + $0xfc0] sm:$0xff] }
  0x4f   : > { %v10440_v55 = vld [vmem:[%s11776_s2] sm:$0xff] }
  0x50   : > { %7540 = vmatpush1.bf16.xpose.msra.mxu1 %v9123_v14  ;;  %v9043_v14 = vcombine.low %v1081_v2, %v1089_v4 }
  0x51   : > { %7541 = vmatprep.subr.bf16.mxu1 %v9140_v17  ;;  %7220 = vmatpush1.bf16.xpose.msra.mxu0 %v8931_v18  ;;  %v1313_v17 = vld [vmem:[%s10314_s19 + $0xd40] sm:$0xff]  ;;  %v9251_v18 = vcombine.low %v1289_v9, %v1297_v10 }
  0x52   : > { %7221 = vmatprep.subr.bf16.mxu0 %v8948_v19  ;;  %v1113_v19 = vld [vmem:[%s10314_s19 + $0x700] sm:$0xff]  ;;  %v9268_v21 = vcombine.high %v1305_v16, %v1313_v17 }
  0x53   : > { %v9076_v23 = vcombine.high %v1113_v19, %v1121_v20 }
  0x58   : > { %7542 = vmatpush1.bf16.xpose.msra.mxu1 %v9139_v22  ;;  %v9059_v22 = vcombine.low %v1097_v3, %v1105_v12 }
  0x59   : > { %7543 = vmatprep.subr.bf16.mxu1 %v9156_v25  ;;  %7222 = vmatpush1.bf16.xpose.msra.mxu0 %v8947_v26  ;;  %v1329_v25 = vld [vmem:[%s10314_s19 + $0xdc0] sm:$0xff]  ;;  %v9267_v26 = vcombine.low %v1305_v16, %v1313_v17  ;;  %v914_v16 = vld [vmem:[%s10314_s19 + $0xc8] sm:$0xff] }
  0x5a   : > { %7223 = vmatprep.subr.bf16.mxu0 %v8964_v27  ;;  %v1129_v27 = vld [vmem:[%s10314_s19 + $0x780] sm:$0xff]  ;;  %v9284_v29 = vcombine.high %v1321_v24, %v1329_v25  ;;  %v1162_v17 = vld [vmem:[%s10314_s19 + $0x888] sm:$0xff] }
  0x5b   : > { %v9092_v31 = vcombine.high %v1129_v27, %v1137_v28  ;;  %v9091_v36 = vcombine.low %v1129_v27, %v1137_v28 }
  0x60   : > { %7544 = vmatpush1.bf16.xpose.msra.mxu1 %v9155_v30  ;;  %v9075_v30 = vcombine.low %v1113_v19, %v1121_v20  ;;  %v10468_v19 = vsub.s32 4, %v10299_v5 }
  0x61   : > { %7545 = vmatprep.subr.bf16.mxu1 %v9172_v33  ;;  %7224 = vmatpush1.bf16.xpose.msra.mxu0 %v8963_v34  ;;  %v1345_v33 = vld [vmem:[%s10314_s19 + $0xe40] sm:$0xff]  ;;  %v9283_v34 = vcombine.low %v1321_v24, %v1329_v25 }
  0x62   : > { %7225 = vmatprep.subr.bf16.mxu0 %v8980_v35  ;;  %v9300_v35 = vcombine.high %v1337_v32, %v1345_v33  ;;  %v9299_v40 = vcombine.low %v1337_v32, %v1345_v33 }
  0x68   : > { %7546 = vmatpush1.bf16.xpose.msra.mxu1 %v9171_v38  ;;  %v1353_v38 = vld [vmem:[%s10314_s19 + $0xe80] sm:$0xff] }
  0x69   : > { %7547 = vmatprep.subr.bf16.mxu1 %v9188_v41  ;;  %7226 = vmatpush1.bf16.xpose.msra.mxu0 %v8979_v42  ;;  %v9316_v41 = vcombine.high %v1353_v38, %v1361_v39  ;;  %v1369_v42 = vld [vmem:[%s10314_s19 + $0xf00] sm:$0xff]  ;;  %v9315_v44 = vcombine.low %v1353_v38, %v1361_v39  ;;  %v922_v39 = vld [vmem:[%s10314_s19 + $0x108] sm:$0xff] }
  0x6a   : > { %7227 = vmatprep.subr.bf16.mxu0 %v8996_v43  ;;  %v1377_v43 = vld [vmem:[%s10314_s19 + $0xf40] sm:$0xff] }
  0x6b   : > { %v9332_v45 = vcombine.high %v1369_v42, %v1377_v43  ;;  %v9331_v48 = vcombine.low %v1369_v42, %v1377_v43  ;;  %v930_v43 = vld [vmem:[%s10314_s19 + $0x148] sm:$0xff] }
  0x70   : > { %7548 = vmatpush1.bf16.xpose.msra.mxu1 %v9187_v46  ;;  %v1385_v46 = vld [vmem:[%s10314_s19 + $0xf80] sm:$0xff] }
  0x71   : > { %7549 = vmatprep.subr.bf16.mxu1 %v9204_v49  ;;  %7228 = vmatpush1.bf16.xpose.msra.mxu0 %v8995_v50  ;;  %v9348_v49 = vcombine.high %v1385_v46, %v1393_v47  ;;  %v1146_v50 = vld [vmem:[%s10314_s19 + $0x808] sm:$0xff]  ;;  %v9347_v52 = vcombine.low %v1385_v46, %v1393_v47 }
  0x72   : > { %7229 = vmatprep.subr.bf16.mxu0 %v9012_v51  ;;  %v1154_v51 = vld [vmem:[%s10314_s19 + $0x848] sm:$0xff] }
  0x73   : > { %v9110_v53 = vcombine.high %v1146_v50, %v1154_v51  ;;  %v9109_v25 = vcombine.low %v1146_v50, %v1154_v51 }
  0x78   : > { %7550 = vmatpush1.bf16.xpose.msra.mxu1 %v9203_v54  ;;  %v10435_v54 = vsub.s32 0, %v10299_v5 }
  0x79   : > { %7551 = vmatprep.subr.bf16.mxu1 %v9220_v57  ;;  %7230 = vmatpush1.bf16.xpose.msra.mxu0 %v9011_v58  ;;  %v10448_v57 = vld [vmem:[%s11776_s2 + $0x8] sm:$0xff] }
  0x7a   : > { %7231 = vmatprep.subr.bf16.mxu0 %v9028_v59  ;;  %v267_v58 = vrot.slane %v10440_v55, %v10435_v54  ;;  %v271_v59 = vrot.slane %v10440_v55, %v10443_v56  ;;  %v299_v63 = vrot.slane %v10448_v57, %v10435_v54 }
  0x80   : > { %7552 = vmatpush1.bf16.xpose.msra.mxu1 %v9219_v1 }
  0x81   : > { %7553 = vmatprep.subr.bf16.mxu1 %v9236_v6  ;;  %7232 = vmatpush1.bf16.xpose.msra.mxu0 %v9027_v7  ;;  %v10457_v7 = vsub.s32 3, %v10299_v5 }
  0x82   : > { %7233 = vmatprep.subr.bf16.mxu0 %v9044_v8 }
  0x88   : > { %7554 = vmatpush1.bf16.xpose.msra.mxu1 %v9235_v11 }
  0x89   : > { %7555 = vmatprep.subr.bf16.mxu1 %v9252_v13  ;;  %7234 = vmatpush1.bf16.xpose.msra.mxu0 %v9043_v14  ;;  %v906_v13 = vld [vmem:[%s10314_s19 + $0x88] sm:$0xff] }
  0x8a   : > { %7235 = vmatprep.subr.bf16.mxu0 %v9060_v15  ;;  %v8870_v28 = vcombine.high %v906_v13, %v914_v16  ;;  %v8869_v60 = vcombine.low %v906_v13, %v914_v16  ;;  %v1210_v16 = vld [vmem:[%s10314_s19 + $0xa08] sm:$0xff] }
  0x90   : > { %7556 = vmatpush1.bf16.xpose.msra.mxu1 %v9251_v18  ;;  %v1170_v18 = vld [vmem:[%s10314_s19 + $0x8c8] sm:$0xff] }
  0x91   : > { %7557 = vmatprep.subr.bf16.mxu1 %v9268_v21  ;;  %7236 = vmatpush1.bf16.xpose.msra.mxu0 %v9059_v22  ;;  %v279_v22 = vrot.slane %v10440_v55, %v10457_v7  ;;  %v9125_v61 = vcombine.low %v1162_v17, %v1170_v18 }
  0x92   : > { %7237 = vmatprep.subr.bf16.mxu0 %v9076_v23  ;;  %v10473_v23 = vsub.s32 5, %v10299_v5 }
  0x98   : > { %7558 = vmatpush1.bf16.xpose.msra.mxu1 %v9267_v26  ;;  %v315_v26 = vrot.slane %v10448_v57, %v10468_v19 }
  0x99   : > { %7559 = vmatprep.subr.bf16.mxu1 %v9284_v29  ;;  %7238 = vmatpush1.bf16.xpose.msra.mxu0 %v9075_v30  ;;  %v9126_v29 = vcombine.high %v1162_v17, %v1170_v18  ;;  %v1218_v17 = vld [vmem:[%s10314_s19 + $0xa48] sm:$0xff] }
  0x9a   : > { %7239 = vmatprep.subr.bf16.mxu0 %v9092_v31  ;;  %v319_v31 = vrot.slane %v10448_v57, %v10473_v23 }
  0xa0   : > { %7560 = vmatpush1.bf16.xpose.msra.mxu1 %v9283_v34 }
  0xa1   : > { %7561 = vmatprep.subr.bf16.mxu1 %v9300_v35  ;;  %7240 = vmatpush1.bf16.xpose.msra.mxu0 %v9091_v36 }
  0xa2   : > { %7250 = vmatprep.subr.bf16.mxu0 %v8854_v37 }
  0xa8   : > { %7562 = vmatpush1.bf16.xpose.msra.mxu1 %v9299_v40 }
  0xa9   : > { %7563 = vmatprep.subr.bf16.mxu1 %v9316_v41 }
  0xb0   : > { %7564 = vmatpush1.bf16.xpose.msra.mxu1 %v9315_v44  ;;  %v1178_v44 = vld [vmem:[%s10314_s19 + $0x908] sm:$0xff] }
  0xb1   : > { %7565 = vmatprep.subr.bf16.mxu1 %v9332_v45  ;;  %v1186_v45 = vld [vmem:[%s10314_s19 + $0x948] sm:$0xff] }
  0xb8   : > { %7566 = vmatpush1.bf16.xpose.msra.mxu1 %v9331_v48  ;;  %v8886_v48 = vcombine.high %v922_v39, %v930_v43 }
  0xb9   : > { %7567 = vmatprep.subr.bf16.mxu1 %v9348_v49  ;;  %v9142_v49 = vcombine.high %v1178_v44, %v1186_v45 }
  0xc0   : > { %7568 = vmatpush1.bf16.xpose.msra.mxu1 %v9347_v52 }
  0xc1   : > { %7578 = vmatprep.subr.bf16.mxu1 %v9110_v53 }
  0xf1   : > { %v531_v0 = vpop.f32.mrb[0].mxu1  ;;  %v695_v8 = vpop.f32.mrb[0].mxu0 }
  0xf2   : > { %v532_v1 = vadd.f32 %v531_v0, %v267_v58  ;;  %v533_v2 = vpop.f32.mrb[1].mxu1  ;;  %v10459_v11 = vadd.f32 %v695_v8, %v299_v63  ;;  %v10461_v3 = vpop.f32.mrb[1].mxu0  ;;  %v938_v58 = vld [vmem:[%s10314_s19 + $0x188] sm:$0xff] }
  0xf3   : > { %v534_v4 = vadd.f32 %v533_v2, %v271_v59  ;;  %v535_v6 = vpop.f32.mrb[2].mxu1  ;;  %v699_v14 = vpop.f32.mrb[2].mxu0  ;;  %v946_v59 = vld [vmem:[%s10314_s19 + $0x1c8] sm:$0xff]  ;;  %v9141_v2 = vcombine.low %v1178_v44, %v1186_v45 }
  0xf4   : > { %vm825_vm2 = vcmp.gt.f32.partialorder %v532_v1, 0.0  ;;  %v841_v9 = vmul.f32 0.1, %v532_v1  ;;  %v536_v10 = vpop.f32.mrb[3].mxu1  ;;  %v700_v20 = vpop.f32.mrb[3].mxu0  ;;  %v1194_v63 = vld [vmem:[%s10314_s19 + $0x988] sm:$0xff] }
  0xf5   : > { %vm826_vm3 = vcmp.gt.f32.partialorder %v534_v4, 0.0  ;;  %v842_v12 = vmul.f32 0.1, %v534_v4  ;;  %v1202_v0 = vld [vmem:[%s10314_s19 + $0x9c8] sm:$0xff]  ;;  %v311_v20 = vrot.slane %v10448_v57, %v10457_v7  ;;  %vm833_vm11 = vcmp.gt.f32.partialorder %v10459_v11, 0.0 }
  0xf6   : > { %v857_v15 = vsel %vm825_vm2, %v532_v1, %v841_v9  ;;  %v8885_v1 = vcombine.low %v922_v39, %v930_v43  ;;  %v9158_v6 = vcombine.high %v1194_v63, %v1202_v0  ;;  %v954_v14 = vld [vmem:[%s10314_s19 + $0x208] sm:$0xff] }
  0xf7   : > { %v858_v21 = vsel %vm826_vm3, %v534_v4, %v842_v12  ;;  %v10479_v27 = vpack.c.bf16 %v857_v15, %v857_v15  ;;  %v8902_v4 = vcombine.high %v938_v58, %v946_v59  ;;  %v10517_v12 = vsub.s32 2, %v10299_v5  ;;  %v962_v15 = vld [vmem:[%s10314_s19 + $0x248] sm:$0xff] }
  0xf8   : > { %v10475_v24 = vpack.c.bf16 %v858_v21, %v858_v21  ;;  %v8901_v21 = vcombine.low %v938_v58, %v946_v59  ;;  %v978_v39 = vld [vmem:[%s10314_s19 + $0x2c8] sm:$0xff]  ;;  %v8917_v45 = vcombine.low %v954_v14, %v962_v15 }
  0xf9   : > { %v10481_v30 = vpop.f32.mrb[4].mxu1  ;;  %v777_v35 = vpop.f32.mrb[4].mxu0  ;;  %v307_v18 = vrot.slane %v10448_v57, %v10517_v12  ;;  %v994_v58 = vld [vmem:[%s10314_s19 + $0x348] sm:$0xff] }
  0xfa   : > { %7241 = vmatprep.mubr.bf16.mxu0 %v10475_v24  ;;  %7569 = vmatprep.mubr.bf16.mxu1 %v10475_v24  ;;  %v574_v32 = vpop.f32.mrb[5].mxu1  ;;  %v10492_v37 = vadd.f32 %v777_v35, %v315_v26  ;;  %v779_v38 = vpop.f32.mrb[5].mxu0  ;;  %v9174_v26 = vcombine.high %v1210_v16, %v1218_v17  ;;  %v1242_v59 = vld [vmem:[%s10314_s19 + $0xb08] sm:$0xff] }
  0xfb   : > { %7242 = vmatmul.mubr.bf16.vlgmr.msra.gmra.mrb[8].mxu0 %v10479_v27  ;;  %7570 = vmatmul.mubr.bf16.vlgmr.msra.gmra.mrb[24].mxu1 %v10479_v27  ;;  %v575_v33 = vadd.f32 %v574_v32, %v279_v22  ;;  %v576_v34 = vpop.f32.mrb[6].mxu1  ;;  %v10495_v41 = vadd.f32 %v779_v38, %v319_v31  ;;  %v781_v42 = vpop.f32.mrb[6].mxu0  ;;  %v9157_v22 = vcombine.low %v1194_v63, %v1202_v0  ;;  %v10536_v38 = vsub.s32 7, %v10299_v5  ;;  %v1250_v63 = vld [vmem:[%s10314_s19 + $0xb48] sm:$0xff] }
  0xfc   : > { %7251 = vmatpush1.bf16.xpose.msra.mxu0 %v8853_v62  ;;  %7579 = vmatpush1.bf16.xpose.msra.mxu1 %v9109_v25  ;;  %v577_v36 = vpop.f32.mrb[7].mxu1  ;;  %v782_v46 = vpop.f32.mrb[7].mxu0  ;;  %v8918_v25 = vcombine.high %v954_v14, %v962_v15  ;;  %v10532_v34 = vsub.s32 6, %v10299_v5  ;;  %v1234_v42 = vld [vmem:[%s10314_s19 + $0xac8] sm:$0xff]  ;;  %vm837_vm0 = vcmp.gt.f32.partialorder %v10492_v37, 0.0 }
  0xfd   : > { %7252 = vmatprep.subr.bf16.mxu0 %v8870_v28  ;;  %7580 = vmatprep.subr.bf16.mxu1 %v9126_v29  ;;  %vm828_vm4 = vcmp.gt.f32.partialorder %v575_v33, 0.0  ;;  %v844_v40 = vmul.f32 0.1, %v575_v33  ;;  %v970_v36 = vld [vmem:[%s10314_s19 + $0x288] sm:$0xff]  ;;  %v327_v44 = vrot.slane %v10448_v57, %v10536_v38  ;;  %v9173_v46 = vcombine.low %v1210_v16, %v1218_v17 }
  0xfe   : > { %v323_v43 = vrot.slane %v10448_v57, %v10532_v34  ;;  %v986_v57 = vld [vmem:[%s10314_s19 + $0x308] sm:$0xff]  ;;  %v8933_v0 = vcombine.low %v970_v36, %v978_v39  ;;  %v9205_v16 = vcombine.low %v1242_v59, %v1250_v63  ;;  %vm838_vm14 = vcmp.gt.f32.partialorder %v10495_v41, 0.0 }
  0xff   : > { %v860_v47 = vsel %vm828_vm4, %v575_v33, %v844_v40  ;;  %v1226_v40 = vld [vmem:[%s10314_s19 + $0xa88] sm:$0xff]  ;;  %v8949_v15 = vcombine.low %v986_v57, %v994_v58 }
 0x100   : > { %v10500_v62 = vpack.c.bf16 %v860_v47, %v860_v47  ;;  %v8934_v47 = vcombine.high %v970_v36, %v978_v39  ;;  %v1266_v14 = vld [vmem:[%s10314_s19 + $0xbc8] sm:$0xff] }
 0x101   : > { %v10502_v50 = vpop.f32.mrb[8].mxu1  ;;  %v1042_v36 = vld [vmem:[%s10314_s19 + $0x4c8] sm:$0xff] }
 0x102   : > { %v10504_v51 = vpop.f32.mrb[9].mxu1  ;;  %7282 = vmatprep.mubr.bf16.mxu0 %v10500_v62  ;;  %7610 = vmatprep.mubr.bf16.mxu1 %v10500_v62  ;;  %v1290_v39 = vld [vmem:[%s10314_s19 + $0xc88] sm:$0xff] }
 0x103   : > { %v617_v52 = vpop.f32.mrb[10].mxu1 }
 0x104   : > { %7253 = vmatpush1.bf16.xpose.msra.mxu0 %v8869_v60  ;;  %7581 = vmatpush1.bf16.xpose.msra.mxu1 %v9125_v61  ;;  %v618_v53 = vpop.f32.mrb[11].mxu1  ;;  %v9190_v60 = vcombine.high %v1226_v40, %v1234_v42 }
 0x105   : > { %7254 = vmatprep.subr.bf16.mxu0 %v8886_v48  ;;  %7582 = vmatprep.subr.bf16.mxu1 %v9142_v49 }
 0x109   : > { %v10512_v8 = vpop.f32.mrb[12].mxu1 }
 0x10a   : > { %v10514_v9 = vpop.f32.mrb[13].mxu1 }
 0x10b   : > { %v658_v10 = vpop.f32.mrb[14].mxu1 }
 0x10c   : > { %7255 = vmatpush1.bf16.xpose.msra.mxu0 %v8885_v1  ;;  %7583 = vmatpush1.bf16.xpose.msra.mxu1 %v9141_v2  ;;  %v659_v13 = vpop.f32.mrb[15].mxu1  ;;  %v9189_v1 = vcombine.low %v1226_v40, %v1234_v42  ;;  %v8950_v2 = vcombine.high %v986_v57, %v994_v58  ;;  %v1010_v10 = vld [vmem:[%s10314_s19 + $0x3c8] sm:$0xff] }
 0x10d   : > { %7256 = vmatprep.subr.bf16.mxu0 %v8902_v4  ;;  %7584 = vmatprep.subr.bf16.mxu1 %v9158_v6  ;;  %v9206_v4 = vcombine.high %v1242_v59, %v1250_v63  ;;  %v1002_v6 = vld [vmem:[%s10314_s19 + $0x388] sm:$0xff] }
 0x10e   : > { %v1258_v13 = vld [vmem:[%s10314_s19 + $0xb88] sm:$0xff]  ;;  %v8966_v17 = vcombine.high %v1002_v6, %v1010_v10 }
 0x10f   : > { %v1298_v40 = vld [vmem:[%s10314_s19 + $0xcc8] sm:$0xff] }
 0x110   : > { %v1066_v58 = vld [vmem:[%s10314_s19 + $0x588] sm:$0xff] }
 0x111   : > { %v736_v28 = vpop.f32.mrb[16].mxu1  ;;  %v1074_v59 = vld [vmem:[%s10314_s19 + $0x5c8] sm:$0xff] }
 0x112   : > { %v10527_v29 = vadd.f32 %v736_v28, %v307_v18  ;;  %v738_v31 = vpop.f32.mrb[17].mxu1  ;;  %v9222_v18 = vcombine.high %v1258_v13, %v1266_v14  ;;  %v9221_v28 = vcombine.low %v1258_v13, %v1266_v14  ;;  %v1322_v63 = vld [vmem:[%s10314_s19 + $0xd88] sm:$0xff] }
 0x113   : > { %v10529_v32 = vadd.f32 %v738_v31, %v311_v20  ;;  %v740_v33 = vpop.f32.mrb[18].mxu1  ;;  %v1018_v20 = vld [vmem:[%s10314_s19 + $0x408] sm:$0xff] }
 0x114   : > { %7257 = vmatpush1.bf16.xpose.msra.mxu0 %v8901_v21  ;;  %7585 = vmatpush1.bf16.xpose.msra.mxu1 %v9157_v22  ;;  %v741_v35 = vpop.f32.mrb[19].mxu1  ;;  %v1026_v21 = vld [vmem:[%s10314_s19 + $0x448] sm:$0xff]  ;;  %vm835_vm13 = vcmp.gt.f32.partialorder %v10527_v29, 0.0 }
 0x115   : > { %7258 = vmatprep.subr.bf16.mxu0 %v8918_v25  ;;  %7586 = vmatprep.subr.bf16.mxu1 %v9174_v26  ;;  %v1274_v22 = vld [vmem:[%s10314_s19 + $0xc08] sm:$0xff]  ;;  %v8965_v26 = vcombine.low %v1002_v6, %v1010_v10  ;;  %v8982_v31 = vcombine.high %v1018_v20, %v1026_v21  ;;  %v8981_v42 = vcombine.low %v1018_v20, %v1026_v21  ;;  %vm836_vm12 = vcmp.gt.f32.partialorder %v10529_v32, 0.0 }
 0x116   : > { %v1282_v25 = vld [vmem:[%s10314_s19 + $0xc48] sm:$0xff] }
 0x117   : > { %v9238_v33 = vcombine.high %v1274_v22, %v1282_v25  ;;  %v1034_v35 = vld [vmem:[%s10314_s19 + $0x488] sm:$0xff] }
 0x118   : > { %v1082_v10 = vld [vmem:[%s10314_s19 + $0x608] sm:$0xff] }
 0x119   : > { %v818_v61 = vpop.f32.mrb[20].mxu1  ;;  %v1090_v13 = vld [vmem:[%s10314_s19 + $0x648] sm:$0xff] }
 0x11a   : > { %v10545_v5 = vadd.f32 %v818_v61, %v323_v43  ;;  %v820_v48 = vpop.f32.mrb[21].mxu1  ;;  %v9237_v43 = vcombine.low %v1274_v22, %v1282_v25  ;;  %v1314_v61 = vld [vmem:[%s10314_s19 + $0xd48] sm:$0xff] }
 0x11b   : > { %v10547_v49 = vadd.f32 %v820_v48, %v327_v44  ;;  %v822_v52 = vpop.f32.mrb[22].mxu1  ;;  %v8998_v44 = vcombine.high %v1034_v35, %v1042_v36  ;;  %v8997_v48 = vcombine.low %v1034_v35, %v1042_v36  ;;  %v1338_v14 = vld [vmem:[%s10314_s19 + $0xe08] sm:$0xff] }
 0x11c   : > { %7259 = vmatpush1.bf16.xpose.msra.mxu0 %v8917_v45  ;;  %7587 = vmatpush1.bf16.xpose.msra.mxu1 %v9173_v46  ;;  %v823_v53 = vpop.f32.mrb[23].mxu1  ;;  %v9254_v45 = vcombine.high %v1290_v39, %v1298_v40  ;;  %v1050_v46 = vld [vmem:[%s10314_s19 + $0x508] sm:$0xff]  ;;  %v9253_v52 = vcombine.low %v1290_v39, %v1298_v40  ;;  %vm839_vm2 = vcmp.gt.f32.partialorder %v10545_v5, 0.0 }
 0x11d   : > { %7260 = vmatprep.subr.bf16.mxu0 %v8934_v47  ;;  %7588 = vmatprep.subr.bf16.mxu1 %v9190_v60  ;;  %v1058_v47 = vld [vmem:[%s10314_s19 + $0x548] sm:$0xff]  ;;  %vm840_vm1 = vcmp.gt.f32.partialorder %v10547_v49, 0.0 }
 0x11e   : > { %v1306_v60 = vld [vmem:[%s10314_s19 + $0xd08] sm:$0xff]  ;;  %v9014_v53 = vcombine.high %v1050_v46, %v1058_v47 }
 0x11f   : > { %v9270_v57 = vcombine.high %v1306_v60, %v1314_v61  ;;  %v1098_v21 = vld [vmem:[%s10314_s19 + $0x688] sm:$0xff] }
 0x120   : > { %v1106_v22 = vld [vmem:[%s10314_s19 + $0x6c8] sm:$0xff] }
 0x121   : > { %v1354_v25 = vld [vmem:[%s10314_s19 + $0xe88] sm:$0xff] }
 0x122   : > { %v1114_v36 = vld [vmem:[%s10314_s19 + $0x708] sm:$0xff] }
 0x123   : > { %v1122_v39 = vld [vmem:[%s10314_s19 + $0x748] sm:$0xff] }
 0x124   : > { %7261 = vmatpush1.bf16.xpose.msra.mxu0 %v8933_v0  ;;  %7589 = vmatpush1.bf16.xpose.msra.mxu1 %v9189_v1  ;;  %v1330_v0 = vld [vmem:[%s10314_s19 + $0xdc8] sm:$0xff]  ;;  %v9013_v1 = vcombine.low %v1050_v46, %v1058_v47 }
 0x125   : > { %7262 = vmatprep.subr.bf16.mxu0 %v8950_v2  ;;  %7590 = vmatprep.subr.bf16.mxu1 %v9206_v4  ;;  %v9269_v2 = vcombine.low %v1306_v60, %v1314_v61  ;;  %v9030_v4 = vcombine.high %v1066_v58, %v1074_v59  ;;  %v9286_v6 = vcombine.high %v1322_v63, %v1330_v0  ;;  %v1370_v40 = vld [vmem:[%s10314_s19 + $0xf08] sm:$0xff] }
 0x126   : > { %v1130_v47 = vld [vmem:[%s10314_s19 + $0x788] sm:$0xff] }
 0x127   : > { %v1138_v60 = vld [vmem:[%s10314_s19 + $0x7c8] sm:$0xff] }
 0x128   : > { %v1386_v61 = vld [vmem:[%s10314_s19 + $0xf88] sm:$0xff] }
 0x12c   : > { %7263 = vmatpush1.bf16.xpose.msra.mxu0 %v8949_v15  ;;  %7591 = vmatpush1.bf16.xpose.msra.mxu1 %v9205_v16  ;;  %v1346_v15 = vld [vmem:[%s10314_s19 + $0xe48] sm:$0xff]  ;;  %v9029_v16 = vcombine.low %v1066_v58, %v1074_v59  ;;  %v275_v59 = vrot.slane %v10440_v55, %v10517_v12 }
 0x12d   : > { %7264 = vmatprep.subr.bf16.mxu0 %v8966_v17  ;;  %7592 = vmatprep.subr.bf16.mxu1 %v9222_v18  ;;  %v9285_v17 = vcombine.low %v1322_v63, %v1330_v0  ;;  %v9046_v18 = vcombine.high %v1082_v10, %v1090_v13  ;;  %v9302_v20 = vcombine.high %v1338_v14, %v1346_v15  ;;  %v891_v0 = vld [vmem:[%s10314_s19 + $0x10] sm:$0xff] }
 0x12e   : > { %v287_v63 = vrot.slane %v10440_v55, %v10473_v23 }
 0x134   : > { %7265 = vmatpush1.bf16.xpose.msra.mxu0 %v8965_v26  ;;  %7593 = vmatpush1.bf16.xpose.msra.mxu1 %v9221_v28  ;;  %v1362_v26 = vld [vmem:[%s10314_s19 + $0xec8] sm:$0xff]  ;;  %v9045_v28 = vcombine.low %v1082_v10, %v1090_v13  ;;  %v616_v10 = vadd.f32 %v10504_v51, %v287_v63  ;;  %v9093_v13 = vcombine.low %v1130_v47, %v1138_v60  ;;  %v1163_v51 = vld [vmem:[%s10314_s19 + $0x890] sm:$0xff] }
 0x135   : > { %7266 = vmatprep.subr.bf16.mxu0 %v8982_v31  ;;  %7594 = vmatprep.subr.bf16.mxu1 %v9238_v33  ;;  %v9301_v31 = vcombine.low %v1338_v14, %v1346_v15  ;;  %v9062_v33 = vcombine.high %v1098_v21, %v1106_v22  ;;  %v9318_v35 = vcombine.high %v1354_v25, %v1362_v26  ;;  %v955_v63 = vld [vmem:[%s10314_s19 + $0x210] sm:$0xff] }
 0x136   : > { %vm830_vm6 = vcmp.gt.f32.partialorder %v616_v10, 0.0 }
 0x13c   : > { %7267 = vmatpush1.bf16.xpose.msra.mxu0 %v8981_v42  ;;  %7595 = vmatpush1.bf16.xpose.msra.mxu1 %v9237_v43  ;;  %v1378_v42 = vld [vmem:[%s10314_s19 + $0xf48] sm:$0xff]  ;;  %v9061_v43 = vcombine.low %v1098_v21, %v1106_v22  ;;  %v915_v22 = vld [vmem:[%s10314_s19 + $0xd0] sm:$0xff] }
 0x13d   : > { %7268 = vmatprep.subr.bf16.mxu0 %v8998_v44  ;;  %7596 = vmatprep.subr.bf16.mxu1 %v9254_v45  ;;  %v9317_v44 = vcombine.low %v1354_v25, %v1362_v26  ;;  %v9078_v45 = vcombine.high %v1114_v36, %v1122_v39  ;;  %v9334_v46 = vcombine.high %v1370_v40, %v1378_v42  ;;  %v1171_v25 = vld [vmem:[%s10314_s19 + $0x8d0] sm:$0xff] }
 0x144   : > { %7269 = vmatpush1.bf16.xpose.msra.mxu0 %v8997_v48  ;;  %7597 = vmatpush1.bf16.xpose.msra.mxu1 %v9253_v52  ;;  %v1394_v48 = vld [vmem:[%s10314_s19 + $0xfc8] sm:$0xff]  ;;  %v9077_v52 = vcombine.low %v1114_v36, %v1122_v39  ;;  %v9128_v36 = vcombine.high %v1163_v51, %v1171_v25  ;;  %v923_v39 = vld [vmem:[%s10314_s19 + $0x110] sm:$0xff] }
 0x145   : > { %7270 = vmatprep.subr.bf16.mxu0 %v9014_v53  ;;  %7598 = vmatprep.subr.bf16.mxu1 %v9270_v57  ;;  %v9333_v53 = vcombine.low %v1370_v40, %v1378_v42  ;;  %v9094_v57 = vcombine.high %v1130_v47, %v1138_v60  ;;  %v9350_v58 = vcombine.high %v1386_v61, %v1394_v48  ;;  %v931_v40 = vld [vmem:[%s10314_s19 + $0x150] sm:$0xff] }
 0x146   : > { %v9349_v14 = vcombine.low %v1386_v61, %v1394_v48  ;;  %v1179_v42 = vld [vmem:[%s10314_s19 + $0x910] sm:$0xff] }
 0x147   : > { %v939_v60 = vld [vmem:[%s10314_s19 + $0x190] sm:$0xff] }
 0x148   : > { %v947_v61 = vld [vmem:[%s10314_s19 + $0x1d0] sm:$0xff] }
 0x149   : > { %v1195_v48 = vld [vmem:[%s10314_s19 + $0x990] sm:$0xff] }
 0x14c   : > { %7271 = vmatpush1.bf16.xpose.msra.mxu0 %v9013_v1  ;;  %7599 = vmatpush1.bf16.xpose.msra.mxu1 %v9269_v2  ;;  %v573_v1 = vadd.f32 %v10481_v30, %v275_v59  ;;  %v899_v2 = vld [vmem:[%s10314_s19 + $0x50] sm:$0xff] }
 0x14d   : > { %7272 = vmatprep.subr.bf16.mxu0 %v9030_v4  ;;  %7600 = vmatprep.subr.bf16.mxu1 %v9286_v6  ;;  %v1147_v4 = vld [vmem:[%s10314_s19 + $0x810] sm:$0xff]  ;;  %v8856_v15 = vcombine.high %v891_v0, %v899_v2  ;;  %v8855_v26 = vcombine.low %v891_v0, %v899_v2 }
 0x14e   : > { %v1155_v6 = vld [vmem:[%s10314_s19 + $0x850] sm:$0xff]  ;;  %vm827_vm5 = vcmp.gt.f32.partialorder %v573_v1, 0.0 }
 0x14f   : > { %v963_v0 = vld [vmem:[%s10314_s19 + $0x250] sm:$0xff] }
 0x150   : > { %v1219_v2 = vld [vmem:[%s10314_s19 + $0xa50] sm:$0xff] }
 0x154   : > { %7273 = vmatpush1.bf16.xpose.msra.mxu0 %v9029_v16  ;;  %7601 = vmatpush1.bf16.xpose.msra.mxu1 %v9285_v17  ;;  %v9112_v16 = vcombine.high %v1147_v4, %v1155_v6  ;;  %v843_v17 = vmul.f32 0.1, %v573_v1 }
 0x155   : > { %7274 = vmatprep.subr.bf16.mxu0 %v9046_v18  ;;  %7602 = vmatprep.subr.bf16.mxu1 %v9302_v20  ;;  %v846_v18 = vmul.f32 0.1, %v616_v10  ;;  %v907_v20 = vld [vmem:[%s10314_s19 + $0x90] sm:$0xff] }
 0x156   : > { %v859_v30 = vsel %vm827_vm5, %v573_v1, %v843_v17  ;;  %v1211_v1 = vld [vmem:[%s10314_s19 + $0xa10] sm:$0xff] }
 0x157   : > { %v862_v21 = vsel %vm830_vm6, %v616_v10, %v846_v18  ;;  %v8920_v10 = vcombine.high %v955_v63, %v963_v0  ;;  %v1235_v17 = vld [vmem:[%s10314_s19 + $0xad0] sm:$0xff]  ;;  %v8919_v18 = vcombine.low %v955_v63, %v963_v0 }
 0x158   : > { %v1035_v0 = vld [vmem:[%s10314_s19 + $0x490] sm:$0xff] }
 0x15c   : > { %7275 = vmatpush1.bf16.xpose.msra.mxu0 %v9045_v28  ;;  %7603 = vmatpush1.bf16.xpose.msra.mxu1 %v9301_v31  ;;  %v10603_v28 = vpack.c.bf16 %v859_v30, %v859_v30  ;;  %v9111_v31 = vcombine.low %v1147_v4, %v1155_v6  ;;  %v8903_v4 = vcombine.low %v939_v60, %v947_v61 }
 0x15d   : > { %7276 = vmatprep.subr.bf16.mxu0 %v9062_v33  ;;  %7604 = vmatprep.subr.bf16.mxu1 %v9318_v35  ;;  %v10605_v33 = vpack.c.bf16 %v862_v21, %v862_v21  ;;  %v8872_v35 = vcombine.high %v907_v20, %v915_v22  ;;  %v9175_v30 = vcombine.low %v1211_v1, %v1219_v2 }
 0x164   : > { %7277 = vmatpush1.bf16.xpose.msra.mxu0 %v9061_v43  ;;  %7605 = vmatpush1.bf16.xpose.msra.mxu1 %v9317_v44  ;;  %v1187_v43 = vld [vmem:[%s10314_s19 + $0x950] sm:$0xff]  ;;  %v8871_v44 = vcombine.low %v907_v20, %v915_v22 }
 0x165   : > { %7278 = vmatprep.subr.bf16.mxu0 %v9078_v45  ;;  %7606 = vmatprep.subr.bf16.mxu1 %v9334_v46  ;;  %v9127_v45 = vcombine.low %v1163_v51, %v1171_v25  ;;  %v8888_v46 = vcombine.high %v923_v39, %v931_v40  ;;  %v9144_v47 = vcombine.high %v1179_v42, %v1187_v43  ;;  %v987_v22 = vld [vmem:[%s10314_s19 + $0x310] sm:$0xff] }
 0x166   : > { %v995_v51 = vld [vmem:[%s10314_s19 + $0x350] sm:$0xff] }
 0x167   : > { %v1243_v25 = vld [vmem:[%s10314_s19 + $0xb10] sm:$0xff] }
 0x16c   : > { %7279 = vmatpush1.bf16.xpose.msra.mxu0 %v9077_v52  ;;  %7607 = vmatpush1.bf16.xpose.msra.mxu1 %v9333_v53  ;;  %v1203_v52 = vld [vmem:[%s10314_s19 + $0x9d0] sm:$0xff]  ;;  %v8887_v53 = vcombine.low %v923_v39, %v931_v40 }
 0x16d   : > { %7280 = vmatprep.subr.bf16.mxu0 %v9094_v57  ;;  %7608 = vmatprep.subr.bf16.mxu1 %v9350_v58  ;;  %v9143_v57 = vcombine.low %v1179_v42, %v1187_v43  ;;  %v8904_v58 = vcombine.high %v939_v60, %v947_v61  ;;  %v9160_v59 = vcombine.high %v1195_v48, %v1203_v52  ;;  %v1003_v40 = vld [vmem:[%s10314_s19 + $0x390] sm:$0xff] }
 0x16e   : > { %v9159_v6 = vcombine.low %v1195_v48, %v1203_v52  ;;  %v1011_v42 = vld [vmem:[%s10314_s19 + $0x3d0] sm:$0xff] }
 0x16f   : > { %v1259_v43 = vld [vmem:[%s10314_s19 + $0xb90] sm:$0xff] }
 0x170   : > { %v1019_v61 = vld [vmem:[%s10314_s19 + $0x410] sm:$0xff] }
 0x171   : > { %v1027_v48 = vld [vmem:[%s10314_s19 + $0x450] sm:$0xff] }
 0x172   : > { %v1275_v52 = vld [vmem:[%s10314_s19 + $0xc10] sm:$0xff] }
 0x174   : > { %7281 = vmatpush1.bf16.xpose.msra.mxu0 %v9093_v13  ;;  %7609 = vmatpush1.bf16.xpose.msra.mxu1 %v9349_v14  ;;  %v9176_v13 = vcombine.high %v1211_v1, %v1219_v2  ;;  %v971_v14 = vld [vmem:[%s10314_s19 + $0x290] sm:$0xff] }
 0x175   : > { %7291 = vmatprep.subr.bf16.mxu0 %v8856_v15  ;;  %7619 = vmatprep.subr.bf16.mxu1 %v9112_v16  ;;  %v979_v15 = vld [vmem:[%s10314_s19 + $0x2d0] sm:$0xff] }
 0x176   : > { %v1227_v16 = vld [vmem:[%s10314_s19 + $0xa90] sm:$0xff]  ;;  %v8936_v20 = vcombine.high %v971_v14, %v979_v15 }
 0x177   : > { %v9192_v21 = vcombine.high %v1227_v16, %v1235_v17  ;;  %v1043_v1 = vld [vmem:[%s10314_s19 + $0x4d0] sm:$0xff] }
 0x178   : > { %v1291_v2 = vld [vmem:[%s10314_s19 + $0xc90] sm:$0xff] }
 0x17b   : > { %7283 = vmatmul.mubr.bf16.vlgmr.msra.gmra.mrb[8].mxu0 %v10603_v28  ;;  %7611 = vmatmul.mubr.bf16.vlgmr.msra.gmra.mrb[24].mxu1 %v10603_v28 }
 0x17c   : > { %7292 = vmatpush1.bf16.xpose.msra.mxu0 %v8855_v26  ;;  %7323 = vmatprep.mubr.bf16.mxu0 %v10605_v33  ;;  %v1251_v26 = vld [vmem:[%s10314_s19 + $0xb50] sm:$0xff] }
 0x17d   : > { %7620 = vmatpush1.bf16.xpose.msra.mxu1 %v9111_v31  ;;  %7651 = vmatprep.mubr.bf16.mxu1 %v10605_v33  ;;  %v8935_v31 = vcombine.low %v971_v14, %v979_v15  ;;  %v9208_v39 = vcombine.high %v1243_v25, %v1251_v26  ;;  %v1051_v15 = vld [vmem:[%s10314_s19 + $0x510] sm:$0xff] }
 0x17e   : > { %7293 = vmatprep.subr.bf16.mxu0 %v8872_v35  ;;  %7621 = vmatprep.subr.bf16.mxu1 %v9128_v36  ;;  %v9191_v35 = vcombine.low %v1227_v16, %v1235_v17  ;;  %v8952_v36 = vcombine.high %v987_v22, %v995_v51  ;;  %v1059_v16 = vld [vmem:[%s10314_s19 + $0x550] sm:$0xff] }
 0x17f   : > { %v1307_v17 = vld [vmem:[%s10314_s19 + $0xd10] sm:$0xff] }
 0x184   : > { %7294 = vmatpush1.bf16.xpose.msra.mxu0 %v8871_v44  ;;  %v1267_v44 = vld [vmem:[%s10314_s19 + $0xbd0] sm:$0xff] }
 0x185   : > { %7622 = vmatpush1.bf16.xpose.msra.mxu1 %v9127_v45  ;;  %7295 = vmatprep.subr.bf16.mxu0 %v8888_v46  ;;  %v8951_v45 = vcombine.low %v987_v22, %v995_v51  ;;  %v9207_v46 = vcombine.low %v1243_v25, %v1251_v26  ;;  %v9224_v60 = vcombine.high %v1259_v43, %v1267_v44  ;;  %v1067_v51 = vld [vmem:[%s10314_s19 + $0x590] sm:$0xff] }
 0x186   : > { %7623 = vmatprep.subr.bf16.mxu1 %v9144_v47  ;;  %v8968_v47 = vcombine.high %v1003_v40, %v1011_v42  ;;  %v1075_v25 = vld [vmem:[%s10314_s19 + $0x5d0] sm:$0xff] }
 0x187   : > { %v1323_v26 = vld [vmem:[%s10314_s19 + $0xd90] sm:$0xff] }
 0x18c   : > { %7296 = vmatpush1.bf16.xpose.msra.mxu0 %v8887_v53  ;;  %v1283_v53 = vld [vmem:[%s10314_s19 + $0xc50] sm:$0xff] }
 0x18d   : > { %7624 = vmatpush1.bf16.xpose.msra.mxu1 %v9143_v57  ;;  %7297 = vmatprep.subr.bf16.mxu0 %v8904_v58  ;;  %v8967_v57 = vcombine.low %v1003_v40, %v1011_v42  ;;  %v9223_v58 = vcombine.low %v1259_v43, %v1267_v44  ;;  %v9240_v63 = vcombine.high %v1275_v52, %v1283_v53  ;;  %v1083_v42 = vld [vmem:[%s10314_s19 + $0x610] sm:$0xff] }
 0x18e   : > { %7625 = vmatprep.subr.bf16.mxu1 %v9160_v59  ;;  %v8984_v59 = vcombine.high %v1019_v61, %v1027_v48  ;;  %v1091_v43 = vld [vmem:[%s10314_s19 + $0x650] sm:$0xff] }
 0x18f   : > { %v1339_v44 = vld [vmem:[%s10314_s19 + $0xe10] sm:$0xff] }
 0x194   : > { %7298 = vmatpush1.bf16.xpose.msra.mxu0 %v8903_v4  ;;  %v1299_v4 = vld [vmem:[%s10314_s19 + $0xcd0] sm:$0xff] }
 0x195   : > { %7626 = vmatpush1.bf16.xpose.msra.mxu1 %v9159_v6  ;;  %7299 = vmatprep.subr.bf16.mxu0 %v8920_v10  ;;  %v8983_v6 = vcombine.low %v1019_v61, %v1027_v48  ;;  %v9239_v10 = vcombine.low %v1275_v52, %v1283_v53  ;;  %v9256_v14 = vcombine.high %v1291_v2, %v1299_v4  ;;  %v1099_v48 = vld [vmem:[%s10314_s19 + $0x690] sm:$0xff] }
 0x196   : > { %7627 = vmatprep.subr.bf16.mxu1 %v9176_v13  ;;  %v9000_v13 = vcombine.high %v1035_v0, %v1043_v1  ;;  %v1107_v52 = vld [vmem:[%s10314_s19 + $0x6d0] sm:$0xff] }
 0x197   : > { %v1355_v53 = vld [vmem:[%s10314_s19 + $0xe90] sm:$0xff] }
 0x19c   : > { %7300 = vmatpush1.bf16.xpose.msra.mxu0 %v8919_v18  ;;  %v1315_v18 = vld [vmem:[%s10314_s19 + $0xd50] sm:$0xff] }
 0x19d   : > { %7628 = vmatpush1.bf16.xpose.msra.mxu1 %v9175_v30  ;;  %7301 = vmatprep.subr.bf16.mxu0 %v8936_v20  ;;  %v8999_v30 = vcombine.low %v1035_v0, %v1043_v1  ;;  %v9255_v20 = vcombine.low %v1291_v2, %v1299_v4  ;;  %v9272_v22 = vcombine.high %v1307_v17, %v1315_v18  ;;  %v1115_v1 = vld [vmem:[%s10314_s19 + $0x710] sm:$0xff] }
 0x19e   : > { %7629 = vmatprep.subr.bf16.mxu1 %v9192_v21  ;;  %v9016_v21 = vcombine.high %v1051_v15, %v1059_v16  ;;  %v1123_v2 = vld [vmem:[%s10314_s19 + $0x750] sm:$0xff] }
 0x19f   : > { %v1371_v4 = vld [vmem:[%s10314_s19 + $0xf10] sm:$0xff] }
 0x1a4   : > { %7302 = vmatpush1.bf16.xpose.msra.mxu0 %v8935_v31  ;;  %v1331_v31 = vld [vmem:[%s10314_s19 + $0xdd0] sm:$0xff] }
 0x1a5   : > { %7630 = vmatpush1.bf16.xpose.msra.mxu1 %v9191_v35  ;;  %7303 = vmatprep.subr.bf16.mxu0 %v8952_v36  ;;  %v9015_v35 = vcombine.low %v1051_v15, %v1059_v16  ;;  %v9271_v36 = vcombine.low %v1307_v17, %v1315_v18  ;;  %v9288_v40 = vcombine.high %v1323_v26, %v1331_v31  ;;  %v1131_v16 = vld [vmem:[%s10314_s19 + $0x790] sm:$0xff] }
 0x1a6   : > { %7631 = vmatprep.subr.bf16.mxu1 %v9208_v39  ;;  %v9032_v39 = vcombine.high %v1067_v51, %v1075_v25  ;;  %v1139_v17 = vld [vmem:[%s10314_s19 + $0x7d0] sm:$0xff] }
 0x1a7   : > { %v1387_v18 = vld [vmem:[%s10314_s19 + $0xf90] sm:$0xff] }
 0x1ac   : > { %7304 = vmatpush1.bf16.xpose.msra.mxu0 %v8951_v45  ;;  %v1347_v45 = vld [vmem:[%s10314_s19 + $0xe50] sm:$0xff] }
 0x1ad   : > { %7632 = vmatpush1.bf16.xpose.msra.mxu1 %v9207_v46  ;;  %7305 = vmatprep.subr.bf16.mxu0 %v8968_v47  ;;  %v9031_v46 = vcombine.low %v1067_v51, %v1075_v25  ;;  %v9287_v47 = vcombine.low %v1323_v26, %v1331_v31  ;;  %v9304_v61 = vcombine.high %v1339_v44, %v1347_v45 }
 0x1ae   : > { %7633 = vmatprep.subr.bf16.mxu1 %v9224_v60  ;;  %v9048_v60 = vcombine.high %v1083_v42, %v1091_v43  ;;  %v283_v51 = vrot.slane %v10440_v55, %v10468_v19  ;;  %v295_v26 = vrot.slane %v10440_v55, %v10536_v38 }
 0x1b0   : > { %v614_v31 = vadd.f32 %v10502_v50, %v283_v51 }
 0x1b2   : > { %v845_v55 = vmul.f32 0.1, %v614_v31  ;;  %vm829_vm7 = vcmp.gt.f32.partialorder %v614_v31, 0.0 }
 0x1b4   : > { %7306 = vmatpush1.bf16.xpose.msra.mxu0 %v8967_v57  ;;  %v1363_v57 = vld [vmem:[%s10314_s19 + $0xed0] sm:$0xff]  ;;  %v861_v50 = vsel %vm829_vm7, %v614_v31, %v845_v55  ;;  %v1212_v31 = vld [vmem:[%s10314_s19 + $0xa18] sm:$0xff] }
 0x1b5   : > { %7634 = vmatpush1.bf16.xpose.msra.mxu1 %v9223_v58  ;;  %7307 = vmatprep.subr.bf16.mxu0 %v8984_v59  ;;  %v9047_v58 = vcombine.low %v1083_v42, %v1091_v43  ;;  %v9303_v59 = vcombine.low %v1339_v44, %v1347_v45  ;;  %v9320_v0 = vcombine.high %v1355_v53, %v1363_v57  ;;  %v1236_v55 = vld [vmem:[%s10314_s19 + $0xad8] sm:$0xff] }
 0x1b6   : > { %7635 = vmatprep.subr.bf16.mxu1 %v9240_v63  ;;  %v9064_v63 = vcombine.high %v1099_v48, %v1107_v52  ;;  %v657_v42 = vadd.f32 %v10514_v9, %v295_v26  ;;  %v9095_v43 = vcombine.low %v1131_v16, %v1139_v17  ;;  %v964_v26 = vld [vmem:[%s10314_s19 + $0x258] sm:$0xff] }
 0x1b8   : > { %vm832_vm8 = vcmp.gt.f32.partialorder %v657_v42, 0.0 }
 0x1bc   : > { %7308 = vmatpush1.bf16.xpose.msra.mxu0 %v8983_v6  ;;  %v1379_v6 = vld [vmem:[%s10314_s19 + $0xf50] sm:$0xff] }
 0x1bd   : > { %7636 = vmatpush1.bf16.xpose.msra.mxu1 %v9239_v10  ;;  %7309 = vmatprep.subr.bf16.mxu0 %v9000_v13  ;;  %v9063_v10 = vcombine.low %v1099_v48, %v1107_v52  ;;  %v9319_v13 = vcombine.low %v1355_v53, %v1363_v57  ;;  %v9336_v15 = vcombine.high %v1371_v4, %v1379_v6  ;;  %v1164_v52 = vld [vmem:[%s10314_s19 + $0x898] sm:$0xff] }
 0x1be   : > { %7637 = vmatprep.subr.bf16.mxu1 %v9256_v14  ;;  %v9080_v14 = vcombine.high %v1115_v1, %v1123_v2  ;;  %v1172_v53 = vld [vmem:[%s10314_s19 + $0x8d8] sm:$0xff]  ;;  %v10681_v57 = vpack.c.bf16 %v861_v50, %v861_v50 }
 0x1c4   : > { %7310 = vmatpush1.bf16.xpose.msra.mxu0 %v8999_v30  ;;  %v1395_v30 = vld [vmem:[%s10314_s19 + $0xfd0] sm:$0xff] }
 0x1c5   : > { %7638 = vmatpush1.bf16.xpose.msra.mxu1 %v9255_v20  ;;  %7311 = vmatprep.subr.bf16.mxu0 %v9016_v21  ;;  %v9079_v20 = vcombine.low %v1115_v1, %v1123_v2  ;;  %v9335_v21 = vcombine.low %v1371_v4, %v1379_v6  ;;  %v9352_v25 = vcombine.high %v1387_v18, %v1395_v30  ;;  %v924_v1 = vld [vmem:[%s10314_s19 + $0x118] sm:$0xff] }
 0x1c6   : > { %7639 = vmatprep.subr.bf16.mxu1 %v9272_v22  ;;  %v9096_v22 = vcombine.high %v1131_v16, %v1139_v17  ;;  %v9351_v44 = vcombine.low %v1387_v18, %v1395_v30  ;;  %v932_v2 = vld [vmem:[%s10314_s19 + $0x158] sm:$0xff] }
 0x1c7   : > { %v1180_v4 = vld [vmem:[%s10314_s19 + $0x918] sm:$0xff] }
 0x1c8   : > { %v1188_v6 = vld [vmem:[%s10314_s19 + $0x958] sm:$0xff] }
 0x1c9   : > { %v940_v16 = vld [vmem:[%s10314_s19 + $0x198] sm:$0xff] }
 0x1ca   : > { %v948_v17 = vld [vmem:[%s10314_s19 + $0x1d8] sm:$0xff] }
 0x1cb   : > { %v1196_v18 = vld [vmem:[%s10314_s19 + $0x998] sm:$0xff] }
 0x1cc   : > { %7312 = vmatpush1.bf16.xpose.msra.mxu0 %v9015_v35  ;;  %v892_v35 = vld [vmem:[%s10314_s19 + $0x18] sm:$0xff] }
 0x1cd   : > { %7640 = vmatpush1.bf16.xpose.msra.mxu1 %v9271_v36  ;;  %7313 = vmatprep.subr.bf16.mxu0 %v9032_v39  ;;  %v900_v36 = vld [vmem:[%s10314_s19 + $0x58] sm:$0xff] }
 0x1ce   : > { %7641 = vmatprep.subr.bf16.mxu1 %v9288_v40  ;;  %v1148_v39 = vld [vmem:[%s10314_s19 + $0x818] sm:$0xff]  ;;  %v8858_v45 = vcombine.high %v892_v35, %v900_v36  ;;  %v8857_v9 = vcombine.low %v892_v35, %v900_v36  ;;  %v8905_v36 = vcombine.low %v940_v16, %v948_v17 }
 0x1cf   : > { %v1156_v40 = vld [vmem:[%s10314_s19 + $0x858] sm:$0xff] }
 0x1d0   : > { %v1204_v30 = vld [vmem:[%s10314_s19 + $0x9d8] sm:$0xff] }
 0x1d1   : > { %v9162_v51 = vcombine.high %v1196_v18, %v1204_v30  ;;  %v1220_v35 = vld [vmem:[%s10314_s19 + $0xa58] sm:$0xff] }
 0x1d4   : > { %7314 = vmatpush1.bf16.xpose.msra.mxu0 %v9031_v46  ;;  %v9114_v46 = vcombine.high %v1148_v39, %v1156_v40 }
 0x1d5   : > { %7642 = vmatpush1.bf16.xpose.msra.mxu1 %v9287_v47  ;;  %7315 = vmatprep.subr.bf16.mxu0 %v9048_v60  ;;  %v848_v47 = vmul.f32 0.1, %v657_v42  ;;  %v908_v60 = vld [vmem:[%s10314_s19 + $0x98] sm:$0xff] }
 0x1d6   : > { %7643 = vmatprep.subr.bf16.mxu1 %v9304_v61  ;;  %v916_v61 = vld [vmem:[%s10314_s19 + $0xd8] sm:$0xff] }
 0x1d7   : > { %v864_v48 = vsel %vm832_vm8, %v657_v42, %v848_v47  ;;  %v9178_v42 = vcombine.high %v1212_v31, %v1220_v35  ;;  %v9177_v47 = vcombine.low %v1212_v31, %v1220_v35  ;;  %v1292_v31 = vld [vmem:[%s10314_s19 + $0xc98] sm:$0xff] }
 0x1d8   : > { %v1300_v35 = vld [vmem:[%s10314_s19 + $0xcd8] sm:$0xff] }
 0x1dc   : > { %7316 = vmatpush1.bf16.xpose.msra.mxu0 %v9047_v58  ;;  %v9113_v58 = vcombine.low %v1148_v39, %v1156_v40  ;;  %v9161_v39 = vcombine.low %v1196_v18, %v1204_v30  ;;  %v1276_v18 = vld [vmem:[%s10314_s19 + $0xc18] sm:$0xff] }
 0x1dd   : > { %7644 = vmatpush1.bf16.xpose.msra.mxu1 %v9303_v59  ;;  %7317 = vmatprep.subr.bf16.mxu0 %v9064_v63  ;;  %v8874_v59 = vcombine.high %v908_v60, %v916_v61  ;;  %v10683_v63 = vpack.c.bf16 %v864_v48, %v864_v48  ;;  %v996_v48 = vld [vmem:[%s10314_s19 + $0x358] sm:$0xff] }
 0x1de   : > { %7645 = vmatprep.subr.bf16.mxu1 %v9320_v0  ;;  %v9130_v0 = vcombine.high %v1164_v52, %v1172_v53  ;;  %v1284_v30 = vld [vmem:[%s10314_s19 + $0xc58] sm:$0xff] }
 0x1e4   : > { %7318 = vmatpush1.bf16.xpose.msra.mxu0 %v9063_v10  ;;  %v8873_v10 = vcombine.low %v908_v60, %v916_v61  ;;  %v988_v61 = vld [vmem:[%s10314_s19 + $0x318] sm:$0xff] }
 0x1e5   : > { %7646 = vmatpush1.bf16.xpose.msra.mxu1 %v9319_v13  ;;  %7319 = vmatprep.subr.bf16.mxu0 %v9080_v14  ;;  %v9129_v13 = vcombine.low %v1164_v52, %v1172_v53  ;;  %v8890_v14 = vcombine.high %v924_v1, %v932_v2  ;;  %v1252_v52 = vld [vmem:[%s10314_s19 + $0xb58] sm:$0xff] }
 0x1e6   : > { %7647 = vmatprep.subr.bf16.mxu1 %v9336_v15  ;;  %v9146_v15 = vcombine.high %v1180_v4, %v1188_v6 }
 0x1ec   : > { %7320 = vmatpush1.bf16.xpose.msra.mxu0 %v9079_v20  ;;  %v8889_v20 = vcombine.low %v924_v1, %v932_v2  ;;  %v1004_v1 = vld [vmem:[%s10314_s19 + $0x398] sm:$0xff] }
 0x1ed   : > { %7648 = vmatpush1.bf16.xpose.msra.mxu1 %v9335_v21  ;;  %7321 = vmatprep.subr.bf16.mxu0 %v9096_v22  ;;  %v9145_v21 = vcombine.low %v1180_v4, %v1188_v6  ;;  %v8906_v22 = vcombine.high %v940_v16, %v948_v17  ;;  %v1012_v2 = vld [vmem:[%s10314_s19 + $0x3d8] sm:$0xff] }
 0x1ee   : > { %7649 = vmatprep.subr.bf16.mxu1 %v9352_v25  ;;  %v956_v25 = vld [vmem:[%s10314_s19 + $0x218] sm:$0xff] }
 0x1ef   : > { %v8922_v40 = vcombine.high %v956_v25, %v964_v26  ;;  %v1260_v4 = vld [vmem:[%s10314_s19 + $0xb98] sm:$0xff] }
 0x1f0   : > { %v1268_v6 = vld [vmem:[%s10314_s19 + $0xbd8] sm:$0xff] }
 0x1f1   : > { %v1020_v16 = vld [vmem:[%s10314_s19 + $0x418] sm:$0xff] }
 0x1f2   : > { %v1028_v17 = vld [vmem:[%s10314_s19 + $0x458] sm:$0xff] }
 0x1f4   : > { %7322 = vmatpush1.bf16.xpose.msra.mxu0 %v9095_v43  ;;  %v972_v43 = vld [vmem:[%s10314_s19 + $0x298] sm:$0xff] }
 0x1f5   : > { %7650 = vmatpush1.bf16.xpose.msra.mxu1 %v9351_v44  ;;  %7332 = vmatprep.subr.bf16.mxu0 %v8858_v45  ;;  %v980_v44 = vld [vmem:[%s10314_s19 + $0x2d8] sm:$0xff] }
 0x1f6   : > { %7660 = vmatprep.subr.bf16.mxu1 %v9114_v46  ;;  %v1228_v45 = vld [vmem:[%s10314_s19 + $0xa98] sm:$0xff]  ;;  %v8921_v46 = vcombine.low %v956_v25, %v964_v26  ;;  %v8938_v50 = vcombine.high %v972_v43, %v980_v44  ;;  %v8937_v53 = vcombine.low %v972_v43, %v980_v44 }
 0x1f7   : > { %v9194_v60 = vcombine.high %v1228_v45, %v1236_v55  ;;  %v1036_v25 = vld [vmem:[%s10314_s19 + $0x498] sm:$0xff] }
 0x1f8   : > { %v1044_v26 = vld [vmem:[%s10314_s19 + $0x4d8] sm:$0xff] }
 0x1f9   : > { %v1052_v43 = vld [vmem:[%s10314_s19 + $0x518] sm:$0xff] }
 0x1fa   : > { %v1060_v44 = vld [vmem:[%s10314_s19 + $0x558] sm:$0xff] }
 0x1fb   : > { %7324 = vmatmul.mubr.bf16.vlgmr.msra.gmra.mrb[8].mxu0 %v10681_v57 }
 0x1fc   : > { %7652 = vmatmul.mubr.bf16.vlgmr.msra.gmra.mrb[24].mxu1 %v10681_v57  ;;  %7333 = vmatpush1.bf16.xpose.msra.mxu0 %v8857_v9  ;;  %v1244_v9 = vld [vmem:[%s10314_s19 + $0xb18] sm:$0xff] }
 0x1fd   : > { %7364 = vmatprep.mubr.bf16.mxu0 %v10683_v63  ;;  %7661 = vmatpush1.bf16.xpose.msra.mxu1 %v9113_v58  ;;  %v9193_v58 = vcombine.low %v1228_v45, %v1236_v55  ;;  %v1308_v45 = vld [vmem:[%s10314_s19 + $0xd18] sm:$0xff] }
 0x1fe   : > { %7692 = vmatprep.mubr.bf16.mxu1 %v10683_v63  ;;  %7334 = vmatprep.subr.bf16.mxu0 %v8874_v59  ;;  %v8954_v59 = vcombine.high %v988_v61, %v996_v48  ;;  %v1316_v55 = vld [vmem:[%s10314_s19 + $0xd58] sm:$0xff] }
 0x1ff   : > { %7662 = vmatprep.subr.bf16.mxu1 %v9130_v0  ;;  %v9210_v0 = vcombine.high %v1244_v9, %v1252_v52 }
 0x204   : > { %7335 = vmatpush1.bf16.xpose.msra.mxu0 %v8873_v10  ;;  %v8953_v10 = vcombine.low %v988_v61, %v996_v48  ;;  %v1068_v61 = vld [vmem:[%s10314_s19 + $0x598] sm:$0xff] }
 0x205   : > { %7663 = vmatpush1.bf16.xpose.msra.mxu1 %v9129_v13  ;;  %7336 = vmatprep.subr.bf16.mxu0 %v8890_v14  ;;  %v9209_v13 = vcombine.low %v1244_v9, %v1252_v52  ;;  %v8970_v14 = vcombine.high %v1004_v1, %v1012_v2  ;;  %v1076_v48 = vld [vmem:[%s10314_s19 + $0x5d8] sm:$0xff] }
 0x206   : > { %7664 = vmatprep.subr.bf16.mxu1 %v9146_v15  ;;  %v9226_v15 = vcombine.high %v1260_v4, %v1268_v6  ;;  %v1324_v9 = vld [vmem:[%s10314_s19 + $0xd98] sm:$0xff] }
 0x207   : > { %v1332_v52 = vld [vmem:[%s10314_s19 + $0xdd8] sm:$0xff] }
 0x20c   : > { %7337 = vmatpush1.bf16.xpose.msra.mxu0 %v8889_v20  ;;  %v8969_v20 = vcombine.low %v1004_v1, %v1012_v2  ;;  %v1084_v1 = vld [vmem:[%s10314_s19 + $0x618] sm:$0xff] }
 0x20d   : > { %7665 = vmatpush1.bf16.xpose.msra.mxu1 %v9145_v21  ;;  %7338 = vmatprep.subr.bf16.mxu0 %v8906_v22  ;;  %v9225_v21 = vcombine.low %v1260_v4, %v1268_v6  ;;  %v8986_v22 = vcombine.high %v1020_v16, %v1028_v17  ;;  %v1092_v2 = vld [vmem:[%s10314_s19 + $0x658] sm:$0xff] }
 0x20e   : > { %7666 = vmatprep.subr.bf16.mxu1 %v9162_v51  ;;  %v9242_v51 = vcombine.high %v1276_v18, %v1284_v30  ;;  %v1340_v4 = vld [vmem:[%s10314_s19 + $0xe18] sm:$0xff] }
 0x20f   : > { %v1348_v6 = vld [vmem:[%s10314_s19 + $0xe58] sm:$0xff] }
 0x214   : > { %7339 = vmatpush1.bf16.xpose.msra.mxu0 %v8905_v36  ;;  %v8985_v36 = vcombine.low %v1020_v16, %v1028_v17  ;;  %v1100_v16 = vld [vmem:[%s10314_s19 + $0x698] sm:$0xff] }
 0x215   : > { %7667 = vmatpush1.bf16.xpose.msra.mxu1 %v9161_v39  ;;  %7340 = vmatprep.subr.bf16.mxu0 %v8922_v40  ;;  %v9241_v39 = vcombine.low %v1276_v18, %v1284_v30  ;;  %v9002_v40 = vcombine.high %v1036_v25, %v1044_v26  ;;  %v1108_v17 = vld [vmem:[%s10314_s19 + $0x6d8] sm:$0xff] }
 0x216   : > { %7668 = vmatprep.subr.bf16.mxu1 %v9178_v42  ;;  %v9258_v42 = vcombine.high %v1292_v31, %v1300_v35  ;;  %v1356_v18 = vld [vmem:[%s10314_s19 + $0xe98] sm:$0xff] }
 0x217   : > { %v1364_v30 = vld [vmem:[%s10314_s19 + $0xed8] sm:$0xff] }
 0x21c   : > { %7341 = vmatpush1.bf16.xpose.msra.mxu0 %v8921_v46  ;;  %v9001_v46 = vcombine.low %v1036_v25, %v1044_v26  ;;  %v1116_v25 = vld [vmem:[%s10314_s19 + $0x718] sm:$0xff] }
 0x21d   : > { %7669 = vmatpush1.bf16.xpose.msra.mxu1 %v9177_v47  ;;  %7342 = vmatprep.subr.bf16.mxu0 %v8938_v50  ;;  %v9257_v47 = vcombine.low %v1292_v31, %v1300_v35  ;;  %v9018_v50 = vcombine.high %v1052_v43, %v1060_v44  ;;  %v1124_v26 = vld [vmem:[%s10314_s19 + $0x758] sm:$0xff] }
 0x21e   : > { %7670 = vmatprep.subr.bf16.mxu1 %v9194_v60  ;;  %v9274_v60 = vcombine.high %v1308_v45, %v1316_v55  ;;  %v1372_v31 = vld [vmem:[%s10314_s19 + $0xf18] sm:$0xff] }
 0x21f   : > { %v1380_v35 = vld [vmem:[%s10314_s19 + $0xf58] sm:$0xff] }
 0x224   : > { %7343 = vmatpush1.bf16.xpose.msra.mxu0 %v8937_v53  ;;  %v9017_v53 = vcombine.low %v1052_v43, %v1060_v44  ;;  %v1132_v43 = vld [vmem:[%s10314_s19 + $0x798] sm:$0xff] }
 0x225   : > { %7671 = vmatpush1.bf16.xpose.msra.mxu1 %v9193_v58  ;;  %7344 = vmatprep.subr.bf16.mxu0 %v8954_v59  ;;  %v9273_v58 = vcombine.low %v1308_v45, %v1316_v55  ;;  %v9034_v59 = vcombine.high %v1068_v61, %v1076_v48  ;;  %v1140_v44 = vld [vmem:[%s10314_s19 + $0x7d8] sm:$0xff] }
 0x226   : > { %7672 = vmatprep.subr.bf16.mxu1 %v9210_v0  ;;  %v9290_v0 = vcombine.high %v1324_v9, %v1332_v52  ;;  %v1388_v45 = vld [vmem:[%s10314_s19 + $0xf98] sm:$0xff] }
 0x227   : > { %v1396_v55 = vld [vmem:[%s10314_s19 + $0xfd8] sm:$0xff] }
 0x22c   : > { %7345 = vmatpush1.bf16.xpose.msra.mxu0 %v8953_v10  ;;  %v9033_v10 = vcombine.low %v1068_v61, %v1076_v48  ;;  %v9354_v48 = vcombine.high %v1388_v45, %v1396_v55 }
 0x22d   : > { %7673 = vmatpush1.bf16.xpose.msra.mxu1 %v9209_v13  ;;  %7346 = vmatprep.subr.bf16.mxu0 %v8970_v14  ;;  %v9289_v13 = vcombine.low %v1324_v9, %v1332_v52  ;;  %v9050_v14 = vcombine.high %v1084_v1, %v1092_v2  ;;  %v10142_v9 = vld [vmem:[%s11776_s2 + $0x8] sm:$0xff] }
 0x22e   : > { %7674 = vmatprep.subr.bf16.mxu1 %v9226_v15  ;;  %v9306_v15 = vcombine.high %v1340_v4, %v1348_v6  ;;  %v303_v52 = vrot.slane %v10142_v9, %v10443_v56  ;;  %v957_v9 = vld [vmem:[%s10314_s19 + $0x220] sm:$0xff] }
 0x234   : > { %7347 = vmatpush1.bf16.xpose.msra.mxu0 %v8969_v20  ;;  %v9049_v20 = vcombine.low %v1084_v1, %v1092_v2  ;;  %v1157_v1 = vld [vmem:[%s10314_s19 + $0x860] sm:$0xff]  ;;  %v698_v2 = vadd.f32 %v10461_v3, %v303_v52 }
 0x235   : > { %7675 = vmatpush1.bf16.xpose.msra.mxu1 %v9225_v21  ;;  %7348 = vmatprep.subr.bf16.mxu0 %v8986_v22  ;;  %v9305_v21 = vcombine.low %v1340_v4, %v1348_v6  ;;  %v9066_v22 = vcombine.high %v1100_v16, %v1108_v17  ;;  %v9097_v4 = vcombine.low %v1132_v43, %v1140_v44  ;;  %v965_v52 = vld [vmem:[%s10314_s19 + $0x260] sm:$0xff] }
 0x236   : > { %7676 = vmatprep.subr.bf16.mxu1 %v9242_v51  ;;  %v9322_v51 = vcombine.high %v1356_v18, %v1364_v30  ;;  %v9353_v6 = vcombine.low %v1388_v45, %v1396_v55  ;;  %vm834_vm10 = vcmp.gt.f32.partialorder %v698_v2, 0.0  ;;  %v941_v45 = vld [vmem:[%s10314_s19 + $0x1a0] sm:$0xff] }
 0x237   : > { %v949_v55 = vld [vmem:[%s10314_s19 + $0x1e0] sm:$0xff] }
 0x23c   : > { %7349 = vmatpush1.bf16.xpose.msra.mxu0 %v8985_v36  ;;  %v9065_v36 = vcombine.low %v1100_v16, %v1108_v17  ;;  %v909_v16 = vld [vmem:[%s10314_s19 + $0xa0] sm:$0xff] }
 0x23d   : > { %7677 = vmatpush1.bf16.xpose.msra.mxu1 %v9241_v39  ;;  %7350 = vmatprep.subr.bf16.mxu0 %v9002_v40  ;;  %v9321_v39 = vcombine.low %v1356_v18, %v1364_v30  ;;  %v9082_v40 = vcombine.high %v1116_v25, %v1124_v26  ;;  %v917_v17 = vld [vmem:[%s10314_s19 + $0xe0] sm:$0xff] }
 0x23e   : > { %7678 = vmatprep.subr.bf16.mxu1 %v9258_v42  ;;  %v9338_v42 = vcombine.high %v1372_v31, %v1380_v35  ;;  %v1165_v30 = vld [vmem:[%s10314_s19 + $0x8a0] sm:$0xff] }
 0x244   : > { %7351 = vmatpush1.bf16.xpose.msra.mxu0 %v9001_v46  ;;  %v9081_v46 = vcombine.low %v1116_v25, %v1124_v26 }
 0x245   : > { %7679 = vmatpush1.bf16.xpose.msra.mxu1 %v9257_v47  ;;  %7352 = vmatprep.subr.bf16.mxu0 %v9018_v50  ;;  %v9337_v47 = vcombine.low %v1372_v31, %v1380_v35  ;;  %v9098_v50 = vcombine.high %v1132_v43, %v1140_v44  ;;  %v925_v31 = vld [vmem:[%s10314_s19 + $0x120] sm:$0xff] }
 0x246   : > { %7680 = vmatprep.subr.bf16.mxu1 %v9274_v60  ;;  %v10141_v60 = vld [vmem:[%s11776_s2] sm:$0xff] }
 0x247   : > { %v291_v61 = vrot.slane %v10141_v60, %v10532_v34  ;;  %v933_v35 = vld [vmem:[%s10314_s19 + $0x160] sm:$0xff] }
 0x248   : > { %v8892_v43 = vcombine.high %v925_v31, %v933_v35 }
 0x24c   : > { %7353 = vmatpush1.bf16.xpose.msra.mxu0 %v9017_v53  ;;  %v655_v53 = vadd.f32 %v10512_v8, %v291_v61  ;;  %v8908_v61 = vcombine.high %v941_v45, %v949_v55 }
 0x24d   : > { %7681 = vmatpush1.bf16.xpose.msra.mxu1 %v9273_v58  ;;  %7354 = vmatprep.subr.bf16.mxu0 %v9034_v59  ;;  %v893_v58 = vld [vmem:[%s10314_s19 + $0x20] sm:$0xff] }
 0x24e   : > { %7682 = vmatprep.subr.bf16.mxu1 %v9290_v0  ;;  %v901_v59 = vld [vmem:[%s10314_s19 + $0x60] sm:$0xff]  ;;  %vm831_vm9 = vcmp.gt.f32.partialorder %v655_v53, 0.0 }
 0x24f   : > { %v1149_v0 = vld [vmem:[%s10314_s19 + $0x820] sm:$0xff]  ;;  %v8859_v3 = vcombine.low %v893_v58, %v901_v59 }
 0x254   : > { %7355 = vmatpush1.bf16.xpose.msra.mxu0 %v9033_v10  ;;  %v8860_v10 = vcombine.high %v893_v58, %v901_v59  ;;  %v1221_v58 = vld [vmem:[%s10314_s19 + $0xa60] sm:$0xff]  ;;  %v8907_v59 = vcombine.low %v941_v45, %v949_v55 }
 0x255   : > { %7683 = vmatpush1.bf16.xpose.msra.mxu1 %v9289_v13  ;;  %7356 = vmatprep.subr.bf16.mxu0 %v9050_v14  ;;  %v847_v13 = vmul.f32 0.1, %v655_v53  ;;  %v9116_v14 = vcombine.high %v1149_v0, %v1157_v1  ;;  %v1021_v45 = vld [vmem:[%s10314_s19 + $0x420] sm:$0xff] }
 0x256   : > { %7684 = vmatprep.subr.bf16.mxu1 %v9306_v15  ;;  %v850_v15 = vmul.f32 0.1, %v698_v2  ;;  %v1029_v55 = vld [vmem:[%s10314_s19 + $0x460] sm:$0xff] }
 0x257   : > { %v863_v8 = vsel %vm831_vm9, %v655_v53, %v847_v13  ;;  %v1213_v53 = vld [vmem:[%s10314_s19 + $0xa20] sm:$0xff] }
 0x258   : > { %v866_v18 = vsel %vm834_vm10, %v698_v2, %v850_v15  ;;  %v9180_v2 = vcombine.high %v1213_v53, %v1221_v58  ;;  %v1237_v13 = vld [vmem:[%s10314_s19 + $0xae0] sm:$0xff]  ;;  %v9179_v15 = vcombine.low %v1213_v53, %v1221_v58 }
 0x259   : > { %v10765_v25 = vpack.c.bf16 %v866_v18, %v866_v18  ;;  %v997_v18 = vld [vmem:[%s10314_s19 + $0x360] sm:$0xff] }
 0x25a   : > { %v1293_v53 = vld [vmem:[%s10314_s19 + $0xca0] sm:$0xff] }
 0x25b   : > { %v1301_v58 = vld [vmem:[%s10314_s19 + $0xce0] sm:$0xff] }
 0x25c   : > { %7357 = vmatpush1.bf16.xpose.msra.mxu0 %v9049_v20  ;;  %v1173_v20 = vld [vmem:[%s10314_s19 + $0x8e0] sm:$0xff] }
 0x25d   : > { %7685 = vmatpush1.bf16.xpose.msra.mxu1 %v9305_v21  ;;  %7358 = vmatprep.subr.bf16.mxu0 %v9066_v22  ;;  %v10763_v21 = vpack.c.bf16 %v863_v8, %v863_v8  ;;  %v9115_v22 = vcombine.low %v1149_v0, %v1157_v1  ;;  %v9132_v26 = vcombine.high %v1165_v30, %v1173_v20 }
 0x25e   : > { %7686 = vmatprep.subr.bf16.mxu1 %v9322_v51  ;;  %v8876_v51 = vcombine.high %v909_v16, %v917_v17  ;;  %v8924_v1 = vcombine.high %v957_v9, %v965_v52 }
 0x264   : > { %7359 = vmatpush1.bf16.xpose.msra.mxu0 %v9065_v36  ;;  %v1181_v36 = vld [vmem:[%s10314_s19 + $0x920] sm:$0xff] }
 0x265   : > { %7687 = vmatpush1.bf16.xpose.msra.mxu1 %v9321_v39  ;;  %7360 = vmatprep.subr.bf16.mxu0 %v9082_v40  ;;  %v1189_v39 = vld [vmem:[%s10314_s19 + $0x960] sm:$0xff]  ;;  %v8875_v40 = vcombine.low %v909_v16, %v917_v17 }
 0x266   : > { %7688 = vmatprep.subr.bf16.mxu1 %v9338_v42  ;;  %v9131_v42 = vcombine.low %v1165_v30, %v1173_v20  ;;  %v9148_v44 = vcombine.high %v1181_v36, %v1189_v39  ;;  %v9147_v60 = vcombine.low %v1181_v36, %v1189_v39  ;;  %v989_v17 = vld [vmem:[%s10314_s19 + $0x320] sm:$0xff] }
 0x267   : > { %v1253_v30 = vld [vmem:[%s10314_s19 + $0xb60] sm:$0xff] }
 0x268   : > { %v1261_v36 = vld [vmem:[%s10314_s19 + $0xba0] sm:$0xff] }
 0x269   : > { %v1269_v39 = vld [vmem:[%s10314_s19 + $0xbe0] sm:$0xff] }
 0x26c   : > { %7361 = vmatpush1.bf16.xpose.msra.mxu0 %v9081_v46  ;;  %v1197_v46 = vld [vmem:[%s10314_s19 + $0x9a0] sm:$0xff] }
 0x26d   : > { %7689 = vmatpush1.bf16.xpose.msra.mxu1 %v9337_v47  ;;  %7362 = vmatprep.subr.bf16.mxu0 %v9098_v50  ;;  %v1205_v47 = vld [vmem:[%s10314_s19 + $0x9e0] sm:$0xff]  ;;  %v8891_v50 = vcombine.low %v925_v31, %v933_v35 }
 0x26e   : > { %7690 = vmatprep.subr.bf16.mxu1 %v9354_v48  ;;  %v9164_v48 = vcombine.high %v1197_v46, %v1205_v47  ;;  %v9163_v0 = vcombine.low %v1197_v46, %v1205_v47  ;;  %v1005_v31 = vld [vmem:[%s10314_s19 + $0x3a0] sm:$0xff] }
 0x26f   : > { %v1013_v35 = vld [vmem:[%s10314_s19 + $0x3e0] sm:$0xff] }
 0x270   : > { %v1277_v46 = vld [vmem:[%s10314_s19 + $0xc20] sm:$0xff] }
 0x271   : > { %v1285_v47 = vld [vmem:[%s10314_s19 + $0xc60] sm:$0xff] }
 0x274   : > { %7363 = vmatpush1.bf16.xpose.msra.mxu0 %v9097_v4  ;;  %v973_v4 = vld [vmem:[%s10314_s19 + $0x2a0] sm:$0xff] }
 0x275   : > { %7691 = vmatpush1.bf16.xpose.msra.mxu1 %v9353_v6  ;;  %7373 = vmatprep.subr.bf16.mxu0 %v8860_v10  ;;  %v981_v6 = vld [vmem:[%s10314_s19 + $0x2e0] sm:$0xff] }
 0x276   : > { %7701 = vmatprep.subr.bf16.mxu1 %v9116_v14  ;;  %v1229_v10 = vld [vmem:[%s10314_s19 + $0xaa0] sm:$0xff]  ;;  %v8923_v14 = vcombine.low %v957_v9, %v965_v52  ;;  %v8940_v8 = vcombine.high %v973_v4, %v981_v6  ;;  %v8939_v20 = vcombine.low %v973_v4, %v981_v6 }
 0x277   : > { %v9196_v16 = vcombine.high %v1229_v10, %v1237_v13  ;;  %v1037_v9 = vld [vmem:[%s10314_s19 + $0x4a0] sm:$0xff] }
 0x278   : > { %v1045_v52 = vld [vmem:[%s10314_s19 + $0x4e0] sm:$0xff] }
 0x279   : > { %v1053_v4 = vld [vmem:[%s10314_s19 + $0x520] sm:$0xff] }
 0x27a   : > { %v1061_v6 = vld [vmem:[%s10314_s19 + $0x560] sm:$0xff] }
 0x27b   : > { %7365 = vmatmul.mubr.bf16.vlgmr.msra.gmra.mrb[8].mxu0 %v10763_v21 }
 0x27c   : > { %7693 = vmatmul.mubr.bf16.vlgmr.msra.gmra.mrb[24].mxu1 %v10763_v21  ;;  %7374 = vmatpush1.bf16.xpose.msra.mxu0 %v8859_v3  ;;  %v1245_v3 = vld [vmem:[%s10314_s19 + $0xb20] sm:$0xff] }
 0x27d   : > { %7405 = vmatprep.mubr.bf16.mxu0 %v10765_v25  ;;  %7702 = vmatpush1.bf16.xpose.msra.mxu1 %v9115_v22  ;;  %v9195_v22 = vcombine.low %v1229_v10, %v1237_v13  ;;  %v1309_v10 = vld [vmem:[%s10314_s19 + $0xd20] sm:$0xff] }
 0x27e   : > { %7733 = vmatprep.mubr.bf16.mxu1 %v10765_v25  ;;  %7375 = vmatprep.subr.bf16.mxu0 %v8876_v51  ;;  %v8956_v51 = vcombine.high %v989_v17, %v997_v18  ;;  %v1317_v13 = vld [vmem:[%s10314_s19 + $0xd60] sm:$0xff] }
 0x27f   : > { %7703 = vmatprep.subr.bf16.mxu1 %v9132_v26  ;;  %v9212_v26 = vcombine.high %v1245_v3, %v1253_v30 }
 0x284   : > { %7376 = vmatpush1.bf16.xpose.msra.mxu0 %v8875_v40  ;;  %v8955_v40 = vcombine.low %v989_v17, %v997_v18  ;;  %v1069_v17 = vld [vmem:[%s10314_s19 + $0x5a0] sm:$0xff] }
 0x285   : > { %7704 = vmatpush1.bf16.xpose.msra.mxu1 %v9131_v42  ;;  %7377 = vmatprep.subr.bf16.mxu0 %v8892_v43  ;;  %v9211_v42 = vcombine.low %v1245_v3, %v1253_v30  ;;  %v8972_v43 = vcombine.high %v1005_v31, %v1013_v35  ;;  %v1077_v18 = vld [vmem:[%s10314_s19 + $0x5e0] sm:$0xff] }
 0x286   : > { %7705 = vmatprep.subr.bf16.mxu1 %v9148_v44  ;;  %v9228_v44 = vcombine.high %v1261_v36, %v1269_v39  ;;  %v1325_v3 = vld [vmem:[%s10314_s19 + $0xda0] sm:$0xff] }
 0x287   : > { %v1333_v30 = vld [vmem:[%s10314_s19 + $0xde0] sm:$0xff] }
 0x28c   : > { %7378 = vmatpush1.bf16.xpose.msra.mxu0 %v8891_v50  ;;  %v8971_v50 = vcombine.low %v1005_v31, %v1013_v35  ;;  %v1085_v31 = vld [vmem:[%s10314_s19 + $0x620] sm:$0xff] }
 0x28d   : > { %7706 = vmatpush1.bf16.xpose.msra.mxu1 %v9147_v60  ;;  %7379 = vmatprep.subr.bf16.mxu0 %v8908_v61  ;;  %v9227_v60 = vcombine.low %v1261_v36, %v1269_v39  ;;  %v8988_v61 = vcombine.high %v1021_v45, %v1029_v55  ;;  %v1093_v35 = vld [vmem:[%s10314_s19 + $0x660] sm:$0xff] }
 0x28e   : > { %7707 = vmatprep.subr.bf16.mxu1 %v9164_v48  ;;  %v9244_v48 = vcombine.high %v1277_v46, %v1285_v47  ;;  %v1341_v36 = vld [vmem:[%s10314_s19 + $0xe20] sm:$0xff] }
 0x28f   : > { %v1349_v39 = vld [vmem:[%s10314_s19 + $0xe60] sm:$0xff] }
 0x294   : > { %7380 = vmatpush1.bf16.xpose.msra.mxu0 %v8907_v59  ;;  %v8987_v59 = vcombine.low %v1021_v45, %v1029_v55  ;;  %v1101_v45 = vld [vmem:[%s10314_s19 + $0x6a0] sm:$0xff] }
 0x295   : > { %7708 = vmatpush1.bf16.xpose.msra.mxu1 %v9163_v0  ;;  %7381 = vmatprep.subr.bf16.mxu0 %v8924_v1  ;;  %v9243_v0 = vcombine.low %v1277_v46, %v1285_v47  ;;  %v9004_v1 = vcombine.high %v1037_v9, %v1045_v52  ;;  %v1109_v55 = vld [vmem:[%s10314_s19 + $0x6e0] sm:$0xff] }
 0x296   : > { %7709 = vmatprep.subr.bf16.mxu1 %v9180_v2  ;;  %v9260_v2 = vcombine.high %v1293_v53, %v1301_v58  ;;  %v1357_v46 = vld [vmem:[%s10314_s19 + $0xea0] sm:$0xff] }
 0x297   : > { %v1365_v47 = vld [vmem:[%s10314_s19 + $0xee0] sm:$0xff] }
 0x29c   : > { %7382 = vmatpush1.bf16.xpose.msra.mxu0 %v8923_v14  ;;  %v9003_v14 = vcombine.low %v1037_v9, %v1045_v52  ;;  %v1117_v9 = vld [vmem:[%s10314_s19 + $0x720] sm:$0xff] }
 0x29d   : > { %7710 = vmatpush1.bf16.xpose.msra.mxu1 %v9179_v15  ;;  %7383 = vmatprep.subr.bf16.mxu0 %v8940_v8  ;;  %v9259_v15 = vcombine.low %v1293_v53, %v1301_v58  ;;  %v9020_v8 = vcombine.high %v1053_v4, %v1061_v6  ;;  %v1125_v52 = vld [vmem:[%s10314_s19 + $0x760] sm:$0xff] }
 0x29e   : > { %7711 = vmatprep.subr.bf16.mxu1 %v9196_v16  ;;  %v9276_v16 = vcombine.high %v1309_v10, %v1317_v13  ;;  %v1373_v53 = vld [vmem:[%s10314_s19 + $0xf20] sm:$0xff] }
 0x29f   : > { %v1381_v58 = vld [vmem:[%s10314_s19 + $0xf60] sm:$0xff] }
 0x2a4   : > { %7384 = vmatpush1.bf16.xpose.msra.mxu0 %v8939_v20  ;;  %v9019_v20 = vcombine.low %v1053_v4, %v1061_v6  ;;  %v1133_v4 = vld [vmem:[%s10314_s19 + $0x7a0] sm:$0xff] }
 0x2a5   : > { %7712 = vmatpush1.bf16.xpose.msra.mxu1 %v9195_v22  ;;  %7385 = vmatprep.subr.bf16.mxu0 %v8956_v51  ;;  %v9275_v22 = vcombine.low %v1309_v10, %v1317_v13  ;;  %v9036_v51 = vcombine.high %v1069_v17, %v1077_v18  ;;  %v1141_v6 = vld [vmem:[%s10314_s19 + $0x7e0] sm:$0xff] }
 0x2a6   : > { %7713 = vmatprep.subr.bf16.mxu1 %v9212_v26  ;;  %v9292_v26 = vcombine.high %v1325_v3, %v1333_v30  ;;  %v1389_v10 = vld [vmem:[%s10314_s19 + $0xfa0] sm:$0xff] }
 0x2a7   : > { %v1397_v13 = vld [vmem:[%s10314_s19 + $0xfe0] sm:$0xff] }
 0x2ac   : > { %7386 = vmatpush1.bf16.xpose.msra.mxu0 %v8955_v40  ;;  %v9035_v40 = vcombine.low %v1069_v17, %v1077_v18  ;;  %v894_v17 = vld [vmem:[%s10314_s19 + $0x28] sm:$0xff] }
 0x2ad   : > { %7714 = vmatpush1.bf16.xpose.msra.mxu1 %v9211_v42  ;;  %7387 = vmatprep.subr.bf16.mxu0 %v8972_v43  ;;  %v9291_v42 = vcombine.low %v1325_v3, %v1333_v30  ;;  %v9052_v43 = vcombine.high %v1085_v31, %v1093_v35  ;;  %v902_v18 = vld [vmem:[%s10314_s19 + $0x68] sm:$0xff] }
 0x2ae   : > { %7715 = vmatprep.subr.bf16.mxu1 %v9228_v44  ;;  %v9308_v44 = vcombine.high %v1341_v36, %v1349_v39  ;;  %v1150_v3 = vld [vmem:[%s10314_s19 + $0x828] sm:$0xff] }
 0x2af   : > { %v1158_v30 = vld [vmem:[%s10314_s19 + $0x868] sm:$0xff] }
 0x2b4   : > { %7388 = vmatpush1.bf16.xpose.msra.mxu0 %v8971_v50  ;;  %v9051_v50 = vcombine.low %v1085_v31, %v1093_v35  ;;  %v9118_v31 = vcombine.high %v1150_v3, %v1158_v30  ;;  %v852_v35 = vmul.f32 0.1, %v10529_v32 }
 0x2b5   : > { %7716 = vmatpush1.bf16.xpose.msra.mxu1 %v9227_v60  ;;  %7389 = vmatprep.subr.bf16.mxu0 %v8988_v61  ;;  %v9307_v60 = vcombine.low %v1341_v36, %v1349_v39  ;;  %v9068_v61 = vcombine.high %v1101_v45, %v1109_v55  ;;  %v910_v39 = vld [vmem:[%s10314_s19 + $0xa8] sm:$0xff] }
 0x2b6   : > { %7717 = vmatprep.subr.bf16.mxu1 %v9244_v48  ;;  %v9324_v48 = vcombine.high %v1357_v46, %v1365_v47 }
 0x2bc   : > { %7390 = vmatpush1.bf16.xpose.msra.mxu0 %v8987_v59  ;;  %v9067_v59 = vcombine.low %v1101_v45, %v1109_v55  ;;  %v1174_v45 = vld [vmem:[%s10314_s19 + $0x8e8] sm:$0xff] }
 0x2bd   : > { %7718 = vmatpush1.bf16.xpose.msra.mxu1 %v9243_v0  ;;  %7391 = vmatprep.subr.bf16.mxu0 %v9004_v1  ;;  %v9323_v0 = vcombine.low %v1357_v46, %v1365_v47  ;;  %v9084_v1 = vcombine.high %v1117_v9, %v1125_v52  ;;  %v9117_v46 = vcombine.low %v1150_v3, %v1158_v30 }
 0x2be   : > { %7719 = vmatprep.subr.bf16.mxu1 %v9260_v2  ;;  %v9340_v2 = vcombine.high %v1373_v53, %v1381_v58 }
 0x2c4   : > { %7392 = vmatpush1.bf16.xpose.msra.mxu0 %v9003_v14  ;;  %v9083_v14 = vcombine.low %v1117_v9, %v1125_v52 }
 0x2c5   : > { %7720 = vmatpush1.bf16.xpose.msra.mxu1 %v9259_v15  ;;  %7393 = vmatprep.subr.bf16.mxu0 %v9020_v8  ;;  %v9339_v15 = vcombine.low %v1373_v53, %v1381_v58  ;;  %v9100_v8 = vcombine.high %v1133_v4, %v1141_v6 }
 0x2c6   : > { %7721 = vmatprep.subr.bf16.mxu1 %v9276_v16  ;;  %v9356_v16 = vcombine.high %v1389_v10, %v1397_v13 }
 0x2cc   : > { %7394 = vmatpush1.bf16.xpose.msra.mxu0 %v9019_v20  ;;  %v9099_v20 = vcombine.low %v1133_v4, %v1141_v6 }
 0x2cd   : > { %7722 = vmatpush1.bf16.xpose.msra.mxu1 %v9275_v22  ;;  %7395 = vmatprep.subr.bf16.mxu0 %v9036_v51  ;;  %v9355_v22 = vcombine.low %v1389_v10, %v1397_v13  ;;  %v8862_v51 = vcombine.high %v894_v17, %v902_v18 }
 0x2ce   : > { %7723 = vmatprep.subr.bf16.mxu1 %v9292_v26  ;;  %v849_v26 = vmul.f32 0.1, %v10459_v11 }
 0x2d0   : > { %v865_v36 = vsel %vm833_vm11, %v10459_v11, %v849_v26  ;;  %v1238_v26 = vld [vmem:[%s10314_s19 + $0xae8] sm:$0xff]  ;;  %vm8747_vm11 = vcmask 58368  }
 0x2d1   : > { %v10841_v55 = vpack.c.bf16 %v865_v36, %v865_v36 }
 0x2d4   : > { %7396 = vmatpush1.bf16.xpose.msra.mxu0 %v9035_v40  ;;  %v918_v40 = vld [vmem:[%s10314_s19 + $0xe8] sm:$0xff] }
 0x2d5   : > { %7724 = vmatpush1.bf16.xpose.msra.mxu1 %v9291_v42  ;;  %7397 = vmatprep.subr.bf16.mxu0 %v9052_v43  ;;  %v868_v42 = vsel %vm836_vm12, %v10529_v32, %v852_v35  ;;  %v8861_v43 = vcombine.low %v894_v17, %v902_v18  ;;  %v8878_v47 = vcombine.high %v910_v39, %v918_v40  ;;  %v926_v32 = vld [vmem:[%s10314_s19 + $0x128] sm:$0xff] }
 0x2d6   : > { %7725 = vmatprep.subr.bf16.mxu1 %v9308_v44  ;;  %v1166_v44 = vld [vmem:[%s10314_s19 + $0x8a8] sm:$0xff]  ;;  %v8877_v9 = vcombine.low %v910_v39, %v918_v40 }
 0x2d7   : > { %v9134_v11 = vcombine.high %v1166_v44, %v1174_v45  ;;  %v9133_v52 = vcombine.low %v1166_v44, %v1174_v45  ;;  %v990_v40 = vld [vmem:[%s10314_s19 + $0x328] sm:$0xff] }
 0x2d8   : > { %v1254_v44 = vld [vmem:[%s10314_s19 + $0xb68] sm:$0xff] }
 0x2dc   : > { %7398 = vmatpush1.bf16.xpose.msra.mxu0 %v9051_v50  ;;  %v10843_v50 = vpack.c.bf16 %v868_v42, %v868_v42  ;;  %v998_v42 = vld [vmem:[%s10314_s19 + $0x368] sm:$0xff] }
 0x2dd   : > { %7726 = vmatpush1.bf16.xpose.msra.mxu1 %v9307_v60  ;;  %7399 = vmatprep.subr.bf16.mxu0 %v9068_v61  ;;  %v934_v60 = vld [vmem:[%s10314_s19 + $0x168] sm:$0xff] }
 0x2de   : > { %7727 = vmatprep.subr.bf16.mxu1 %v9324_v48  ;;  %v1182_v61 = vld [vmem:[%s10314_s19 + $0x928] sm:$0xff]  ;;  %v8894_v53 = vcombine.high %v926_v32, %v934_v60  ;;  %v8893_v4 = vcombine.low %v926_v32, %v934_v60 }
 0x2df   : > { %v1190_v48 = vld [vmem:[%s10314_s19 + $0x968] sm:$0xff] }
 0x2e0   : > { %v9150_v58 = vcombine.high %v1182_v61, %v1190_v48  ;;  %v9149_v6 = vcombine.low %v1182_v61, %v1190_v48  ;;  %v1006_v32 = vld [vmem:[%s10314_s19 + $0x3a8] sm:$0xff] }
 0x2e1   : > { %v1014_v60 = vld [vmem:[%s10314_s19 + $0x3e8] sm:$0xff] }
 0x2e2   : > { %v1262_v61 = vld [vmem:[%s10314_s19 + $0xba8] sm:$0xff] }
 0x2e3   : > { %v1270_v48 = vld [vmem:[%s10314_s19 + $0xbe8] sm:$0xff] }
 0x2e4   : > { %7400 = vmatpush1.bf16.xpose.msra.mxu0 %v9067_v59  ;;  %v942_v59 = vld [vmem:[%s10314_s19 + $0x1a8] sm:$0xff] }
 0x2e5   : > { %7728 = vmatpush1.bf16.xpose.msra.mxu1 %v9323_v0  ;;  %7401 = vmatprep.subr.bf16.mxu0 %v9084_v1  ;;  %v950_v0 = vld [vmem:[%s10314_s19 + $0x1e8] sm:$0xff] }
 0x2e6   : > { %7729 = vmatprep.subr.bf16.mxu1 %v9340_v2  ;;  %v1198_v1 = vld [vmem:[%s10314_s19 + $0x9a8] sm:$0xff]  ;;  %v8910_v10 = vcombine.high %v942_v59, %v950_v0  ;;  %v8909_v17 = vcombine.low %v942_v59, %v950_v0 }
 0x2e7   : > { %v1206_v2 = vld [vmem:[%s10314_s19 + $0x9e8] sm:$0xff] }
 0x2e8   : > { %v9166_v13 = vcombine.high %v1198_v1, %v1206_v2  ;;  %v9165_v18 = vcombine.low %v1198_v1, %v1206_v2  ;;  %v1022_v59 = vld [vmem:[%s10314_s19 + $0x428] sm:$0xff] }
 0x2e9   : > { %v1030_v0 = vld [vmem:[%s10314_s19 + $0x468] sm:$0xff] }
 0x2ea   : > { %v1278_v1 = vld [vmem:[%s10314_s19 + $0xc28] sm:$0xff] }
 0x2eb   : > { %v1286_v2 = vld [vmem:[%s10314_s19 + $0xc68] sm:$0xff] }
 0x2ec   : > { %7402 = vmatpush1.bf16.xpose.msra.mxu0 %v9083_v14  ;;  %v958_v14 = vld [vmem:[%s10314_s19 + $0x228] sm:$0xff] }
 0x2ed   : > { %7730 = vmatpush1.bf16.xpose.msra.mxu1 %v9339_v15  ;;  %7403 = vmatprep.subr.bf16.mxu0 %v9100_v8  ;;  %v966_v15 = vld [vmem:[%s10314_s19 + $0x268] sm:$0xff] }
 0x2ee   : > { %7731 = vmatprep.subr.bf16.mxu1 %v9356_v16  ;;  %v1214_v8 = vld [vmem:[%s10314_s19 + $0xa28] sm:$0xff]  ;;  %v8926_v3 = vcombine.high %v958_v14, %v966_v15 }
 0x2ef   : > { %v1222_v16 = vld [vmem:[%s10314_s19 + $0xa68] sm:$0xff] }
 0x2f0   : > { %v9182_v30 = vcombine.high %v1214_v8, %v1222_v16  ;;  %v9181_v35 = vcombine.low %v1214_v8, %v1222_v16  ;;  %v1294_v8 = vld [vmem:[%s10314_s19 + $0xca8] sm:$0xff] }
 0x2f1   : > { %v1302_v16 = vld [vmem:[%s10314_s19 + $0xce8] sm:$0xff] }
 0x2f4   : > { %7404 = vmatpush1.bf16.xpose.msra.mxu0 %v9099_v20  ;;  %v974_v20 = vld [vmem:[%s10314_s19 + $0x2a8] sm:$0xff] }
 0x2f5   : > { %7732 = vmatpush1.bf16.xpose.msra.mxu1 %v9355_v22  ;;  %7414 = vmatprep.subr.bf16.mxu0 %v8862_v51  ;;  %v982_v22 = vld [vmem:[%s10314_s19 + $0x2e8] sm:$0xff] }
 0x2f6   : > { %7742 = vmatprep.subr.bf16.mxu1 %v9118_v31  ;;  %v1230_v51 = vld [vmem:[%s10314_s19 + $0xaa8] sm:$0xff]  ;;  %v8925_v31 = vcombine.low %v958_v14, %v966_v15  ;;  %v8942_v36 = vcombine.high %v974_v20, %v982_v22  ;;  %v8941_v45 = vcombine.low %v974_v20, %v982_v22 }
 0x2f7   : > { %v9198_v39 = vcombine.high %v1230_v51, %v1238_v26  ;;  %v1038_v14 = vld [vmem:[%s10314_s19 + $0x4a8] sm:$0xff] }
 0x2f8   : > { %v1046_v15 = vld [vmem:[%s10314_s19 + $0x4e8] sm:$0xff] }
 0x2f9   : > { %v1054_v20 = vld [vmem:[%s10314_s19 + $0x528] sm:$0xff] }
 0x2fa   : > { %v1062_v22 = vld [vmem:[%s10314_s19 + $0x568] sm:$0xff] }
 0x2fb   : > { %7406 = vmatmul.mubr.bf16.vlgmr.msra.gmra.mrb[8].mxu0 %v10841_v55 }
 0x2fc   : > { %7734 = vmatmul.mubr.bf16.vlgmr.msra.gmra.mrb[24].mxu1 %v10841_v55  ;;  %7415 = vmatpush1.bf16.xpose.msra.mxu0 %v8861_v43  ;;  %v1246_v43 = vld [vmem:[%s10314_s19 + $0xb28] sm:$0xff] }
 0x2fd   : > { %7446 = vmatprep.mubr.bf16.mxu0 %v10843_v50  ;;  %7743 = vmatpush1.bf16.xpose.msra.mxu1 %v9117_v46  ;;  %v9197_v46 = vcombine.low %v1230_v51, %v1238_v26  ;;  %v1310_v51 = vld [vmem:[%s10314_s19 + $0xd28] sm:$0xff] }
 0x2fe   : > { %7774 = vmatprep.mubr.bf16.mxu1 %v10843_v50  ;;  %7416 = vmatprep.subr.bf16.mxu0 %v8878_v47  ;;  %v8958_v47 = vcombine.high %v990_v40, %v998_v42  ;;  %v1318_v26 = vld [vmem:[%s10314_s19 + $0xd68] sm:$0xff] }
 0x2ff   : > { %7744 = vmatprep.subr.bf16.mxu1 %v9134_v11  ;;  %v9214_v11 = vcombine.high %v1246_v43, %v1254_v44 }
 0x304   : > { %7417 = vmatpush1.bf16.xpose.msra.mxu0 %v8877_v9  ;;  %v8957_v9 = vcombine.low %v990_v40, %v998_v42  ;;  %v1070_v40 = vld [vmem:[%s10314_s19 + $0x5a8] sm:$0xff] }
 0x305   : > { %7745 = vmatpush1.bf16.xpose.msra.mxu1 %v9133_v52  ;;  %7418 = vmatprep.subr.bf16.mxu0 %v8894_v53  ;;  %v9213_v52 = vcombine.low %v1246_v43, %v1254_v44  ;;  %v8974_v53 = vcombine.high %v1006_v32, %v1014_v60  ;;  %v1078_v42 = vld [vmem:[%s10314_s19 + $0x5e8] sm:$0xff] }
 0x306   : > { %7746 = vmatprep.subr.bf16.mxu1 %v9150_v58  ;;  %v9230_v58 = vcombine.high %v1262_v61, %v1270_v48  ;;  %v1326_v43 = vld [vmem:[%s10314_s19 + $0xda8] sm:$0xff] }
 0x307   : > { %v1334_v44 = vld [vmem:[%s10314_s19 + $0xde8] sm:$0xff] }
 0x30c   : > { %7419 = vmatpush1.bf16.xpose.msra.mxu0 %v8893_v4  ;;  %v8973_v4 = vcombine.low %v1006_v32, %v1014_v60  ;;  %v1086_v32 = vld [vmem:[%s10314_s19 + $0x628] sm:$0xff] }
 0x30d   : > { %7747 = vmatpush1.bf16.xpose.msra.mxu1 %v9149_v6  ;;  %7420 = vmatprep.subr.bf16.mxu0 %v8910_v10  ;;  %v9229_v6 = vcombine.low %v1262_v61, %v1270_v48  ;;  %v8990_v10 = vcombine.high %v1022_v59, %v1030_v0  ;;  %v1094_v60 = vld [vmem:[%s10314_s19 + $0x668] sm:$0xff] }
 0x30e   : > { %7748 = vmatprep.subr.bf16.mxu1 %v9166_v13  ;;  %v9246_v13 = vcombine.high %v1278_v1, %v1286_v2  ;;  %v1342_v61 = vld [vmem:[%s10314_s19 + $0xe28] sm:$0xff] }
 0x30f   : > { %v1350_v48 = vld [vmem:[%s10314_s19 + $0xe68] sm:$0xff] }
 0x314   : > { %7421 = vmatpush1.bf16.xpose.msra.mxu0 %v8909_v17  ;;  %v8989_v17 = vcombine.low %v1022_v59, %v1030_v0  ;;  %v1102_v59 = vld [vmem:[%s10314_s19 + $0x6a8] sm:$0xff] }
 0x315   : > { %7749 = vmatpush1.bf16.xpose.msra.mxu1 %v9165_v18  ;;  %7422 = vmatprep.subr.bf16.mxu0 %v8926_v3  ;;  %v9245_v18 = vcombine.low %v1278_v1, %v1286_v2  ;;  %v9006_v3 = vcombine.high %v1038_v14, %v1046_v15  ;;  %v1110_v0 = vld [vmem:[%s10314_s19 + $0x6e8] sm:$0xff] }
 0x316   : > { %7750 = vmatprep.subr.bf16.mxu1 %v9182_v30  ;;  %v9262_v30 = vcombine.high %v1294_v8, %v1302_v16  ;;  %v1358_v1 = vld [vmem:[%s10314_s19 + $0xea8] sm:$0xff] }
 0x317   : > { %v1366_v2 = vld [vmem:[%s10314_s19 + $0xee8] sm:$0xff] }
 0x31c   : > { %7423 = vmatpush1.bf16.xpose.msra.mxu0 %v8925_v31  ;;  %v9005_v31 = vcombine.low %v1038_v14, %v1046_v15  ;;  %v1118_v14 = vld [vmem:[%s10314_s19 + $0x728] sm:$0xff] }
 0x31d   : > { %7751 = vmatpush1.bf16.xpose.msra.mxu1 %v9181_v35  ;;  %7424 = vmatprep.subr.bf16.mxu0 %v8942_v36  ;;  %v9261_v35 = vcombine.low %v1294_v8, %v1302_v16  ;;  %v9022_v36 = vcombine.high %v1054_v20, %v1062_v22  ;;  %v1126_v15 = vld [vmem:[%s10314_s19 + $0x768] sm:$0xff] }
 0x31e   : > { %7752 = vmatprep.subr.bf16.mxu1 %v9198_v39  ;;  %v9278_v39 = vcombine.high %v1310_v51, %v1318_v26  ;;  %v1374_v8 = vld [vmem:[%s10314_s19 + $0xf28] sm:$0xff] }
 0x31f   : > { %v1382_v16 = vld [vmem:[%s10314_s19 + $0xf68] sm:$0xff] }
 0x324   : > { %7425 = vmatpush1.bf16.xpose.msra.mxu0 %v8941_v45  ;;  %v9021_v45 = vcombine.low %v1054_v20, %v1062_v22  ;;  %v1134_v20 = vld [vmem:[%s10314_s19 + $0x7a8] sm:$0xff] }
 0x325   : > { %7753 = vmatpush1.bf16.xpose.msra.mxu1 %v9197_v46  ;;  %7426 = vmatprep.subr.bf16.mxu0 %v8958_v47  ;;  %v9277_v46 = vcombine.low %v1310_v51, %v1318_v26  ;;  %v9038_v47 = vcombine.high %v1070_v40, %v1078_v42  ;;  %v1142_v22 = vld [vmem:[%s10314_s19 + $0x7e8] sm:$0xff] }
 0x326   : > { %7754 = vmatprep.subr.bf16.mxu1 %v9214_v11  ;;  %v9294_v11 = vcombine.high %v1326_v43, %v1334_v44  ;;  %v1390_v51 = vld [vmem:[%s10314_s19 + $0xfa8] sm:$0xff] }
 0x327   : > { %v1398_v26 = vld [vmem:[%s10314_s19 + $0xfe8] sm:$0xff] }
 0x32c   : > { %7427 = vmatpush1.bf16.xpose.msra.mxu0 %v8957_v9  ;;  %v9037_v9 = vcombine.low %v1070_v40, %v1078_v42  ;;  %v895_v40 = vld [vmem:[%s10314_s19 + $0x30] sm:$0xff] }
 0x32d   : > { %7755 = vmatpush1.bf16.xpose.msra.mxu1 %v9213_v52  ;;  %7428 = vmatprep.subr.bf16.mxu0 %v8974_v53  ;;  %v9293_v52 = vcombine.low %v1326_v43, %v1334_v44  ;;  %v9054_v53 = vcombine.high %v1086_v32, %v1094_v60  ;;  %v903_v42 = vld [vmem:[%s10314_s19 + $0x70] sm:$0xff] }
 0x32e   : > { %7756 = vmatprep.subr.bf16.mxu1 %v9230_v58  ;;  %v9310_v58 = vcombine.high %v1342_v61, %v1350_v48  ;;  %v1151_v43 = vld [vmem:[%s10314_s19 + $0x830] sm:$0xff] }
 0x32f   : > { %v1159_v44 = vld [vmem:[%s10314_s19 + $0x870] sm:$0xff] }
 0x334   : > { %7429 = vmatpush1.bf16.xpose.msra.mxu0 %v8973_v4  ;;  %v9053_v4 = vcombine.low %v1086_v32, %v1094_v60  ;;  %v9120_v32 = vcombine.high %v1151_v43, %v1159_v44  ;;  %v854_v60 = vmul.f32 0.1, %v10495_v41 }
 0x335   : > { %7757 = vmatpush1.bf16.xpose.msra.mxu1 %v9229_v6  ;;  %7430 = vmatprep.subr.bf16.mxu0 %v8990_v10  ;;  %v9309_v6 = vcombine.low %v1342_v61, %v1350_v48  ;;  %v9070_v10 = vcombine.high %v1102_v59, %v1110_v0  ;;  %v911_v48 = vld [vmem:[%s10314_s19 + $0xb0] sm:$0xff] }
 0x336   : > { %7758 = vmatprep.subr.bf16.mxu1 %v9246_v13  ;;  %v9326_v13 = vcombine.high %v1358_v1, %v1366_v2 }
 0x33c   : > { %7431 = vmatpush1.bf16.xpose.msra.mxu0 %v8989_v17  ;;  %v9069_v17 = vcombine.low %v1102_v59, %v1110_v0  ;;  %v1175_v59 = vld [vmem:[%s10314_s19 + $0x8f0] sm:$0xff] }
 0x33d   : > { %7759 = vmatpush1.bf16.xpose.msra.mxu1 %v9245_v18  ;;  %7432 = vmatprep.subr.bf16.mxu0 %v9006_v3  ;;  %v9325_v18 = vcombine.low %v1358_v1, %v1366_v2  ;;  %v9086_v3 = vcombine.high %v1118_v14, %v1126_v15  ;;  %v9119_v1 = vcombine.low %v1151_v43, %v1159_v44 }
 0x33e   : > { %7760 = vmatprep.subr.bf16.mxu1 %v9262_v30  ;;  %v9342_v30 = vcombine.high %v1374_v8, %v1382_v16 }
 0x344   : > { %7433 = vmatpush1.bf16.xpose.msra.mxu0 %v9005_v31  ;;  %v9085_v31 = vcombine.low %v1118_v14, %v1126_v15 }
 0x345   : > { %7761 = vmatpush1.bf16.xpose.msra.mxu1 %v9261_v35  ;;  %7434 = vmatprep.subr.bf16.mxu0 %v9022_v36  ;;  %v9341_v35 = vcombine.low %v1374_v8, %v1382_v16  ;;  %v9102_v36 = vcombine.high %v1134_v20, %v1142_v22 }
 0x346   : > { %7762 = vmatprep.subr.bf16.mxu1 %v9278_v39  ;;  %v9358_v39 = vcombine.high %v1390_v51, %v1398_v26 }
 0x34c   : > { %7435 = vmatpush1.bf16.xpose.msra.mxu0 %v9021_v45  ;;  %v9101_v45 = vcombine.low %v1134_v20, %v1142_v22 }
 0x34d   : > { %7763 = vmatpush1.bf16.xpose.msra.mxu1 %v9277_v46  ;;  %7436 = vmatprep.subr.bf16.mxu0 %v9038_v47  ;;  %v9357_v46 = vcombine.low %v1390_v51, %v1398_v26  ;;  %v8864_v47 = vcombine.high %v895_v40, %v903_v42 }
 0x34e   : > { %7764 = vmatprep.subr.bf16.mxu1 %v9294_v11  ;;  %v851_v11 = vmul.f32 0.1, %v10527_v29 }
 0x350   : > { %v867_v61 = vsel %vm835_vm13, %v10527_v29, %v851_v11  ;;  %v1239_v11 = vld [vmem:[%s10314_s19 + $0xaf0] sm:$0xff] }
 0x351   : > { %v10919_v0 = vpack.c.bf16 %v867_v61, %v867_v61 }
 0x354   : > { %7437 = vmatpush1.bf16.xpose.msra.mxu0 %v9037_v9  ;;  %v919_v9 = vld [vmem:[%s10314_s19 + $0xf0] sm:$0xff] }
 0x355   : > { %7765 = vmatpush1.bf16.xpose.msra.mxu1 %v9293_v52  ;;  %7438 = vmatprep.subr.bf16.mxu0 %v9054_v53  ;;  %v870_v52 = vsel %vm838_vm14, %v10495_v41, %v854_v60  ;;  %v8863_v53 = vcombine.low %v895_v40, %v903_v42  ;;  %v8880_v2 = vcombine.high %v911_v48, %v919_v9  ;;  %v927_v41 = vld [vmem:[%s10314_s19 + $0x130] sm:$0xff] }
 0x356   : > { %7766 = vmatprep.subr.bf16.mxu1 %v9310_v58  ;;  %v1167_v58 = vld [vmem:[%s10314_s19 + $0x8b0] sm:$0xff]  ;;  %v8879_v14 = vcombine.low %v911_v48, %v919_v9 }
 0x357   : > { %v9136_v29 = vcombine.high %v1167_v58, %v1175_v59  ;;  %v9135_v15 = vcombine.low %v1167_v58, %v1175_v59  ;;  %v991_v9 = vld [vmem:[%s10314_s19 + $0x330] sm:$0xff] }
 0x358   : > { %v1255_v58 = vld [vmem:[%s10314_s19 + $0xb70] sm:$0xff] }
 0x35c   : > { %7439 = vmatpush1.bf16.xpose.msra.mxu0 %v9053_v4  ;;  %v10921_v4 = vpack.c.bf16 %v870_v52, %v870_v52  ;;  %v999_v52 = vld [vmem:[%s10314_s19 + $0x370] sm:$0xff] }
 0x35d   : > { %7767 = vmatpush1.bf16.xpose.msra.mxu1 %v9309_v6  ;;  %7440 = vmatprep.subr.bf16.mxu0 %v9070_v10  ;;  %v935_v6 = vld [vmem:[%s10314_s19 + $0x170] sm:$0xff] }
 0x35e   : > { %7768 = vmatprep.subr.bf16.mxu1 %v9326_v13  ;;  %v1183_v10 = vld [vmem:[%s10314_s19 + $0x930] sm:$0xff]  ;;  %v8896_v8 = vcombine.high %v927_v41, %v935_v6  ;;  %v8895_v20 = vcombine.low %v927_v41, %v935_v6 }
 0x35f   : > { %v1191_v13 = vld [vmem:[%s10314_s19 + $0x970] sm:$0xff] }
 0x360   : > { %v9152_v16 = vcombine.high %v1183_v10, %v1191_v13  ;;  %v9151_v22 = vcombine.low %v1183_v10, %v1191_v13  ;;  %v1007_v41 = vld [vmem:[%s10314_s19 + $0x3b0] sm:$0xff] }
 0x361   : > { %v1015_v6 = vld [vmem:[%s10314_s19 + $0x3f0] sm:$0xff] }
 0x362   : > { %v1263_v10 = vld [vmem:[%s10314_s19 + $0xbb0] sm:$0xff] }
 0x363   : > { %v1271_v13 = vld [vmem:[%s10314_s19 + $0xbf0] sm:$0xff] }
 0x364   : > { %7441 = vmatpush1.bf16.xpose.msra.mxu0 %v9069_v17  ;;  %v943_v17 = vld [vmem:[%s10314_s19 + $0x1b0] sm:$0xff] }
 0x365   : > { %7769 = vmatpush1.bf16.xpose.msra.mxu1 %v9325_v18  ;;  %7442 = vmatprep.subr.bf16.mxu0 %v9086_v3  ;;  %v951_v18 = vld [vmem:[%s10314_s19 + $0x1f0] sm:$0xff] }
 0x366   : > { %7770 = vmatprep.subr.bf16.mxu1 %v9342_v30  ;;  %v1199_v3 = vld [vmem:[%s10314_s19 + $0x9b0] sm:$0xff]  ;;  %v8912_v51 = vcombine.high %v943_v17, %v951_v18  ;;  %v8911_v40 = vcombine.low %v943_v17, %v951_v18 }
 0x367   : > { %v1207_v30 = vld [vmem:[%s10314_s19 + $0x9f0] sm:$0xff] }
 0x368   : > { %v9168_v26 = vcombine.high %v1199_v3, %v1207_v30  ;;  %v9167_v42 = vcombine.low %v1199_v3, %v1207_v30  ;;  %v1023_v17 = vld [vmem:[%s10314_s19 + $0x430] sm:$0xff] }
 0x369   : > { %v1031_v18 = vld [vmem:[%s10314_s19 + $0x470] sm:$0xff] }
 0x36a   : > { %v1279_v3 = vld [vmem:[%s10314_s19 + $0xc30] sm:$0xff] }
 0x36b   : > { %v1287_v30 = vld [vmem:[%s10314_s19 + $0xc70] sm:$0xff] }
 0x36c   : > { %7443 = vmatpush1.bf16.xpose.msra.mxu0 %v9085_v31  ;;  %v959_v31 = vld [vmem:[%s10314_s19 + $0x230] sm:$0xff] }
 0x36d   : > { %7771 = vmatpush1.bf16.xpose.msra.mxu1 %v9341_v35  ;;  %7444 = vmatprep.subr.bf16.mxu0 %v9102_v36  ;;  %v967_v35 = vld [vmem:[%s10314_s19 + $0x270] sm:$0xff] }
 0x36e   : > { %7772 = vmatprep.subr.bf16.mxu1 %v9358_v39  ;;  %v1215_v36 = vld [vmem:[%s10314_s19 + $0xa30] sm:$0xff]  ;;  %v8928_v43 = vcombine.high %v959_v31, %v967_v35 }
 0x36f   : > { %v1223_v39 = vld [vmem:[%s10314_s19 + $0xa70] sm:$0xff] }
 0x370   : > { %v9184_v44 = vcombine.high %v1215_v36, %v1223_v39  ;;  %v9183_v60 = vcombine.low %v1215_v36, %v1223_v39  ;;  %v1295_v36 = vld [vmem:[%s10314_s19 + $0xcb0] sm:$0xff] }
 0x371   : > { %v1303_v39 = vld [vmem:[%s10314_s19 + $0xcf0] sm:$0xff] }
 0x374   : > { %7445 = vmatpush1.bf16.xpose.msra.mxu0 %v9101_v45  ;;  %v975_v45 = vld [vmem:[%s10314_s19 + $0x2b0] sm:$0xff] }
 0x375   : > { %7773 = vmatpush1.bf16.xpose.msra.mxu1 %v9357_v46  ;;  %7455 = vmatprep.subr.bf16.mxu0 %v8864_v47  ;;  %v983_v46 = vld [vmem:[%s10314_s19 + $0x2f0] sm:$0xff] }
 0x376   : > { %7783 = vmatprep.subr.bf16.mxu1 %v9120_v32  ;;  %v1231_v47 = vld [vmem:[%s10314_s19 + $0xab0] sm:$0xff]  ;;  %v8927_v32 = vcombine.low %v959_v31, %v967_v35  ;;  %v8944_v61 = vcombine.high %v975_v45, %v983_v46  ;;  %v8943_v59 = vcombine.low %v975_v45, %v983_v46 }
 0x377   : > { %v9200_v48 = vcombine.high %v1231_v47, %v1239_v11  ;;  %v1039_v31 = vld [vmem:[%s10314_s19 + $0x4b0] sm:$0xff] }
 0x378   : > { %v1047_v35 = vld [vmem:[%s10314_s19 + $0x4f0] sm:$0xff] }
 0x379   : > { %v1055_v45 = vld [vmem:[%s10314_s19 + $0x530] sm:$0xff] }
 0x37a   : > { %v1063_v46 = vld [vmem:[%s10314_s19 + $0x570] sm:$0xff] }
 0x37b   : > { %7447 = vmatmul.mubr.bf16.vlgmr.msra.gmra.mrb[8].mxu0 %v10919_v0 }
 0x37c   : > { %7775 = vmatmul.mubr.bf16.vlgmr.msra.gmra.mrb[24].mxu1 %v10919_v0  ;;  %7456 = vmatpush1.bf16.xpose.msra.mxu0 %v8863_v53  ;;  %v1247_v53 = vld [vmem:[%s10314_s19 + $0xb30] sm:$0xff] }
 0x37d   : > { %7487 = vmatprep.mubr.bf16.mxu0 %v10921_v4  ;;  %7784 = vmatpush1.bf16.xpose.msra.mxu1 %v9119_v1  ;;  %v9199_v1 = vcombine.low %v1231_v47, %v1239_v11  ;;  %v1311_v47 = vld [vmem:[%s10314_s19 + $0xd30] sm:$0xff] }
 0x37e   : > { %7815 = vmatprep.mubr.bf16.mxu1 %v10921_v4  ;;  %7457 = vmatprep.subr.bf16.mxu0 %v8880_v2  ;;  %v8960_v2 = vcombine.high %v991_v9, %v999_v52  ;;  %v1319_v11 = vld [vmem:[%s10314_s19 + $0xd70] sm:$0xff] }
 0x37f   : > { %7785 = vmatprep.subr.bf16.mxu1 %v9136_v29  ;;  %v9216_v29 = vcombine.high %v1247_v53, %v1255_v58 }
 0x384   : > { %7458 = vmatpush1.bf16.xpose.msra.mxu0 %v8879_v14  ;;  %v8959_v14 = vcombine.low %v991_v9, %v999_v52  ;;  %v1071_v9 = vld [vmem:[%s10314_s19 + $0x5b0] sm:$0xff] }
 0x385   : > { %7786 = vmatpush1.bf16.xpose.msra.mxu1 %v9135_v15  ;;  %7459 = vmatprep.subr.bf16.mxu0 %v8896_v8  ;;  %v9215_v15 = vcombine.low %v1247_v53, %v1255_v58  ;;  %v8976_v8 = vcombine.high %v1007_v41, %v1015_v6  ;;  %v1079_v52 = vld [vmem:[%s10314_s19 + $0x5f0] sm:$0xff] }
 0x386   : > { %7787 = vmatprep.subr.bf16.mxu1 %v9152_v16  ;;  %v9232_v16 = vcombine.high %v1263_v10, %v1271_v13  ;;  %v1327_v53 = vld [vmem:[%s10314_s19 + $0xdb0] sm:$0xff] }
 0x387   : > { %v1335_v58 = vld [vmem:[%s10314_s19 + $0xdf0] sm:$0xff] }
 0x38c   : > { %7460 = vmatpush1.bf16.xpose.msra.mxu0 %v8895_v20  ;;  %v8975_v20 = vcombine.low %v1007_v41, %v1015_v6  ;;  %v1087_v41 = vld [vmem:[%s10314_s19 + $0x630] sm:$0xff] }
 0x38d   : > { %7788 = vmatpush1.bf16.xpose.msra.mxu1 %v9151_v22  ;;  %7461 = vmatprep.subr.bf16.mxu0 %v8912_v51  ;;  %v9231_v22 = vcombine.low %v1263_v10, %v1271_v13  ;;  %v8992_v51 = vcombine.high %v1023_v17, %v1031_v18  ;;  %v1095_v6 = vld [vmem:[%s10314_s19 + $0x670] sm:$0xff] }
 0x38e   : > { %7789 = vmatprep.subr.bf16.mxu1 %v9168_v26  ;;  %v9248_v26 = vcombine.high %v1279_v3, %v1287_v30  ;;  %v1343_v10 = vld [vmem:[%s10314_s19 + $0xe30] sm:$0xff] }
 0x38f   : > { %v1351_v13 = vld [vmem:[%s10314_s19 + $0xe70] sm:$0xff] }
 0x394   : > { %7462 = vmatpush1.bf16.xpose.msra.mxu0 %v8911_v40  ;;  %v8991_v40 = vcombine.low %v1023_v17, %v1031_v18  ;;  %v1103_v17 = vld [vmem:[%s10314_s19 + $0x6b0] sm:$0xff] }
 0x395   : > { %7790 = vmatpush1.bf16.xpose.msra.mxu1 %v9167_v42  ;;  %7463 = vmatprep.subr.bf16.mxu0 %v8928_v43  ;;  %v9247_v42 = vcombine.low %v1279_v3, %v1287_v30  ;;  %v9008_v43 = vcombine.high %v1039_v31, %v1047_v35  ;;  %v1111_v18 = vld [vmem:[%s10314_s19 + $0x6f0] sm:$0xff] }
 0x396   : > { %7791 = vmatprep.subr.bf16.mxu1 %v9184_v44  ;;  %v9264_v44 = vcombine.high %v1295_v36, %v1303_v39  ;;  %v1359_v3 = vld [vmem:[%s10314_s19 + $0xeb0] sm:$0xff] }
 0x397   : > { %v1367_v30 = vld [vmem:[%s10314_s19 + $0xef0] sm:$0xff] }
 0x39c   : > { %7464 = vmatpush1.bf16.xpose.msra.mxu0 %v8927_v32  ;;  %v9007_v32 = vcombine.low %v1039_v31, %v1047_v35  ;;  %v1119_v31 = vld [vmem:[%s10314_s19 + $0x730] sm:$0xff] }
 0x39d   : > { %7792 = vmatpush1.bf16.xpose.msra.mxu1 %v9183_v60  ;;  %7465 = vmatprep.subr.bf16.mxu0 %v8944_v61  ;;  %v9263_v60 = vcombine.low %v1295_v36, %v1303_v39  ;;  %v9024_v61 = vcombine.high %v1055_v45, %v1063_v46  ;;  %v1127_v35 = vld [vmem:[%s10314_s19 + $0x770] sm:$0xff] }
 0x39e   : > { %7793 = vmatprep.subr.bf16.mxu1 %v9200_v48  ;;  %v9280_v48 = vcombine.high %v1311_v47, %v1319_v11  ;;  %v1375_v36 = vld [vmem:[%s10314_s19 + $0xf30] sm:$0xff] }
 0x39f   : > { %v1383_v39 = vld [vmem:[%s10314_s19 + $0xf70] sm:$0xff] }
 0x3a4   : > { %7466 = vmatpush1.bf16.xpose.msra.mxu0 %v8943_v59  ;;  %v9023_v59 = vcombine.low %v1055_v45, %v1063_v46  ;;  %v1135_v45 = vld [vmem:[%s10314_s19 + $0x7b0] sm:$0xff] }
 0x3a5   : > { %7794 = vmatpush1.bf16.xpose.msra.mxu1 %v9199_v1  ;;  %7467 = vmatprep.subr.bf16.mxu0 %v8960_v2  ;;  %v9279_v1 = vcombine.low %v1311_v47, %v1319_v11  ;;  %v9040_v2 = vcombine.high %v1071_v9, %v1079_v52  ;;  %v1143_v46 = vld [vmem:[%s10314_s19 + $0x7f0] sm:$0xff] }
 0x3a6   : > { %7795 = vmatprep.subr.bf16.mxu1 %v9216_v29  ;;  %v9296_v29 = vcombine.high %v1327_v53, %v1335_v58  ;;  %v1391_v47 = vld [vmem:[%s10314_s19 + $0xfb0] sm:$0xff] }
 0x3a7   : > { %v1399_v11 = vld [vmem:[%s10314_s19 + $0xff0] sm:$0xff] }
 0x3ac   : > { %7468 = vmatpush1.bf16.xpose.msra.mxu0 %v8959_v14  ;;  %v9039_v14 = vcombine.low %v1071_v9, %v1079_v52  ;;  %v896_v9 = vld [vmem:[%s10314_s19 + $0x38] sm:$0xff] }
 0x3ad   : > { %7796 = vmatpush1.bf16.xpose.msra.mxu1 %v9215_v15  ;;  %7469 = vmatprep.subr.bf16.mxu0 %v8976_v8  ;;  %v9295_v15 = vcombine.low %v1327_v53, %v1335_v58  ;;  %v9056_v8 = vcombine.high %v1087_v41, %v1095_v6  ;;  %v904_v52 = vld [vmem:[%s10314_s19 + $0x78] sm:$0xff] }
 0x3ae   : > { %7797 = vmatprep.subr.bf16.mxu1 %v9232_v16  ;;  %v9312_v16 = vcombine.high %v1343_v10, %v1351_v13  ;;  %v1152_v53 = vld [vmem:[%s10314_s19 + $0x838] sm:$0xff] }
 0x3af   : > { %v1160_v58 = vld [vmem:[%s10314_s19 + $0x878] sm:$0xff] }
 0x3b4   : > { %7470 = vmatpush1.bf16.xpose.msra.mxu0 %v8975_v20  ;;  %v9055_v20 = vcombine.low %v1087_v41, %v1095_v6  ;;  %v9122_v41 = vcombine.high %v1152_v53, %v1160_v58  ;;  %v856_v6 = vmul.f32 0.1, %v10547_v49 }
 0x3b5   : > { %7798 = vmatpush1.bf16.xpose.msra.mxu1 %v9231_v22  ;;  %7471 = vmatprep.subr.bf16.mxu0 %v8992_v51  ;;  %v9311_v22 = vcombine.low %v1343_v10, %v1351_v13  ;;  %v9072_v51 = vcombine.high %v1103_v17, %v1111_v18  ;;  %v912_v13 = vld [vmem:[%s10314_s19 + $0xb8] sm:$0xff] }
 0x3b6   : > { %7799 = vmatprep.subr.bf16.mxu1 %v9248_v26  ;;  %v9328_v26 = vcombine.high %v1359_v3, %v1367_v30 }
 0x3bc   : > { %7472 = vmatpush1.bf16.xpose.msra.mxu0 %v8991_v40  ;;  %v9071_v40 = vcombine.low %v1103_v17, %v1111_v18  ;;  %v1176_v17 = vld [vmem:[%s10314_s19 + $0x8f8] sm:$0xff] }
 0x3bd   : > { %7800 = vmatpush1.bf16.xpose.msra.mxu1 %v9247_v42  ;;  %7473 = vmatprep.subr.bf16.mxu0 %v9008_v43  ;;  %v9327_v42 = vcombine.low %v1359_v3, %v1367_v30  ;;  %v9088_v43 = vcombine.high %v1119_v31, %v1127_v35  ;;  %v9121_v3 = vcombine.low %v1152_v53, %v1160_v58 }
 0x3be   : > { %7801 = vmatprep.subr.bf16.mxu1 %v9264_v44  ;;  %v9344_v44 = vcombine.high %v1375_v36, %v1383_v39 }
 0x3c4   : > { %7474 = vmatpush1.bf16.xpose.msra.mxu0 %v9007_v32  ;;  %v9087_v32 = vcombine.low %v1119_v31, %v1127_v35 }
 0x3c5   : > { %7802 = vmatpush1.bf16.xpose.msra.mxu1 %v9263_v60  ;;  %7475 = vmatprep.subr.bf16.mxu0 %v9024_v61  ;;  %v9343_v60 = vcombine.low %v1375_v36, %v1383_v39  ;;  %v9104_v61 = vcombine.high %v1135_v45, %v1143_v46 }
 0x3c6   : > { %7803 = vmatprep.subr.bf16.mxu1 %v9280_v48  ;;  %v9360_v48 = vcombine.high %v1391_v47, %v1399_v11 }
 0x3cc   : > { %7476 = vmatpush1.bf16.xpose.msra.mxu0 %v9023_v59  ;;  %v9103_v59 = vcombine.low %v1135_v45, %v1143_v46 }
 0x3cd   : > { %7804 = vmatpush1.bf16.xpose.msra.mxu1 %v9279_v1  ;;  %7477 = vmatprep.subr.bf16.mxu0 %v9040_v2  ;;  %v9359_v1 = vcombine.low %v1391_v47, %v1399_v11  ;;  %v8866_v2 = vcombine.high %v896_v9, %v904_v52 }
 0x3ce   : > { %7805 = vmatprep.subr.bf16.mxu1 %v9296_v29  ;;  %v853_v29 = vmul.f32 0.1, %v10492_v37 }
 0x3d0   : > { %v869_v10 = vsel %vm837_vm0, %v10492_v37, %v853_v29  ;;  %v1240_v29 = vld [vmem:[%s10314_s19 + $0xaf8] sm:$0xff] }
 0x3d1   : > { %v10999_v18 = vpack.c.bf16 %v869_v10, %v869_v10 }
 0x3d4   : > { %7478 = vmatpush1.bf16.xpose.msra.mxu0 %v9039_v14  ;;  %v920_v14 = vld [vmem:[%s10314_s19 + $0xf8] sm:$0xff] }
 0x3d5   : > { %7806 = vmatpush1.bf16.xpose.msra.mxu1 %v9295_v15  ;;  %7479 = vmatprep.subr.bf16.mxu0 %v9056_v8  ;;  %v872_v15 = vsel %vm840_vm1, %v10547_v49, %v856_v6  ;;  %v8865_v8 = vcombine.low %v896_v9, %v904_v52  ;;  %v8882_v30 = vcombine.high %v912_v13, %v920_v14  ;;  %v928_v49 = vld [vmem:[%s10314_s19 + $0x138] sm:$0xff] }
 0x3d6   : > { %7807 = vmatprep.subr.bf16.mxu1 %v9312_v16  ;;  %v1168_v16 = vld [vmem:[%s10314_s19 + $0x8b8] sm:$0xff]  ;;  %v8881_v31 = vcombine.low %v912_v13, %v920_v14 }
 0x3d7   : > { %v9138_v37 = vcombine.high %v1168_v16, %v1176_v17  ;;  %v9137_v35 = vcombine.low %v1168_v16, %v1176_v17  ;;  %v992_v14 = vld [vmem:[%s10314_s19 + $0x338] sm:$0xff] }
 0x3d8   : > { %v1256_v16 = vld [vmem:[%s10314_s19 + $0xb78] sm:$0xff] }
 0x3dc   : > { %7480 = vmatpush1.bf16.xpose.msra.mxu0 %v9055_v20  ;;  %v11001_v20 = vpack.c.bf16 %v872_v15, %v872_v15  ;;  %v1000_v15 = vld [vmem:[%s10314_s19 + $0x378] sm:$0xff] }
 0x3dd   : > { %7808 = vmatpush1.bf16.xpose.msra.mxu1 %v9311_v22  ;;  %7481 = vmatprep.subr.bf16.mxu0 %v9072_v51  ;;  %v936_v22 = vld [vmem:[%s10314_s19 + $0x178] sm:$0xff] }
 0x3de   : > { %7809 = vmatprep.subr.bf16.mxu1 %v9328_v26  ;;  %v1184_v51 = vld [vmem:[%s10314_s19 + $0x938] sm:$0xff]  ;;  %v8898_v36 = vcombine.high %v928_v49, %v936_v22  ;;  %v8897_v45 = vcombine.low %v928_v49, %v936_v22 }
 0x3df   : > { %v1192_v26 = vld [vmem:[%s10314_s19 + $0x978] sm:$0xff] }
 0x3e0   : > { %v9154_v39 = vcombine.high %v1184_v51, %v1192_v26  ;;  %v9153_v46 = vcombine.low %v1184_v51, %v1192_v26  ;;  %v1008_v49 = vld [vmem:[%s10314_s19 + $0x3b8] sm:$0xff] }
 0x3e1   : > { %v1016_v22 = vld [vmem:[%s10314_s19 + $0x3f8] sm:$0xff] }
 0x3e2   : > { %v1264_v51 = vld [vmem:[%s10314_s19 + $0xbb8] sm:$0xff] }
 0x3e3   : > { %v1272_v26 = vld [vmem:[%s10314_s19 + $0xbf8] sm:$0xff] }
 0x3e4   : > { %7482 = vmatpush1.bf16.xpose.msra.mxu0 %v9071_v40  ;;  %v944_v40 = vld [vmem:[%s10314_s19 + $0x1b8] sm:$0xff] }
 0x3e5   : > { %7810 = vmatpush1.bf16.xpose.msra.mxu1 %v9327_v42  ;;  %7483 = vmatprep.subr.bf16.mxu0 %v9088_v43  ;;  %v952_v42 = vld [vmem:[%s10314_s19 + $0x1f8] sm:$0xff] }
 0x3e6   : > { %7811 = vmatprep.subr.bf16.mxu1 %v9344_v44  ;;  %v1200_v43 = vld [vmem:[%s10314_s19 + $0x9b8] sm:$0xff]  ;;  %v8914_v47 = vcombine.high %v944_v40, %v952_v42  ;;  %v8913_v9 = vcombine.low %v944_v40, %v952_v42 }
 0x3e7   : > { %v1208_v44 = vld [vmem:[%s10314_s19 + $0x9f8] sm:$0xff] }
 0x3e8   : > { %v9170_v11 = vcombine.high %v1200_v43, %v1208_v44  ;;  %v9169_v52 = vcombine.low %v1200_v43, %v1208_v44  ;;  %v1024_v40 = vld [vmem:[%s10314_s19 + $0x438] sm:$0xff] }
 0x3e9   : > { %v1032_v42 = vld [vmem:[%s10314_s19 + $0x478] sm:$0xff] }
 0x3ea   : > { %v1280_v43 = vld [vmem:[%s10314_s19 + $0xc38] sm:$0xff] }
 0x3eb   : > { %v1288_v44 = vld [vmem:[%s10314_s19 + $0xc78] sm:$0xff] }
 0x3ec   : > { %7484 = vmatpush1.bf16.xpose.msra.mxu0 %v9087_v32  ;;  %v960_v32 = vld [vmem:[%s10314_s19 + $0x238] sm:$0xff] }
 0x3ed   : > { %7812 = vmatpush1.bf16.xpose.msra.mxu1 %v9343_v60  ;;  %7485 = vmatprep.subr.bf16.mxu0 %v9104_v61  ;;  %v968_v60 = vld [vmem:[%s10314_s19 + $0x278] sm:$0xff] }
 0x3ee   : > { %7813 = vmatprep.subr.bf16.mxu1 %v9360_v48  ;;  %v1216_v61 = vld [vmem:[%s10314_s19 + $0xa38] sm:$0xff]  ;;  %v8930_v53 = vcombine.high %v960_v32, %v968_v60 }
 0x3ef   : > { %v1224_v48 = vld [vmem:[%s10314_s19 + $0xa78] sm:$0xff] }
 0x3f0   : > { %v9186_v58 = vcombine.high %v1216_v61, %v1224_v48  ;;  %v9185_v6 = vcombine.low %v1216_v61, %v1224_v48  ;;  %v1296_v61 = vld [vmem:[%s10314_s19 + $0xcb8] sm:$0xff] }
 0x3f1   : > { %v1304_v48 = vld [vmem:[%s10314_s19 + $0xcf8] sm:$0xff] }
 0x3f4   : > { %7486 = vmatpush1.bf16.xpose.msra.mxu0 %v9103_v59  ;;  %v976_v59 = vld [vmem:[%s10314_s19 + $0x2b8] sm:$0xff] }
 0x3f5   : > { %7814 = vmatpush1.bf16.xpose.msra.mxu1 %v9359_v1  ;;  %9875 = vmatprep.subr.msk.bf16.mxu0 %vm7013_vm15, %v8866_v2  ;;  %v984_v1 = vld [vmem:[%s10314_s19 + $0x2f8] sm:$0xff] }
 0x3f6   : > { %9892 = vmatprep.subr.msk.bf16.mxu1 %vm7013_vm15, %v9122_v41  ;;  %v1232_v2 = vld [vmem:[%s10314_s19 + $0xab8] sm:$0xff]  ;;  %v8929_v41 = vcombine.low %v960_v32, %v968_v60  ;;  %v8946_v10 = vcombine.high %v976_v59, %v984_v1  ;;  %v8945_v17 = vcombine.low %v976_v59, %v984_v1 }
 0x3f7   : > { %v9202_v13 = vcombine.high %v1232_v2, %v1240_v29  ;;  %v1040_v32 = vld [vmem:[%s10314_s19 + $0x4b8] sm:$0xff] }
 0x3f8   : > { %v1048_v60 = vld [vmem:[%s10314_s19 + $0x4f8] sm:$0xff] }
 0x3f9   : > { %v1056_v59 = vld [vmem:[%s10314_s19 + $0x538] sm:$0xff] }
 0x3fa   : > { %v1064_v1 = vld [vmem:[%s10314_s19 + $0x578] sm:$0xff] }
 0x3fb   : > { %7488 = vmatmul.mubr.bf16.vlgmr.msra.gmra.mrb[8].mxu0 %v10999_v18 }
 0x3fc   : > { %7816 = vmatmul.mubr.bf16.vlgmr.msra.gmra.mrb[24].mxu1 %v10999_v18  ;;  %7497 = vmatpush1.bf16.xpose.msra.mxu0 %v8865_v8  ;;  %v1248_v8 = vld [vmem:[%s10314_s19 + $0xb38] sm:$0xff] }
 0x3fd   : > { %9891 = vmatprep.mubr.msk.bf16.mxu0 %vm7013_vm15, %v11001_v20  ;;  %7825 = vmatpush1.bf16.xpose.msra.mxu1 %v9121_v3  ;;  %v9201_v3 = vcombine.low %v1232_v2, %v1240_v29  ;;  %v1312_v2 = vld [vmem:[%s10314_s19 + $0xd38] sm:$0xff] }
 0x3fe   : > { %9908 = vmatprep.mubr.msk.bf16.mxu1 %vm7013_vm15, %v11001_v20  ;;  %9876 = vmatprep.subr.msk.bf16.mxu0 %vm7013_vm15, %v8882_v30  ;;  %v8962_v30 = vcombine.high %v992_v14, %v1000_v15  ;;  %v1320_v29 = vld [vmem:[%s10314_s19 + $0xd78] sm:$0xff] }
 0x3ff   : > { %9893 = vmatprep.subr.msk.bf16.mxu1 %vm7013_vm15, %v9138_v37  ;;  %v9218_v37 = vcombine.high %v1248_v8, %v1256_v16 }
 0x404   : > { %7499 = vmatpush1.bf16.xpose.msra.mxu0 %v8881_v31  ;;  %v8961_v31 = vcombine.low %v992_v14, %v1000_v15  ;;  %v1072_v14 = vld [vmem:[%s10314_s19 + $0x5b8] sm:$0xff] }
 0x405   : > { %7827 = vmatpush1.bf16.xpose.msra.mxu1 %v9137_v35  ;;  %9877 = vmatprep.subr.msk.bf16.mxu0 %vm7013_vm15, %v8898_v36  ;;  %v9217_v35 = vcombine.low %v1248_v8, %v1256_v16  ;;  %v8978_v36 = vcombine.high %v1008_v49, %v1016_v22  ;;  %v1080_v15 = vld [vmem:[%s10314_s19 + $0x5f8] sm:$0xff] }
 0x406   : > { %9894 = vmatprep.subr.msk.bf16.mxu1 %vm7013_vm15, %v9154_v39  ;;  %v9234_v39 = vcombine.high %v1264_v51, %v1272_v26  ;;  %v1328_v8 = vld [vmem:[%s10314_s19 + $0xdb8] sm:$0xff] }
 0x407   : > { %v1336_v16 = vld [vmem:[%s10314_s19 + $0xdf8] sm:$0xff] }
 0x40c   : > { %7501 = vmatpush1.bf16.xpose.msra.mxu0 %v8897_v45  ;;  %v8977_v45 = vcombine.low %v1008_v49, %v1016_v22  ;;  %v1088_v49 = vld [vmem:[%s10314_s19 + $0x638] sm:$0xff] }
 0x40d   : > { %7829 = vmatpush1.bf16.xpose.msra.mxu1 %v9153_v46  ;;  %9878 = vmatprep.subr.msk.bf16.mxu0 %vm7013_vm15, %v8914_v47  ;;  %v9233_v46 = vcombine.low %v1264_v51, %v1272_v26  ;;  %v8994_v47 = vcombine.high %v1024_v40, %v1032_v42  ;;  %v1096_v22 = vld [vmem:[%s10314_s19 + $0x678] sm:$0xff] }
 0x40e   : > { %9895 = vmatprep.subr.msk.bf16.mxu1 %vm7013_vm15, %v9170_v11  ;;  %v9250_v11 = vcombine.high %v1280_v43, %v1288_v44  ;;  %v1344_v51 = vld [vmem:[%s10314_s19 + $0xe38] sm:$0xff] }
 0x40f   : > { %v1352_v26 = vld [vmem:[%s10314_s19 + $0xe78] sm:$0xff] }
 0x414   : > { %7503 = vmatpush1.bf16.xpose.msra.mxu0 %v8913_v9  ;;  %v8993_v9 = vcombine.low %v1024_v40, %v1032_v42  ;;  %v1104_v40 = vld [vmem:[%s10314_s19 + $0x6b8] sm:$0xff] }
 0x415   : > { %7831 = vmatpush1.bf16.xpose.msra.mxu1 %v9169_v52  ;;  %9879 = vmatprep.subr.msk.bf16.mxu0 %vm7013_vm15, %v8930_v53  ;;  %v9249_v52 = vcombine.low %v1280_v43, %v1288_v44  ;;  %v9010_v53 = vcombine.high %v1040_v32, %v1048_v60  ;;  %v1112_v42 = vld [vmem:[%s10314_s19 + $0x6f8] sm:$0xff] }
 0x416   : > { %9896 = vmatprep.subr.msk.bf16.mxu1 %vm7013_vm15, %v9186_v58  ;;  %v9266_v58 = vcombine.high %v1296_v61, %v1304_v48  ;;  %v1360_v43 = vld [vmem:[%s10314_s19 + $0xeb8] sm:$0xff] }
 0x417   : > { %v1368_v44 = vld [vmem:[%s10314_s19 + $0xef8] sm:$0xff] }
 0x41c   : > { %7505 = vmatpush1.bf16.xpose.msra.mxu0 %v8929_v41  ;;  %v9009_v41 = vcombine.low %v1040_v32, %v1048_v60  ;;  %v1120_v32 = vld [vmem:[%s10314_s19 + $0x738] sm:$0xff] }
 0x41d   : > { %7833 = vmatpush1.bf16.xpose.msra.mxu1 %v9185_v6  ;;  %9880 = vmatprep.subr.msk.bf16.mxu0 %vm7013_vm15, %v8946_v10  ;;  %v9265_v6 = vcombine.low %v1296_v61, %v1304_v48  ;;  %v9026_v10 = vcombine.high %v1056_v59, %v1064_v1  ;;  %v1128_v60 = vld [vmem:[%s10314_s19 + $0x778] sm:$0xff] }
 0x41e   : > { %9897 = vmatprep.subr.msk.bf16.mxu1 %vm7013_vm15, %v9202_v13  ;;  %v9282_v13 = vcombine.high %v1312_v2, %v1320_v29  ;;  %v1376_v61 = vld [vmem:[%s10314_s19 + $0xf38] sm:$0xff] }
 0x41f   : > { %v1384_v48 = vld [vmem:[%s10314_s19 + $0xf78] sm:$0xff] }
 0x424   : > { %7507 = vmatpush1.bf16.xpose.msra.mxu0 %v8945_v17  ;;  %v9025_v17 = vcombine.low %v1056_v59, %v1064_v1  ;;  %v1136_v59 = vld [vmem:[%s10314_s19 + $0x7b8] sm:$0xff] }
 0x425   : > { %7835 = vmatpush1.bf16.xpose.msra.mxu1 %v9201_v3  ;;  %9881 = vmatprep.subr.msk.bf16.mxu0 %vm7013_vm15, %v8962_v30  ;;  %v9281_v3 = vcombine.low %v1312_v2, %v1320_v29  ;;  %v9042_v30 = vcombine.high %v1072_v14, %v1080_v15  ;;  %v1144_v1 = vld [vmem:[%s10314_s19 + $0x7f8] sm:$0xff] }
 0x426   : > { %9898 = vmatprep.subr.msk.bf16.mxu1 %vm7013_vm15, %v9218_v37  ;;  %v9298_v37 = vcombine.high %v1328_v8, %v1336_v16  ;;  %v1392_v2 = vld [vmem:[%s10314_s19 + $0xfb8] sm:$0xff] }
 0x427   : > { %v1400_v29 = vld [vmem:[%s10314_s19 + $0xff8] sm:$0xff] }
 0x42c   : > { %7509 = vmatpush1.bf16.xpose.msra.mxu0 %v8961_v31  ;;  %v9041_v31 = vcombine.low %v1072_v14, %v1080_v15  ;;  %v1401_v14 = vld [vmem:[%s10314_s19 + $0x1000] sm:$0xff] }
 0x42d   : > { %7837 = vmatpush1.bf16.xpose.msra.mxu1 %v9217_v35  ;;  %9882 = vmatprep.subr.msk.bf16.mxu0 %vm7013_vm15, %v8978_v36  ;;  %v9297_v35 = vcombine.low %v1328_v8, %v1336_v16  ;;  %v9058_v36 = vcombine.high %v1088_v49, %v1096_v22  ;;  %v1409_v15 = vld [vmem:[%s10314_s19 + $0x1040] sm:$0xff] }
 0x42e   : > { %9899 = vmatprep.subr.msk.bf16.mxu1 %vm7013_vm15, %v9234_v39  ;;  %v9314_v39 = vcombine.high %v1344_v51, %v1352_v26  ;;  %v1657_v8 = vld [vmem:[%s10314_s19 + $0x1800] sm:$0xff] }
 0x42f   : > { %v1665_v16 = vld [vmem:[%s10314_s19 + $0x1840] sm:$0xff] }
 0x434   : > { %7511 = vmatpush1.bf16.xpose.msra.mxu0 %v8977_v45  ;;  %v9057_v45 = vcombine.low %v1088_v49, %v1096_v22  ;;  %v9620_v49 = vcombine.high %v1657_v8, %v1665_v16 }
 0x435   : > { %7839 = vmatpush1.bf16.xpose.msra.mxu1 %v9233_v46  ;;  %9883 = vmatprep.subr.msk.bf16.mxu0 %vm7013_vm15, %v8994_v47  ;;  %v9313_v46 = vcombine.low %v1344_v51, %v1352_v26  ;;  %v9074_v47 = vcombine.high %v1104_v40, %v1112_v42  ;;  %v1417_v51 = vld [vmem:[%s10314_s19 + $0x1080] sm:$0xff] }
 0x436   : > { %9900 = vmatprep.subr.msk.bf16.mxu1 %vm7013_vm15, %v9250_v11  ;;  %v9330_v11 = vcombine.high %v1360_v43, %v1368_v44  ;;  %v1425_v26 = vld [vmem:[%s10314_s19 + $0x10c0] sm:$0xff] }
 0x43c   : > { %7513 = vmatpush1.bf16.xpose.msra.mxu0 %v8993_v9  ;;  %v9073_v9 = vcombine.low %v1104_v40, %v1112_v42  ;;  %v9619_v40 = vcombine.low %v1657_v8, %v1665_v16  ;;  %v9380_v42 = vcombine.high %v1417_v51, %v1425_v26  ;;  %v1489_v8 = vld [vmem:[%s10314_s19 + $0x12c0] sm:$0xff] }
 0x43d   : > { %7841 = vmatpush1.bf16.xpose.msra.mxu1 %v9249_v52  ;;  %9884 = vmatprep.subr.msk.bf16.mxu0 %vm7013_vm15, %v9010_v53  ;;  %v9329_v52 = vcombine.low %v1360_v43, %v1368_v44  ;;  %v9090_v53 = vcombine.high %v1120_v32, %v1128_v60  ;;  %v1441_v44 = vld [vmem:[%s10314_s19 + $0x1140] sm:$0xff] }
 0x43e   : > { %9901 = vmatprep.subr.msk.bf16.mxu1 %vm7013_vm15, %v9266_v58  ;;  %v9346_v58 = vcombine.high %v1376_v61, %v1384_v48  ;;  %v1737_v16 = vld [vmem:[%s10314_s19 + $0x1a80] sm:$0xff] }
 0x444   : > { %7515 = vmatpush1.bf16.xpose.msra.mxu0 %v9009_v41  ;;  %v9089_v41 = vcombine.low %v1120_v32, %v1128_v60 }
 0x445   : > { %7843 = vmatpush1.bf16.xpose.msra.mxu1 %v9265_v6  ;;  %9885 = vmatprep.subr.msk.bf16.mxu0 %vm7013_vm15, %v9026_v10  ;;  %v9345_v6 = vcombine.low %v1376_v61, %v1384_v48  ;;  %v9106_v10 = vcombine.high %v1136_v59, %v1144_v1  ;;  %v1457_v61 = vld [vmem:[%s10314_s19 + $0x11c0] sm:$0xff] }
 0x446   : > { %9902 = vmatprep.subr.msk.bf16.mxu1 %vm7013_vm15, %v9282_v13  ;;  %v9362_v13 = vcombine.high %v1392_v2, %v1400_v29  ;;  %v1705_v48 = vld [vmem:[%s10314_s19 + $0x1980] sm:$0xff] }
 0x44c   : > { %7517 = vmatpush1.bf16.xpose.msra.mxu0 %v9025_v17  ;;  %v9105_v17 = vcombine.low %v1136_v59, %v1144_v1  ;;  %v1465_v1 = vld [vmem:[%s10314_s19 + $0x1200] sm:$0xff] }
 0x44d   : > { %7845 = vmatpush1.bf16.xpose.msra.mxu1 %v9281_v3  ;;  %9886 = vmatprep.subr.msk.bf16.mxu0 %vm7013_vm15, %v9042_v30  ;;  %v9361_v3 = vcombine.low %v1392_v2, %v1400_v29  ;;  %v9364_v30 = vcombine.high %v1401_v14, %v1409_v15  ;;  %v1473_v2 = vld [vmem:[%s10314_s19 + $0x1240] sm:$0xff] }
 0x44e   : > { %9903 = vmatprep.subr.msk.bf16.mxu1 %vm7013_vm15, %v9298_v37  ;;  %v855_v37 = vmul.f32 0.1, %v10545_v5  ;;  %v1721_v29 = vld [vmem:[%s10314_s19 + $0x1a00] sm:$0xff] }
 0x450   : > { %v871_v22 = vsel %vm839_vm2, %v10545_v5, %v855_v37  ;;  %v1433_v5 = vld [vmem:[%s10314_s19 + $0x1100] sm:$0xff] }
 0x451   : > { %v9396_v32 = vcombine.high %v1433_v5, %v1441_v44 }
 0x454   : > { %7519 = vmatpush1.bf16.xpose.msra.mxu0 %v9041_v31  ;;  %v9363_v31 = vcombine.low %v1401_v14, %v1409_v15  ;;  %v1481_v15 = vld [vmem:[%s10314_s19 + $0x1280] sm:$0xff] }
 0x455   : > { %7847 = vmatpush1.bf16.xpose.msra.mxu1 %v9297_v35  ;;  %9887 = vmatprep.subr.msk.bf16.mxu0 %vm7013_vm15, %v9058_v36  ;;  %v1673_v35 = vld [vmem:[%s10314_s19 + $0x1880] sm:$0xff]  ;;  %v9444_v37 = vcombine.high %v1481_v15, %v1489_v8 }
 0x456   : > { %9904 = vmatprep.subr.msk.bf16.mxu1 %vm7013_vm15, %v9314_v39  ;;  %v1681_v36 = vld [vmem:[%s10314_s19 + $0x18c0] sm:$0xff]  ;;  %v11106_v39 = vpack.c.bf16 %v871_v22, %v871_v22 }
 0x457   : > { %v9636_v43 = vcombine.high %v1673_v35, %v1681_v36  ;;  %v1497_v22 = vld [vmem:[%s10314_s19 + $0x1300] sm:$0xff] }
 0x45c   : > { %7521 = vmatpush1.bf16.xpose.msra.mxu0 %v9057_v45  ;;  %v1689_v45 = vld [vmem:[%s10314_s19 + $0x1900] sm:$0xff] }
 0x45d   : > { %7849 = vmatpush1.bf16.xpose.msra.mxu1 %v9313_v46  ;;  %9888 = vmatprep.subr.msk.bf16.mxu0 %vm7013_vm15, %v9074_v47  ;;  %v1697_v46 = vld [vmem:[%s10314_s19 + $0x1940] sm:$0xff]  ;;  %v9379_v47 = vcombine.low %v1417_v51, %v1425_v26 }
 0x45e   : > { %9905 = vmatprep.subr.msk.bf16.mxu1 %vm7013_vm15, %v9330_v11  ;;  %v9635_v11 = vcombine.low %v1673_v35, %v1681_v36  ;;  %v9652_v60 = vcombine.high %v1689_v45, %v1697_v46  ;;  %v1505_v51 = vld [vmem:[%s10314_s19 + $0x1340] sm:$0xff]  ;;  %v9443_v35 = vcombine.low %v1481_v15, %v1489_v8 }
 0x45f   : > { %v1753_v26 = vld [vmem:[%s10314_s19 + $0x1b00] sm:$0xff] }
 0x460   : > { %v1569_v15 = vld [vmem:[%s10314_s19 + $0x1540] sm:$0xff] }
 0x461   : > { %v1817_v8 = vld [vmem:[%s10314_s19 + $0x1d00] sm:$0xff] }
 0x464   : > { %7523 = vmatpush1.bf16.xpose.msra.mxu0 %v9073_v9  ;;  %v1713_v9 = vld [vmem:[%s10314_s19 + $0x19c0] sm:$0xff] }
 0x465   : > { %7851 = vmatpush1.bf16.xpose.msra.mxu1 %v9329_v52  ;;  %9889 = vmatprep.subr.msk.bf16.mxu0 %vm7013_vm15, %v9090_v53  ;;  %v9395_v52 = vcombine.low %v1433_v5, %v1441_v44  ;;  %v9651_v53 = vcombine.low %v1689_v45, %v1697_v46  ;;  %v9668_v59 = vcombine.high %v1705_v48, %v1713_v9  ;;  %v1521_v5 = vld [vmem:[%s10314_s19 + $0x13c0] sm:$0xff] }
 0x466   : > { %9906 = vmatprep.subr.msk.bf16.mxu1 %vm7013_vm15, %v9346_v58  ;;  %v1769_v44 = vld [vmem:[%s10314_s19 + $0x1b80] sm:$0xff]  ;;  %v9459_v46 = vcombine.low %v1497_v22, %v1505_v51 }
 0x467   : > { %v1777_v45 = vld [vmem:[%s10314_s19 + $0x1bc0] sm:$0xff] }
 0x46c   : > { %7525 = vmatpush1.bf16.xpose.msra.mxu0 %v9089_v41  ;;  %v1729_v41 = vld [vmem:[%s10314_s19 + $0x1a40] sm:$0xff] }
 0x46d   : > { %7853 = vmatpush1.bf16.xpose.msra.mxu1 %v9345_v6  ;;  %9890 = vmatprep.subr.msk.bf16.mxu0 %vm7013_vm15, %v9106_v10  ;;  %v9667_v10 = vcombine.low %v1705_v48, %v1713_v9  ;;  %v9684_v14 = vcombine.high %v1721_v29, %v1729_v41  ;;  %v1793_v48 = vld [vmem:[%s10314_s19 + $0x1c40] sm:$0xff] }
 0x46e   : > { %9907 = vmatprep.subr.msk.bf16.mxu1 %vm7013_vm15, %v9362_v13  ;;  %v9428_v13 = vcombine.high %v1465_v1, %v1473_v2 }
 0x474   : > { %7527 = vmatpush1.bf16.xpose.msra.mxu0 %v9105_v17  ;;  %v1745_v17 = vld [vmem:[%s10314_s19 + $0x1ac0] sm:$0xff] }
 0x475   : > { %7855 = vmatpush1.bf16.xpose.msra.mxu1 %v9361_v3  ;;  %7865 = vmatprep.subr.bf16.mxu0 %v9364_v30  ;;  %v9427_v3 = vcombine.low %v1465_v1, %v1473_v2  ;;  %v9683_v30 = vcombine.low %v1721_v29, %v1729_v41  ;;  %v9699_v36 = vcombine.low %v1737_v16, %v1745_v17  ;;  %v1553_v1 = vld [vmem:[%s10314_s19 + $0x14c0] sm:$0xff] }
 0x476   : > { %8193 = vmatprep.subr.bf16.mxu1 %v9620_v49  ;;  %v9700_v49 = vcombine.high %v1737_v16, %v1745_v17  ;;  %v1801_v2 = vld [vmem:[%s10314_s19 + $0x1c80] sm:$0xff] }
 0x477   : > { %v1809_v29 = vld [vmem:[%s10314_s19 + $0x1cc0] sm:$0xff] }
 0x478   : > { %v1825_v16 = vld [vmem:[%s10314_s19 + $0x1d40] sm:$0xff] }
 0x47b   : > { %7529 = vmatmul.mubr.bf16.vlgmr.msra.gmra.mrb[8].mxu0 %v11106_v39 }
 0x47c   : > { %7857 = vmatmul.mubr.bf16.vlgmr.msra.gmra.mrb[24].mxu1 %v11106_v39  ;;  %7866 = vmatpush1.bf16.xpose.msra.mxu0 %v9363_v31  ;;  %v1761_v31 = vld [vmem:[%s10314_s19 + $0x1b40] sm:$0xff] }
 0x47d   : > { %7897 = vmatprep.mubr.bf16.mxu0 %v10475_v24  ;;  %8194 = vmatpush1.bf16.xpose.msra.mxu1 %v9619_v40  ;;  %v9460_v40 = vcombine.high %v1497_v22, %v1505_v51  ;;  %v1585_v22 = vld [vmem:[%s10314_s19 + $0x15c0] sm:$0xff] }
 0x47e   : > { %8225 = vmatprep.mubr.bf16.mxu1 %v10475_v24  ;;  %7867 = vmatprep.subr.bf16.mxu0 %v9380_v42  ;;  %v1449_v24 = vld [vmem:[%s10314_s19 + $0x1180] sm:$0xff]  ;;  %v9716_v42 = vcombine.high %v1753_v26, %v1761_v31 }
 0x47f   : > { %8195 = vmatprep.subr.bf16.mxu1 %v9636_v43  ;;  %v9412_v58 = vcombine.high %v1449_v24, %v1457_v61  ;;  %v9411_v6 = vcombine.low %v1449_v24, %v1457_v61  ;;  %v1513_v43 = vld [vmem:[%s10314_s19 + $0x1380] sm:$0xff] }
 0x480   : > { %v1537_v24 = vld [vmem:[%s10314_s19 + $0x1440] sm:$0xff]  ;;  %v9475_v9 = vcombine.low %v1513_v43, %v1521_v5 }
 0x481   : > { %v1785_v61 = vld [vmem:[%s10314_s19 + $0x1c00] sm:$0xff] }
 0x482   : > { %v1833_v51 = vld [vmem:[%s10314_s19 + $0x1d80] sm:$0xff] }
 0x484   : > { %7868 = vmatpush1.bf16.xpose.msra.mxu0 %v9379_v47  ;;  %v9715_v47 = vcombine.low %v1753_v26, %v1761_v31  ;;  %v1841_v26 = vld [vmem:[%s10314_s19 + $0x1dc0] sm:$0xff] }
 0x485   : > { %8196 = vmatpush1.bf16.xpose.msra.mxu1 %v9635_v11  ;;  %7869 = vmatprep.subr.bf16.mxu0 %v9396_v32  ;;  %v9476_v11 = vcombine.high %v1513_v43, %v1521_v5  ;;  %v9732_v32 = vcombine.high %v1769_v44, %v1777_v45  ;;  %v1601_v43 = vld [vmem:[%s10314_s19 + $0x1640] sm:$0xff] }
 0x486   : > { %8197 = vmatprep.subr.bf16.mxu1 %v9652_v60  ;;  %v1529_v60 = vld [vmem:[%s10314_s19 + $0x1400] sm:$0xff] }
 0x487   : > { %v9491_v41 = vcombine.low %v1529_v60, %v1537_v24  ;;  %v1849_v5 = vld [vmem:[%s10314_s19 + $0x1e00] sm:$0xff] }
 0x48c   : > { %7870 = vmatpush1.bf16.xpose.msra.mxu0 %v9395_v52  ;;  %v9731_v52 = vcombine.low %v1769_v44, %v1777_v45  ;;  %v1857_v44 = vld [vmem:[%s10314_s19 + $0x1e40] sm:$0xff] }
 0x48d   : > { %8198 = vmatpush1.bf16.xpose.msra.mxu1 %v9651_v53  ;;  %7871 = vmatprep.subr.bf16.mxu0 %v9412_v58  ;;  %v9492_v53 = vcombine.high %v1529_v60, %v1537_v24  ;;  %v9748_v58 = vcombine.high %v1785_v61, %v1793_v48  ;;  %v1617_v60 = vld [vmem:[%s10314_s19 + $0x16c0] sm:$0xff] }
 0x48e   : > { %8199 = vmatprep.subr.bf16.mxu1 %v9668_v59  ;;  %v1545_v59 = vld [vmem:[%s10314_s19 + $0x1480] sm:$0xff] }
 0x48f   : > { %v9507_v17 = vcombine.low %v1545_v59, %v1553_v1  ;;  %v1865_v24 = vld [vmem:[%s10314_s19 + $0x1e80] sm:$0xff] }
 0x494   : > { %7872 = vmatpush1.bf16.xpose.msra.mxu0 %v9411_v6  ;;  %v9747_v6 = vcombine.low %v1785_v61, %v1793_v48  ;;  %v1873_v61 = vld [vmem:[%s10314_s19 + $0x1ec0] sm:$0xff] }
 0x495   : > { %8200 = vmatpush1.bf16.xpose.msra.mxu1 %v9667_v10  ;;  %7873 = vmatprep.subr.bf16.mxu0 %v9428_v13  ;;  %v9508_v10 = vcombine.high %v1545_v59, %v1553_v1  ;;  %v9764_v13 = vcombine.high %v1801_v2, %v1809_v29  ;;  %v1633_v59 = vld [vmem:[%s10314_s19 + $0x1740] sm:$0xff] }
 0x496   : > { %8201 = vmatprep.subr.bf16.mxu1 %v9684_v14  ;;  %v1561_v14 = vld [vmem:[%s10314_s19 + $0x1500] sm:$0xff] }
 0x497   : > { %v9523_v31 = vcombine.low %v1561_v14, %v1569_v15  ;;  %v1881_v1 = vld [vmem:[%s10314_s19 + $0x1f00] sm:$0xff] }
 0x49c   : > { %7874 = vmatpush1.bf16.xpose.msra.mxu0 %v9427_v3  ;;  %v9763_v3 = vcombine.low %v1801_v2, %v1809_v29  ;;  %v1889_v2 = vld [vmem:[%s10314_s19 + $0x1f40] sm:$0xff] }
 0x49d   : > { %8202 = vmatpush1.bf16.xpose.msra.mxu1 %v9683_v30  ;;  %7875 = vmatprep.subr.bf16.mxu0 %v9444_v37  ;;  %v9524_v30 = vcombine.high %v1561_v14, %v1569_v15  ;;  %v9780_v37 = vcombine.high %v1817_v8, %v1825_v16  ;;  %v1649_v14 = vld [vmem:[%s10314_s19 + $0x17c0] sm:$0xff] }
 0x49e   : > { %8203 = vmatprep.subr.bf16.mxu1 %v9700_v49  ;;  %v1577_v49 = vld [vmem:[%s10314_s19 + $0x1580] sm:$0xff] }
 0x49f   : > { %v9539_v45 = vcombine.low %v1577_v49, %v1585_v22  ;;  %v1897_v15 = vld [vmem:[%s10314_s19 + $0x1f80] sm:$0xff] }
 0x4a4   : > { %7876 = vmatpush1.bf16.xpose.msra.mxu0 %v9443_v35  ;;  %v9779_v35 = vcombine.low %v1817_v8, %v1825_v16  ;;  %v1905_v8 = vld [vmem:[%s10314_s19 + $0x1fc0] sm:$0xff] }
 0x4a5   : > { %8204 = vmatpush1.bf16.xpose.msra.mxu1 %v9699_v36  ;;  %7877 = vmatprep.subr.bf16.mxu0 %v9460_v40  ;;  %v9540_v36 = vcombine.high %v1577_v49, %v1585_v22  ;;  %v9796_v40 = vcombine.high %v1833_v51, %v1841_v26  ;;  %v1410_v49 = vld [vmem:[%s10314_s19 + $0x1048] sm:$0xff] }
 0x4a6   : > { %8205 = vmatprep.subr.bf16.mxu1 %v9716_v42  ;;  %v1593_v42 = vld [vmem:[%s10314_s19 + $0x1600] sm:$0xff]  ;;  %v1658_v22 = vld [vmem:[%s10314_s19 + $0x1808] sm:$0xff] }
 0x4a7   : > { %v9555_v48 = vcombine.low %v1593_v42, %v1601_v43 }
 0x4ac   : > { %7878 = vmatpush1.bf16.xpose.msra.mxu0 %v9459_v46  ;;  %v9795_v46 = vcombine.low %v1833_v51, %v1841_v26  ;;  %v1666_v51 = vld [vmem:[%s10314_s19 + $0x1848] sm:$0xff] }
 0x4ad   : > { %8206 = vmatpush1.bf16.xpose.msra.mxu1 %v9715_v47  ;;  %7879 = vmatprep.subr.bf16.mxu0 %v9476_v11  ;;  %v9556_v47 = vcombine.high %v1593_v42, %v1601_v43  ;;  %v9812_v11 = vcombine.high %v1849_v5, %v1857_v44  ;;  %v1426_v42 = vld [vmem:[%s10314_s19 + $0x10c8] sm:$0xff] }
 0x4ae   : > { %8207 = vmatprep.subr.bf16.mxu1 %v9732_v32  ;;  %v1609_v32 = vld [vmem:[%s10314_s19 + $0x1680] sm:$0xff] }
 0x4af   : > { %v9571_v29 = vcombine.low %v1609_v32, %v1617_v60 }
 0x4b4   : > { %7880 = vmatpush1.bf16.xpose.msra.mxu0 %v9475_v9  ;;  %v9811_v9 = vcombine.low %v1849_v5, %v1857_v44  ;;  %v1674_v5 = vld [vmem:[%s10314_s19 + $0x1888] sm:$0xff] }
 0x4b5   : > { %8208 = vmatpush1.bf16.xpose.msra.mxu1 %v9731_v52  ;;  %7881 = vmatprep.subr.bf16.mxu0 %v9492_v53  ;;  %v9572_v52 = vcombine.high %v1609_v32, %v1617_v60  ;;  %v9828_v53 = vcombine.high %v1865_v24, %v1873_v61  ;;  %v1682_v44 = vld [vmem:[%s10314_s19 + $0x18c8] sm:$0xff] }
 0x4b6   : > { %8209 = vmatprep.subr.bf16.mxu1 %v9748_v58  ;;  %v1625_v58 = vld [vmem:[%s10314_s19 + $0x1700] sm:$0xff]  ;;  %v1442_v32 = vld [vmem:[%s10314_s19 + $0x1148] sm:$0xff] }
 0x4b7   : > { %v9587_v16 = vcombine.low %v1625_v58, %v1633_v59  ;;  %v1690_v60 = vld [vmem:[%s10314_s19 + $0x1908] sm:$0xff] }
 0x4bc   : > { %7882 = vmatpush1.bf16.xpose.msra.mxu0 %v9491_v41  ;;  %v9827_v41 = vcombine.low %v1865_v24, %v1873_v61  ;;  %v1698_v24 = vld [vmem:[%s10314_s19 + $0x1948] sm:$0xff] }
 0x4bd   : > { %8210 = vmatpush1.bf16.xpose.msra.mxu1 %v9747_v6  ;;  %7883 = vmatprep.subr.bf16.mxu0 %v9508_v10  ;;  %v9588_v6 = vcombine.high %v1625_v58, %v1633_v59  ;;  %v9844_v10 = vcombine.high %v1881_v1, %v1889_v2  ;;  %v1714_v58 = vld [vmem:[%s10314_s19 + $0x19c8] sm:$0xff] }
 0x4be   : > { %8211 = vmatprep.subr.bf16.mxu1 %v9764_v13  ;;  %v1641_v13 = vld [vmem:[%s10314_s19 + $0x1780] sm:$0xff] }
 0x4bf   : > { %v9603_v26 = vcombine.low %v1641_v13, %v1649_v14 }
 0x4c4   : > { %7884 = vmatpush1.bf16.xpose.msra.mxu0 %v9507_v17  ;;  %v9843_v17 = vcombine.low %v1881_v1, %v1889_v2  ;;  %v9653_v1 = vcombine.low %v1690_v60, %v1698_v24 }
 0x4c5   : > { %8212 = vmatpush1.bf16.xpose.msra.mxu1 %v9763_v3  ;;  %7885 = vmatprep.subr.bf16.mxu0 %v9524_v30  ;;  %v9604_v3 = vcombine.high %v1641_v13, %v1649_v14  ;;  %v9860_v30 = vcombine.high %v1897_v15, %v1905_v8  ;;  %v1730_v13 = vld [vmem:[%s10314_s19 + $0x1a48] sm:$0xff] }
 0x4c6   : > { %8213 = vmatprep.subr.bf16.mxu1 %v9780_v37  ;;  %v1402_v37 = vld [vmem:[%s10314_s19 + $0x1008] sm:$0xff] }
 0x4c7   : > { %v9365_v43 = vcombine.low %v1402_v37, %v1410_v49 }
 0x4cc   : > { %7886 = vmatpush1.bf16.xpose.msra.mxu0 %v9523_v31  ;;  %v9859_v31 = vcombine.low %v1897_v15, %v1905_v8 }
 0x4cd   : > { %8214 = vmatpush1.bf16.xpose.msra.mxu1 %v9779_v35  ;;  %7887 = vmatprep.subr.bf16.mxu0 %v9540_v36  ;;  %v9366_v35 = vcombine.high %v1402_v37, %v1410_v49  ;;  %v9622_v36 = vcombine.high %v1658_v22, %v1666_v51  ;;  %v1746_v37 = vld [vmem:[%s10314_s19 + $0x1ac8] sm:$0xff] }
 0x4ce   : > { %8215 = vmatprep.subr.bf16.mxu1 %v9796_v40  ;;  %v1418_v40 = vld [vmem:[%s10314_s19 + $0x1088] sm:$0xff] }
 0x4cf   : > { %v9381_v61 = vcombine.low %v1418_v40, %v1426_v42 }
 0x4d4   : > { %7888 = vmatpush1.bf16.xpose.msra.mxu0 %v9539_v45  ;;  %v9621_v45 = vcombine.low %v1658_v22, %v1666_v51 }
 0x4d5   : > { %8216 = vmatpush1.bf16.xpose.msra.mxu1 %v9795_v46  ;;  %7889 = vmatprep.subr.bf16.mxu0 %v9556_v47  ;;  %v9382_v46 = vcombine.high %v1418_v40, %v1426_v42  ;;  %v9638_v47 = vcombine.high %v1674_v5, %v1682_v44  ;;  %v1762_v40 = vld [vmem:[%s10314_s19 + $0x1b48] sm:$0xff] }
 0x4d6   : > { %8217 = vmatprep.subr.bf16.mxu1 %v9812_v11  ;;  %v1434_v11 = vld [vmem:[%s10314_s19 + $0x1108] sm:$0xff] }
 0x4d7   : > { %v9397_v59 = vcombine.low %v1434_v11, %v1442_v32 }
 0x4dc   : > { %7890 = vmatpush1.bf16.xpose.msra.mxu0 %v9555_v48  ;;  %v9637_v48 = vcombine.low %v1674_v5, %v1682_v44 }
 0x4dd   : > { %8218 = vmatpush1.bf16.xpose.msra.mxu1 %v9811_v9  ;;  %7891 = vmatprep.subr.bf16.mxu0 %v9572_v52  ;;  %v9398_v9 = vcombine.high %v1434_v11, %v1442_v32  ;;  %v1458_v52 = vld [vmem:[%s10314_s19 + $0x11c8] sm:$0xff] }
 0x4de   : > { %8219 = vmatprep.subr.bf16.mxu1 %v9828_v53  ;;  %v1706_v53 = vld [vmem:[%s10314_s19 + $0x1988] sm:$0xff] }
 0x4df   : > { %v9669_v15 = vcombine.low %v1706_v53, %v1714_v58  ;;  %v1778_v11 = vld [vmem:[%s10314_s19 + $0x1bc8] sm:$0xff] }
 0x4e4   : > { %7892 = vmatpush1.bf16.xpose.msra.mxu0 %v9571_v29  ;;  %v9670_v29 = vcombine.high %v1706_v53, %v1714_v58 }
 0x4e5   : > { %8220 = vmatpush1.bf16.xpose.msra.mxu1 %v9827_v41  ;;  %7893 = vmatprep.subr.bf16.mxu0 %v9588_v6  ;;  %v1466_v41 = vld [vmem:[%s10314_s19 + $0x1208] sm:$0xff] }
 0x4e6   : > { %8221 = vmatprep.subr.bf16.mxu1 %v9844_v10  ;;  %v1474_v6 = vld [vmem:[%s10314_s19 + $0x1248] sm:$0xff] }
 0x4e7   : > { %v1722_v10 = vld [vmem:[%s10314_s19 + $0x1a08] sm:$0xff]  ;;  %v9430_v8 = vcombine.high %v1466_v41, %v1474_v6  ;;  %v9429_v49 = vcombine.low %v1466_v41, %v1474_v6 }
 0x4e8   : > { %v9685_v22 = vcombine.low %v1722_v10, %v1730_v13  ;;  %v1810_v41 = vld [vmem:[%s10314_s19 + $0x1cc8] sm:$0xff] }
 0x4ec   : > { %7894 = vmatpush1.bf16.xpose.msra.mxu0 %v9587_v16  ;;  %v9686_v16 = vcombine.high %v1722_v10, %v1730_v13 }
 0x4ed   : > { %8222 = vmatpush1.bf16.xpose.msra.mxu1 %v9843_v17  ;;  %7895 = vmatprep.subr.bf16.mxu0 %v9604_v3  ;;  %v1482_v17 = vld [vmem:[%s10314_s19 + $0x1288] sm:$0xff] }
 0x4ee   : > { %8223 = vmatprep.subr.bf16.mxu1 %v9860_v30  ;;  %v1490_v3 = vld [vmem:[%s10314_s19 + $0x12c8] sm:$0xff] }
 0x4ef   : > { %v1738_v30 = vld [vmem:[%s10314_s19 + $0x1a88] sm:$0xff]  ;;  %v9446_v51 = vcombine.high %v1482_v17, %v1490_v3  ;;  %v9445_v42 = vcombine.low %v1482_v17, %v1490_v3 }
 0x4f0   : > { %v1826_v17 = vld [vmem:[%s10314_s19 + $0x1d48] sm:$0xff] }
 0x4f4   : > { %7896 = vmatpush1.bf16.xpose.msra.mxu0 %v9603_v26  ;;  %v9702_v26 = vcombine.high %v1738_v30, %v1746_v37 }
 0x4f5   : > { %8224 = vmatpush1.bf16.xpose.msra.mxu1 %v9859_v31  ;;  %7906 = vmatprep.subr.bf16.mxu0 %v9366_v35  ;;  %v1498_v31 = vld [vmem:[%s10314_s19 + $0x1308] sm:$0xff] }
 0x4f6   : > { %8234 = vmatprep.subr.bf16.mxu1 %v9622_v36  ;;  %v1506_v35 = vld [vmem:[%s10314_s19 + $0x1348] sm:$0xff] }
 0x4f7   : > { %v1754_v36 = vld [vmem:[%s10314_s19 + $0x1b08] sm:$0xff]  ;;  %v9462_v5 = vcombine.high %v1498_v31, %v1506_v35  ;;  %v9461_v32 = vcombine.low %v1498_v31, %v1506_v35 }
 0x4f8   : > { %v9718_v44 = vcombine.high %v1754_v36, %v1762_v40  ;;  %v1842_v31 = vld [vmem:[%s10314_s19 + $0x1dc8] sm:$0xff] }
 0x4fb   : > { %7898 = vmatmul.mubr.bf16.vlgmr.msra.gmra.mrb[12].mxu0 %v10479_v27 }
 0x4fc   : > { %8226 = vmatmul.mubr.bf16.vlgmr.msra.gmra.mrb[28].mxu1 %v10479_v27  ;;  %7907 = vmatpush1.bf16.xpose.msra.mxu0 %v9365_v43  ;;  %v9654_v27 = vcombine.high %v1690_v60, %v1698_v24  ;;  %v9701_v43 = vcombine.low %v1738_v30, %v1746_v37  ;;  %v9717_v60 = vcombine.low %v1754_v36, %v1762_v40 }
 0x4fd   : > { %7938 = vmatprep.mubr.bf16.mxu0 %v10500_v62  ;;  %8235 = vmatpush1.bf16.xpose.msra.mxu1 %v9621_v45  ;;  %v1514_v45 = vld [vmem:[%s10314_s19 + $0x1388] sm:$0xff] }
 0x4fe   : > { %8266 = vmatprep.mubr.bf16.mxu1 %v10500_v62  ;;  %7908 = vmatprep.subr.bf16.mxu0 %v9382_v46  ;;  %v1450_v62 = vld [vmem:[%s10314_s19 + $0x1188] sm:$0xff] }
 0x4ff   : > { %8236 = vmatprep.subr.bf16.mxu1 %v9638_v47  ;;  %v9414_v2 = vcombine.high %v1450_v62, %v1458_v52  ;;  %v9413_v14 = vcombine.low %v1450_v62, %v1458_v52  ;;  %v1522_v46 = vld [vmem:[%s10314_s19 + $0x13c8] sm:$0xff] }
 0x500   : > { %v1770_v47 = vld [vmem:[%s10314_s19 + $0x1b88] sm:$0xff]  ;;  %v9478_v24 = vcombine.high %v1514_v45, %v1522_v46  ;;  %v9477_v52 = vcombine.low %v1514_v45, %v1522_v46 }
 0x501   : > { %v1794_v62 = vld [vmem:[%s10314_s19 + $0x1c48] sm:$0xff]  ;;  %v9733_v53 = vcombine.low %v1770_v47, %v1778_v11 }
 0x504   : > { %7909 = vmatpush1.bf16.xpose.msra.mxu0 %v9381_v61  ;;  %v9734_v61 = vcombine.high %v1770_v47, %v1778_v11  ;;  %v1850_v47 = vld [vmem:[%s10314_s19 + $0x1e08] sm:$0xff] }
 0x505   : > { %8237 = vmatpush1.bf16.xpose.msra.mxu1 %v9637_v48  ;;  %7910 = vmatprep.subr.bf16.mxu0 %v9398_v9  ;;  %v1530_v48 = vld [vmem:[%s10314_s19 + $0x1408] sm:$0xff] }
 0x506   : > { %8238 = vmatprep.subr.bf16.mxu1 %v9654_v27  ;;  %v1538_v9 = vld [vmem:[%s10314_s19 + $0x1448] sm:$0xff] }
 0x507   : > { %v1786_v27 = vld [vmem:[%s10314_s19 + $0x1c08] sm:$0xff]  ;;  %v9494_v58 = vcombine.high %v1530_v48, %v1538_v9  ;;  %v9493_v6 = vcombine.low %v1530_v48, %v1538_v9 }
 0x508   : > { %v9749_v10 = vcombine.low %v1786_v27, %v1794_v62  ;;  %v1858_v11 = vld [vmem:[%s10314_s19 + $0x1e48] sm:$0xff] }
 0x50c   : > { %7911 = vmatpush1.bf16.xpose.msra.mxu0 %v9397_v59  ;;  %v9750_v59 = vcombine.high %v1786_v27, %v1794_v62  ;;  %v9814_v62 = vcombine.high %v1850_v47, %v1858_v11 }
 0x50d   : > { %8239 = vmatpush1.bf16.xpose.msra.mxu1 %v9653_v1  ;;  %7912 = vmatprep.subr.bf16.mxu0 %v9414_v2  ;;  %v1546_v1 = vld [vmem:[%s10314_s19 + $0x1488] sm:$0xff] }
 0x50e   : > { %8240 = vmatprep.subr.bf16.mxu1 %v9670_v29  ;;  %v1554_v2 = vld [vmem:[%s10314_s19 + $0x14c8] sm:$0xff] }
 0x50f   : > { %v1802_v29 = vld [vmem:[%s10314_s19 + $0x1c88] sm:$0xff]  ;;  %v9510_v13 = vcombine.high %v1546_v1, %v1554_v2  ;;  %v9509_v3 = vcombine.low %v1546_v1, %v1554_v2 }
 0x510   : > { %v9765_v30 = vcombine.low %v1802_v29, %v1810_v41  ;;  %v1874_v1 = vld [vmem:[%s10314_s19 + $0x1ec8] sm:$0xff] }
 0x514   : > { %7913 = vmatpush1.bf16.xpose.msra.mxu0 %v9413_v14  ;;  %v9766_v14 = vcombine.high %v1802_v29, %v1810_v41  ;;  %v9813_v29 = vcombine.low %v1850_v47, %v1858_v11 }
 0x515   : > { %8241 = vmatpush1.bf16.xpose.msra.mxu1 %v9669_v15  ;;  %7914 = vmatprep.subr.bf16.mxu0 %v9430_v8  ;;  %v1562_v15 = vld [vmem:[%s10314_s19 + $0x1508] sm:$0xff] }
 0x516   : > { %8242 = vmatprep.subr.bf16.mxu1 %v9686_v16  ;;  %v1570_v8 = vld [vmem:[%s10314_s19 + $0x1548] sm:$0xff] }
 0x517   : > { %v1818_v16 = vld [vmem:[%s10314_s19 + $0x1d08] sm:$0xff]  ;;  %v9526_v37 = vcombine.high %v1562_v15, %v1570_v8  ;;  %v9525_v35 = vcombine.low %v1562_v15, %v1570_v8 }
 0x518   : > { %v9781_v36 = vcombine.low %v1818_v16, %v1826_v17  ;;  %v1890_v15 = vld [vmem:[%s10314_s19 + $0x1f48] sm:$0xff] }
 0x51c   : > { %7915 = vmatpush1.bf16.xpose.msra.mxu0 %v9429_v49  ;;  %v9782_v49 = vcombine.high %v1818_v16, %v1826_v17 }
 0x51d   : > { %8243 = vmatpush1.bf16.xpose.msra.mxu1 %v9685_v22  ;;  %7916 = vmatprep.subr.bf16.mxu0 %v9446_v51  ;;  %v1578_v22 = vld [vmem:[%s10314_s19 + $0x1588] sm:$0xff] }
 0x51e   : > { %8244 = vmatprep.subr.bf16.mxu1 %v9702_v26  ;;  %v1586_v51 = vld [vmem:[%s10314_s19 + $0x15c8] sm:$0xff] }
 0x51f   : > { %v1834_v26 = vld [vmem:[%s10314_s19 + $0x1d88] sm:$0xff]  ;;  %v9542_v40 = vcombine.high %v1578_v22, %v1586_v51 }
 0x520   : > { %v9797_v9 = vcombine.low %v1834_v26, %v1842_v31 }
 0x524   : > { %7917 = vmatpush1.bf16.xpose.msra.mxu0 %v9445_v42  ;;  %v9798_v42 = vcombine.high %v1834_v26, %v1842_v31 }
 0x525   : > { %8245 = vmatpush1.bf16.xpose.msra.mxu1 %v9701_v43  ;;  %7918 = vmatprep.subr.bf16.mxu0 %v9462_v5  ;;  %v1594_v5 = vld [vmem:[%s10314_s19 + $0x1608] sm:$0xff] }
 0x526   : > { %8246 = vmatprep.subr.bf16.mxu1 %v9718_v44  ;;  %v1602_v44 = vld [vmem:[%s10314_s19 + $0x1648] sm:$0xff] }
 0x527   : > { %v9558_v27 = vcombine.high %v1594_v5, %v1602_v44  ;;  %v9557_v2 = vcombine.low %v1594_v5, %v1602_v44  ;;  %v1667_v5 = vld [vmem:[%s10314_s19 + $0x1850] sm:$0xff] }
 0x52c   : > { %7919 = vmatpush1.bf16.xpose.msra.mxu0 %v9461_v32 }
 0x52d   : > { %8247 = vmatpush1.bf16.xpose.msra.mxu1 %v9717_v60  ;;  %7920 = vmatprep.subr.bf16.mxu0 %v9478_v24  ;;  %v9541_v24 = vcombine.low %v1578_v22, %v1586_v51  ;;  %v1906_v22 = vld [vmem:[%s10314_s19 + $0x1fc8] sm:$0xff] }
 0x52e   : > { %8248 = vmatprep.subr.bf16.mxu1 %v9734_v61 }
 0x534   : > { %7921 = vmatpush1.bf16.xpose.msra.mxu0 %v9477_v52 }
 0x535   : > { %8249 = vmatpush1.bf16.xpose.msra.mxu1 %v9733_v53  ;;  %7922 = vmatprep.subr.bf16.mxu0 %v9494_v58  ;;  %v1610_v53 = vld [vmem:[%s10314_s19 + $0x1688] sm:$0xff] }
 0x536   : > { %8250 = vmatprep.subr.bf16.mxu1 %v9750_v59  ;;  %v1618_v58 = vld [vmem:[%s10314_s19 + $0x16c8] sm:$0xff] }
 0x537   : > { %v1866_v59 = vld [vmem:[%s10314_s19 + $0x1e88] sm:$0xff]  ;;  %v9574_v41 = vcombine.high %v1610_v53, %v1618_v58  ;;  %v9573_v8 = vcombine.low %v1610_v53, %v1618_v58  ;;  %v1435_v58 = vld [vmem:[%s10314_s19 + $0x1110] sm:$0xff] }
 0x538   : > { %v9829_v16 = vcombine.low %v1866_v59, %v1874_v1 }
 0x53c   : > { %7923 = vmatpush1.bf16.xpose.msra.mxu0 %v9493_v6  ;;  %v9830_v6 = vcombine.high %v1866_v59, %v1874_v1  ;;  %v1443_v59 = vld [vmem:[%s10314_s19 + $0x1150] sm:$0xff] }
 0x53d   : > { %8251 = vmatpush1.bf16.xpose.msra.mxu1 %v9749_v10  ;;  %7924 = vmatprep.subr.bf16.mxu0 %v9510_v13  ;;  %v1626_v10 = vld [vmem:[%s10314_s19 + $0x1708] sm:$0xff]  ;;  %v1691_v1 = vld [vmem:[%s10314_s19 + $0x1910] sm:$0xff] }
 0x53e   : > { %8252 = vmatprep.subr.bf16.mxu1 %v9766_v14  ;;  %v1634_v13 = vld [vmem:[%s10314_s19 + $0x1748] sm:$0xff] }
 0x53f   : > { %v1882_v14 = vld [vmem:[%s10314_s19 + $0x1f08] sm:$0xff]  ;;  %v9590_v17 = vcombine.high %v1626_v10, %v1634_v13  ;;  %v9589_v51 = vcombine.low %v1626_v10, %v1634_v13  ;;  %v1459_v10 = vld [vmem:[%s10314_s19 + $0x11d0] sm:$0xff] }
 0x540   : > { %v9845_v26 = vcombine.low %v1882_v14, %v1890_v15  ;;  %v1707_v13 = vld [vmem:[%s10314_s19 + $0x1990] sm:$0xff] }
 0x544   : > { %7925 = vmatpush1.bf16.xpose.msra.mxu0 %v9509_v3  ;;  %v9846_v3 = vcombine.high %v1882_v14, %v1890_v15  ;;  %v1715_v14 = vld [vmem:[%s10314_s19 + $0x19d0] sm:$0xff]  ;;  %v9399_v15 = vcombine.low %v1435_v58, %v1443_v59 }
 0x545   : > { %8253 = vmatpush1.bf16.xpose.msra.mxu1 %v9765_v30  ;;  %7926 = vmatprep.subr.bf16.mxu0 %v9526_v37  ;;  %v1642_v30 = vld [vmem:[%s10314_s19 + $0x1788] sm:$0xff] }
 0x546   : > { %8254 = vmatprep.subr.bf16.mxu1 %v9782_v49  ;;  %v1650_v37 = vld [vmem:[%s10314_s19 + $0x17c8] sm:$0xff] }
 0x547   : > { %v1898_v49 = vld [vmem:[%s10314_s19 + $0x1f88] sm:$0xff]  ;;  %v9606_v31 = vcombine.high %v1642_v30, %v1650_v37  ;;  %v9605_v44 = vcombine.low %v1642_v30, %v1650_v37  ;;  %v1475_v30 = vld [vmem:[%s10314_s19 + $0x1250] sm:$0xff] }
 0x548   : > { %v9861_v47 = vcombine.low %v1898_v49, %v1906_v22  ;;  %v1723_v37 = vld [vmem:[%s10314_s19 + $0x1a10] sm:$0xff] }
 0x54c   : > { %7927 = vmatpush1.bf16.xpose.msra.mxu0 %v9525_v35  ;;  %v9862_v35 = vcombine.high %v1898_v49, %v1906_v22  ;;  %v1731_v49 = vld [vmem:[%s10314_s19 + $0x1a50] sm:$0xff] }
 0x54d   : > { %8255 = vmatpush1.bf16.xpose.msra.mxu1 %v9781_v36  ;;  %7928 = vmatprep.subr.bf16.mxu0 %v9542_v40  ;;  %v1403_v36 = vld [vmem:[%s10314_s19 + $0x1010] sm:$0xff] }
 0x54e   : > { %v11220_v43 = vpop.f32.mrb[8].mxu0  ;;  %8256 = vmatprep.subr.bf16.mxu1 %v9798_v42  ;;  %v1411_v40 = vld [vmem:[%s10314_s19 + $0x1050] sm:$0xff] }
 0x54f   : > { %v11224_v45 = vpop.f32.mrb[24].mxu1  ;;  %v11226_v46 = vpop.f32.mrb[9].mxu0  ;;  %v1659_v42 = vld [vmem:[%s10314_s19 + $0x1810] sm:$0xff]  ;;  %v9368_v11 = vcombine.high %v1403_v36, %v1411_v40 }
 0x550   : > { %v11230_v32 = vpop.f32.mrb[25].mxu1  ;;  %v7534_v60 = vpop.f32.mrb[10].mxu0 }
 0x551   : > { %v7862_v61 = vpop.f32.mrb[26].mxu1  ;;  %v7535_v48 = vpop.f32.mrb[11].mxu0  ;;  %v9624_v60 = vcombine.high %v1659_v42, %v1667_v5 }
 0x552   : > { %v7863_v52 = vpop.f32.mrb[27].mxu1  ;;  %v1427_v61 = vld [vmem:[%s10314_s19 + $0x10d0] sm:$0xff]  ;;  %v9367_v48 = vcombine.low %v1403_v36, %v1411_v40 }
 0x553   : > { %v1491_v36 = vld [vmem:[%s10314_s19 + $0x12d0] sm:$0xff] }
 0x554   : > { %7929 = vmatpush1.bf16.xpose.msra.mxu0 %v9541_v24  ;;  %v1419_v24 = vld [vmem:[%s10314_s19 + $0x1090] sm:$0xff] }
 0x555   : > { %8257 = vmatpush1.bf16.xpose.msra.mxu1 %v9797_v9  ;;  %7930 = vmatprep.subr.bf16.mxu0 %v9558_v27  ;;  %v1675_v9 = vld [vmem:[%s10314_s19 + $0x1890] sm:$0xff]  ;;  %v9384_v52 = vcombine.high %v1419_v24, %v1427_v61 }
 0x556   : > { %8258 = vmatprep.subr.bf16.mxu1 %v9814_v62  ;;  %v1683_v27 = vld [vmem:[%s10314_s19 + $0x18d0] sm:$0xff]  ;;  %v9623_v62 = vcombine.low %v1659_v42, %v1667_v5 }
 0x557   : > { %v9640_v53 = vcombine.high %v1675_v9, %v1683_v27  ;;  %v1739_v40 = vld [vmem:[%s10314_s19 + $0x1a90] sm:$0xff] }
 0x558   : > { %v1747_v42 = vld [vmem:[%s10314_s19 + $0x1ad0] sm:$0xff] }
 0x55c   : > { %7931 = vmatpush1.bf16.xpose.msra.mxu0 %v9557_v2  ;;  %v1699_v2 = vld [vmem:[%s10314_s19 + $0x1950] sm:$0xff] }
 0x55d   : > { %8259 = vmatpush1.bf16.xpose.msra.mxu1 %v9813_v29  ;;  %7932 = vmatprep.subr.bf16.mxu0 %v9574_v41  ;;  %v9383_v29 = vcombine.low %v1419_v24, %v1427_v61  ;;  %v9639_v41 = vcombine.low %v1675_v9, %v1683_v27  ;;  %v1507_v24 = vld [vmem:[%s10314_s19 + $0x1350] sm:$0xff]  ;;  %v9703_v27 = vcombine.low %v1739_v40, %v1747_v42 }
 0x55e   : > { %8260 = vmatprep.subr.bf16.mxu1 %v9830_v6  ;;  %v9400_v6 = vcombine.high %v1435_v58, %v1443_v59  ;;  %v1755_v61 = vld [vmem:[%s10314_s19 + $0x1b10] sm:$0xff] }
 0x55f   : > { %v1523_v58 = vld [vmem:[%s10314_s19 + $0x13d0] sm:$0xff] }
 0x560   : > { %v1771_v59 = vld [vmem:[%s10314_s19 + $0x1b90] sm:$0xff] }
 0x564   : > { %7933 = vmatpush1.bf16.xpose.msra.mxu0 %v9573_v8  ;;  %v9655_v8 = vcombine.low %v1691_v1, %v1699_v2 }
 0x565   : > { %8261 = vmatpush1.bf16.xpose.msra.mxu1 %v9829_v16  ;;  %7934 = vmatprep.subr.bf16.mxu0 %v9590_v17  ;;  %v9672_v17 = vcombine.high %v1707_v13, %v1715_v14 }
 0x566   : > { %8262 = vmatprep.subr.bf16.mxu1 %v9846_v3  ;;  %v1467_v3 = vld [vmem:[%s10314_s19 + $0x1210] sm:$0xff] }
 0x567   : > { %v9431_v5 = vcombine.low %v1467_v3, %v1475_v30 }
 0x56c   : > { %7935 = vmatpush1.bf16.xpose.msra.mxu0 %v9589_v51  ;;  %v9671_v51 = vcombine.low %v1707_v13, %v1715_v14  ;;  %v1795_v13 = vld [vmem:[%s10314_s19 + $0x1c50] sm:$0xff] }
 0x56d   : > { %8263 = vmatpush1.bf16.xpose.msra.mxu1 %v9845_v26  ;;  %7936 = vmatprep.subr.bf16.mxu0 %v9606_v31  ;;  %v9432_v26 = vcombine.high %v1467_v3, %v1475_v30  ;;  %v9688_v31 = vcombine.high %v1723_v37, %v1731_v49  ;;  %v1555_v3 = vld [vmem:[%s10314_s19 + $0x14d0] sm:$0xff] }
 0x56e   : > { %8264 = vmatprep.subr.bf16.mxu1 %v9862_v35  ;;  %v1483_v35 = vld [vmem:[%s10314_s19 + $0x1290] sm:$0xff] }
 0x56f   : > { %v9447_v9 = vcombine.low %v1483_v35, %v1491_v36  ;;  %v1803_v30 = vld [vmem:[%s10314_s19 + $0x1c90] sm:$0xff] }
 0x574   : > { %7937 = vmatpush1.bf16.xpose.msra.mxu0 %v9605_v44  ;;  %v9687_v44 = vcombine.low %v1723_v37, %v1731_v49  ;;  %v1811_v37 = vld [vmem:[%s10314_s19 + $0x1cd0] sm:$0xff] }
 0x575   : > { %8265 = vmatpush1.bf16.xpose.msra.mxu1 %v9861_v47  ;;  %7947 = vmatprep.subr.bf16.mxu0 %v9368_v11  ;;  %v9448_v47 = vcombine.high %v1483_v35, %v1491_v36  ;;  %v9704_v11 = vcombine.high %v1739_v40, %v1747_v42  ;;  %v1571_v35 = vld [vmem:[%s10314_s19 + $0x1550] sm:$0xff] }
 0x576   : > { %8275 = vmatprep.subr.bf16.mxu1 %v9624_v60  ;;  %v1499_v60 = vld [vmem:[%s10314_s19 + $0x1310] sm:$0xff] }
 0x577   : > { %v1819_v36 = vld [vmem:[%s10314_s19 + $0x1d10] sm:$0xff] }
 0x578   : > { %v1827_v40 = vld [vmem:[%s10314_s19 + $0x1d50] sm:$0xff] }
 0x57b   : > { %7939 = vmatmul.mubr.bf16.vlgmr.msra.gmra.mrb[12].mxu0 %v10603_v28 }
 0x57c   : > { %8267 = vmatmul.mubr.bf16.vlgmr.msra.gmra.mrb[28].mxu1 %v10603_v28  ;;  %7948 = vmatpush1.bf16.xpose.msra.mxu0 %v9367_v48  ;;  %v9656_v28 = vcombine.high %v1691_v1, %v1699_v2  ;;  %v1763_v48 = vld [vmem:[%s10314_s19 + $0x1b50] sm:$0xff]  ;;  %v9463_v2 = vcombine.low %v1499_v60, %v1507_v24 }
 0x57d   : > { %7979 = vmatprep.mubr.bf16.mxu0 %v10605_v33  ;;  %8276 = vmatpush1.bf16.xpose.msra.mxu1 %v9623_v62  ;;  %v9464_v62 = vcombine.high %v1499_v60, %v1507_v24  ;;  %v1779_v1 = vld [vmem:[%s10314_s19 + $0x1bd0] sm:$0xff] }
 0x57e   : > { %8307 = vmatprep.mubr.bf16.mxu1 %v10605_v33  ;;  %7949 = vmatprep.subr.bf16.mxu0 %v9384_v52  ;;  %v1451_v33 = vld [vmem:[%s10314_s19 + $0x1190] sm:$0xff]  ;;  %v9720_v52 = vcombine.high %v1755_v61, %v1763_v48 }
 0x57f   : > { %8277 = vmatprep.subr.bf16.mxu1 %v9640_v53  ;;  %v9416_v16 = vcombine.high %v1451_v33, %v1459_v10  ;;  %v9415_v22 = vcombine.low %v1451_v33, %v1459_v10  ;;  %v1515_v53 = vld [vmem:[%s10314_s19 + $0x1390] sm:$0xff] }
 0x580   : > { %v1539_v33 = vld [vmem:[%s10314_s19 + $0x1450] sm:$0xff]  ;;  %v9479_v14 = vcombine.low %v1515_v53, %v1523_v58 }
 0x581   : > { %v1787_v10 = vld [vmem:[%s10314_s19 + $0x1c10] sm:$0xff] }
 0x582   : > { %v1587_v60 = vld [vmem:[%s10314_s19 + $0x15d0] sm:$0xff] }
 0x583   : > { %v1835_v24 = vld [vmem:[%s10314_s19 + $0x1d90] sm:$0xff] }
 0x584   : > { %7950 = vmatpush1.bf16.xpose.msra.mxu0 %v9383_v29  ;;  %v9719_v29 = vcombine.low %v1755_v61, %v1763_v48  ;;  %v1843_v61 = vld [vmem:[%s10314_s19 + $0x1dd0] sm:$0xff] }
 0x585   : > { %8278 = vmatpush1.bf16.xpose.msra.mxu1 %v9639_v41  ;;  %7951 = vmatprep.subr.bf16.mxu0 %v9400_v6  ;;  %v9480_v41 = vcombine.high %v1515_v53, %v1523_v58  ;;  %v9736_v6 = vcombine.high %v1771_v59, %v1779_v1  ;;  %v1603_v53 = vld [vmem:[%s10314_s19 + $0x1650] sm:$0xff] }
 0x586   : > { %8279 = vmatprep.subr.bf16.mxu1 %v9656_v28  ;;  %v1531_v28 = vld [vmem:[%s10314_s19 + $0x1410] sm:$0xff] }
 0x587   : > { %v9495_v49 = vcombine.low %v1531_v28, %v1539_v33  ;;  %v1851_v58 = vld [vmem:[%s10314_s19 + $0x1e10] sm:$0xff] }
 0x58c   : > { %7952 = vmatpush1.bf16.xpose.msra.mxu0 %v9399_v15  ;;  %v9735_v15 = vcombine.low %v1771_v59, %v1779_v1  ;;  %v1859_v59 = vld [vmem:[%s10314_s19 + $0x1e50] sm:$0xff] }
 0x58d   : > { %8280 = vmatpush1.bf16.xpose.msra.mxu1 %v9655_v8  ;;  %7953 = vmatprep.subr.bf16.mxu0 %v9416_v16  ;;  %v9496_v8 = vcombine.high %v1531_v28, %v1539_v33  ;;  %v9752_v16 = vcombine.high %v1787_v10, %v1795_v13  ;;  %v1619_v28 = vld [vmem:[%s10314_s19 + $0x16d0] sm:$0xff] }
 0x58e   : > { %8281 = vmatprep.subr.bf16.mxu1 %v9672_v17  ;;  %v1547_v17 = vld [vmem:[%s10314_s19 + $0x1490] sm:$0xff] }
 0x58f   : > { %v9511_v42 = vcombine.low %v1547_v17, %v1555_v3  ;;  %v1867_v33 = vld [vmem:[%s10314_s19 + $0x1e90] sm:$0xff] }
 0x594   : > { %7954 = vmatpush1.bf16.xpose.msra.mxu0 %v9415_v22  ;;  %v9751_v22 = vcombine.low %v1787_v10, %v1795_v13  ;;  %v1875_v10 = vld [vmem:[%s10314_s19 + $0x1ed0] sm:$0xff] }
 0x595   : > { %8282 = vmatpush1.bf16.xpose.msra.mxu1 %v9671_v51  ;;  %7955 = vmatprep.subr.bf16.mxu0 %v9432_v26  ;;  %v9512_v51 = vcombine.high %v1547_v17, %v1555_v3  ;;  %v9768_v26 = vcombine.high %v1803_v30, %v1811_v37  ;;  %v1635_v17 = vld [vmem:[%s10314_s19 + $0x1750] sm:$0xff] }
 0x596   : > { %8283 = vmatprep.subr.bf16.mxu1 %v9688_v31  ;;  %v1563_v31 = vld [vmem:[%s10314_s19 + $0x1510] sm:$0xff] }
 0x597   : > { %v9527_v48 = vcombine.low %v1563_v31, %v1571_v35  ;;  %v1883_v3 = vld [vmem:[%s10314_s19 + $0x1f10] sm:$0xff] }
 0x59c   : > { %7956 = vmatpush1.bf16.xpose.msra.mxu0 %v9431_v5  ;;  %v9767_v5 = vcombine.low %v1803_v30, %v1811_v37  ;;  %v1891_v30 = vld [vmem:[%s10314_s19 + $0x1f50] sm:$0xff] }
 0x59d   : > { %8284 = vmatpush1.bf16.xpose.msra.mxu1 %v9687_v44  ;;  %7957 = vmatprep.subr.bf16.mxu0 %v9448_v47  ;;  %v9528_v44 = vcombine.high %v1563_v31, %v1571_v35  ;;  %v9784_v47 = vcombine.high %v1819_v36, %v1827_v40  ;;  %v1651_v31 = vld [vmem:[%s10314_s19 + $0x17d0] sm:$0xff] }
 0x59e   : > { %8285 = vmatprep.subr.bf16.mxu1 %v9704_v11  ;;  %v1579_v11 = vld [vmem:[%s10314_s19 + $0x1590] sm:$0xff] }
 0x59f   : > { %v9543_v1 = vcombine.low %v1579_v11, %v1587_v60  ;;  %v1899_v35 = vld [vmem:[%s10314_s19 + $0x1f90] sm:$0xff] }
 0x5a4   : > { %7958 = vmatpush1.bf16.xpose.msra.mxu0 %v9447_v9  ;;  %v9783_v9 = vcombine.low %v1819_v36, %v1827_v40  ;;  %v1907_v36 = vld [vmem:[%s10314_s19 + $0x1fd0] sm:$0xff] }
 0x5a5   : > { %8286 = vmatpush1.bf16.xpose.msra.mxu1 %v9703_v27  ;;  %7959 = vmatprep.subr.bf16.mxu0 %v9464_v62  ;;  %v9544_v27 = vcombine.high %v1579_v11, %v1587_v60  ;;  %v9800_v62 = vcombine.high %v1835_v24, %v1843_v61  ;;  %v1412_v11 = vld [vmem:[%s10314_s19 + $0x1058] sm:$0xff] }
 0x5a6   : > { %8287 = vmatprep.subr.bf16.mxu1 %v9720_v52  ;;  %v1595_v52 = vld [vmem:[%s10314_s19 + $0x1610] sm:$0xff]  ;;  %v1660_v60 = vld [vmem:[%s10314_s19 + $0x1818] sm:$0xff] }
 0x5a7   : > { %v9559_v13 = vcombine.low %v1595_v52, %v1603_v53 }
 0x5ac   : > { %7960 = vmatpush1.bf16.xpose.msra.mxu0 %v9463_v2  ;;  %v9799_v2 = vcombine.low %v1835_v24, %v1843_v61  ;;  %v1668_v24 = vld [vmem:[%s10314_s19 + $0x1858] sm:$0xff] }
 0x5ad   : > { %8288 = vmatpush1.bf16.xpose.msra.mxu1 %v9719_v29  ;;  %7961 = vmatprep.subr.bf16.mxu0 %v9480_v41  ;;  %v9560_v29 = vcombine.high %v1595_v52, %v1603_v53  ;;  %v9816_v41 = vcombine.high %v1851_v58, %v1859_v59  ;;  %v1428_v52 = vld [vmem:[%s10314_s19 + $0x10d8] sm:$0xff] }
 0x5ae   : > { %8289 = vmatprep.subr.bf16.mxu1 %v9736_v6  ;;  %v1611_v6 = vld [vmem:[%s10314_s19 + $0x1690] sm:$0xff] }
 0x5af   : > { %v9575_v37 = vcombine.low %v1611_v6, %v1619_v28 }
 0x5b4   : > { %7962 = vmatpush1.bf16.xpose.msra.mxu0 %v9479_v14  ;;  %v9815_v14 = vcombine.low %v1851_v58, %v1859_v59  ;;  %v1676_v58 = vld [vmem:[%s10314_s19 + $0x1898] sm:$0xff] }
 0x5b5   : > { %8290 = vmatpush1.bf16.xpose.msra.mxu1 %v9735_v15  ;;  %7963 = vmatprep.subr.bf16.mxu0 %v9496_v8  ;;  %v9576_v15 = vcombine.high %v1611_v6, %v1619_v28  ;;  %v9832_v8 = vcombine.high %v1867_v33, %v1875_v10  ;;  %v1684_v59 = vld [vmem:[%s10314_s19 + $0x18d8] sm:$0xff] }
 0x5b6   : > { %8291 = vmatprep.subr.bf16.mxu1 %v9752_v16  ;;  %v1627_v16 = vld [vmem:[%s10314_s19 + $0x1710] sm:$0xff]  ;;  %v1444_v6 = vld [vmem:[%s10314_s19 + $0x1158] sm:$0xff] }
 0x5b7   : > { %v9591_v40 = vcombine.low %v1627_v16, %v1635_v17  ;;  %v1692_v28 = vld [vmem:[%s10314_s19 + $0x1918] sm:$0xff] }
 0x5bc   : > { %7964 = vmatpush1.bf16.xpose.msra.mxu0 %v9495_v49  ;;  %v9831_v49 = vcombine.low %v1867_v33, %v1875_v10  ;;  %v1700_v33 = vld [vmem:[%s10314_s19 + $0x1958] sm:$0xff] }
 0x5bd   : > { %8292 = vmatpush1.bf16.xpose.msra.mxu1 %v9751_v22  ;;  %7965 = vmatprep.subr.bf16.mxu0 %v9512_v51  ;;  %v9592_v22 = vcombine.high %v1627_v16, %v1635_v17  ;;  %v9848_v51 = vcombine.high %v1883_v3, %v1891_v30  ;;  %v1716_v16 = vld [vmem:[%s10314_s19 + $0x19d8] sm:$0xff] }
 0x5be   : > { %8293 = vmatprep.subr.bf16.mxu1 %v9768_v26  ;;  %v1643_v26 = vld [vmem:[%s10314_s19 + $0x1790] sm:$0xff] }
 0x5bf   : > { %v9607_v61 = vcombine.low %v1643_v26, %v1651_v31 }
 0x5c4   : > { %7966 = vmatpush1.bf16.xpose.msra.mxu0 %v9511_v42  ;;  %v9847_v42 = vcombine.low %v1883_v3, %v1891_v30  ;;  %v9657_v3 = vcombine.low %v1692_v28, %v1700_v33 }
 0x5c5   : > { %8294 = vmatpush1.bf16.xpose.msra.mxu1 %v9767_v5  ;;  %7967 = vmatprep.subr.bf16.mxu0 %v9528_v44  ;;  %v9608_v5 = vcombine.high %v1643_v26, %v1651_v31  ;;  %v9864_v44 = vcombine.high %v1899_v35, %v1907_v36  ;;  %v1732_v26 = vld [vmem:[%s10314_s19 + $0x1a58] sm:$0xff] }
 0x5c6   : > { %8295 = vmatprep.subr.bf16.mxu1 %v9784_v47  ;;  %v1404_v47 = vld [vmem:[%s10314_s19 + $0x1018] sm:$0xff] }
 0x5c7   : > { %v9369_v53 = vcombine.low %v1404_v47, %v1412_v11 }
 0x5cc   : > { %7968 = vmatpush1.bf16.xpose.msra.mxu0 %v9527_v48  ;;  %v9863_v48 = vcombine.low %v1899_v35, %v1907_v36 }
 0x5cd   : > { %8296 = vmatpush1.bf16.xpose.msra.mxu1 %v9783_v9  ;;  %7969 = vmatprep.subr.bf16.mxu0 %v9544_v27  ;;  %v9370_v9 = vcombine.high %v1404_v47, %v1412_v11  ;;  %v9626_v27 = vcombine.high %v1660_v60, %v1668_v24  ;;  %v1748_v47 = vld [vmem:[%s10314_s19 + $0x1ad8] sm:$0xff] }
 0x5ce   : > { %8297 = vmatprep.subr.bf16.mxu1 %v9800_v62  ;;  %v1420_v62 = vld [vmem:[%s10314_s19 + $0x1098] sm:$0xff] }
 0x5cf   : > { %v9385_v10 = vcombine.low %v1420_v62, %v1428_v52 }
 0x5d4   : > { %7970 = vmatpush1.bf16.xpose.msra.mxu0 %v9543_v1  ;;  %v9625_v1 = vcombine.low %v1660_v60, %v1668_v24 }
 0x5d5   : > { %8298 = vmatpush1.bf16.xpose.msra.mxu1 %v9799_v2  ;;  %7971 = vmatprep.subr.bf16.mxu0 %v9560_v29  ;;  %v9386_v2 = vcombine.high %v1420_v62, %v1428_v52  ;;  %v9642_v29 = vcombine.high %v1676_v58, %v1684_v59  ;;  %v1764_v62 = vld [vmem:[%s10314_s19 + $0x1b58] sm:$0xff] }
 0x5d6   : > { %8299 = vmatprep.subr.bf16.mxu1 %v9816_v41  ;;  %v1436_v41 = vld [vmem:[%s10314_s19 + $0x1118] sm:$0xff] }
 0x5d7   : > { %v9401_v17 = vcombine.low %v1436_v41, %v1444_v6 }
 0x5dc   : > { %7972 = vmatpush1.bf16.xpose.msra.mxu0 %v9559_v13  ;;  %v9641_v13 = vcombine.low %v1676_v58, %v1684_v59 }
 0x5dd   : > { %8300 = vmatpush1.bf16.xpose.msra.mxu1 %v9815_v14  ;;  %7973 = vmatprep.subr.bf16.mxu0 %v9576_v15  ;;  %v9402_v14 = vcombine.high %v1436_v41, %v1444_v6  ;;  %v1460_v15 = vld [vmem:[%s10314_s19 + $0x11d8] sm:$0xff] }
 0x5de   : > { %8301 = vmatprep.subr.bf16.mxu1 %v9832_v8  ;;  %v1708_v8 = vld [vmem:[%s10314_s19 + $0x1998] sm:$0xff] }
 0x5df   : > { %v9673_v35 = vcombine.low %v1708_v8, %v1716_v16  ;;  %v1780_v41 = vld [vmem:[%s10314_s19 + $0x1bd8] sm:$0xff] }
 0x5e4   : > { %7974 = vmatpush1.bf16.xpose.msra.mxu0 %v9575_v37  ;;  %v9674_v37 = vcombine.high %v1708_v8, %v1716_v16 }
 0x5e5   : > { %8302 = vmatpush1.bf16.xpose.msra.mxu1 %v9831_v49  ;;  %7975 = vmatprep.subr.bf16.mxu0 %v9592_v22  ;;  %v1468_v49 = vld [vmem:[%s10314_s19 + $0x1218] sm:$0xff] }
 0x5e6   : > { %8303 = vmatprep.subr.bf16.mxu1 %v9848_v51  ;;  %v1476_v22 = vld [vmem:[%s10314_s19 + $0x1258] sm:$0xff] }
 0x5e7   : > { %v1724_v51 = vld [vmem:[%s10314_s19 + $0x1a18] sm:$0xff]  ;;  %v9434_v36 = vcombine.high %v1468_v49, %v1476_v22  ;;  %v9433_v11 = vcombine.low %v1468_v49, %v1476_v22 }
 0x5e8   : > { %v9689_v60 = vcombine.low %v1724_v51, %v1732_v26  ;;  %v1812_v49 = vld [vmem:[%s10314_s19 + $0x1cd8] sm:$0xff] }
 0x5ec   : > { %7976 = vmatpush1.bf16.xpose.msra.mxu0 %v9591_v40  ;;  %v9690_v40 = vcombine.high %v1724_v51, %v1732_v26 }
 0x5ed   : > { %8304 = vmatpush1.bf16.xpose.msra.mxu1 %v9847_v42  ;;  %7977 = vmatprep.subr.bf16.mxu0 %v9608_v5  ;;  %v1484_v42 = vld [vmem:[%s10314_s19 + $0x1298] sm:$0xff] }
 0x5ee   : > { %8305 = vmatprep.subr.bf16.mxu1 %v9864_v44  ;;  %v1492_v5 = vld [vmem:[%s10314_s19 + $0x12d8] sm:$0xff] }
 0x5ef   : > { %v1740_v44 = vld [vmem:[%s10314_s19 + $0x1a98] sm:$0xff]  ;;  %v9450_v24 = vcombine.high %v1484_v42, %v1492_v5  ;;  %v9449_v52 = vcombine.low %v1484_v42, %v1492_v5 }
 0x5f0   : > { %v1828_v42 = vld [vmem:[%s10314_s19 + $0x1d58] sm:$0xff] }
 0x5f4   : > { %7978 = vmatpush1.bf16.xpose.msra.mxu0 %v9607_v61  ;;  %v9706_v61 = vcombine.high %v1740_v44, %v1748_v47 }
 0x5f5   : > { %8306 = vmatpush1.bf16.xpose.msra.mxu1 %v9863_v48  ;;  %7988 = vmatprep.subr.bf16.mxu0 %v9370_v9  ;;  %v1500_v48 = vld [vmem:[%s10314_s19 + $0x1318] sm:$0xff] }
 0x5f6   : > { %8316 = vmatprep.subr.bf16.mxu1 %v9626_v27  ;;  %v1508_v9 = vld [vmem:[%s10314_s19 + $0x1358] sm:$0xff] }
 0x5f7   : > { %v1756_v27 = vld [vmem:[%s10314_s19 + $0x1b18] sm:$0xff]  ;;  %v9466_v58 = vcombine.high %v1500_v48, %v1508_v9  ;;  %v9465_v6 = vcombine.low %v1500_v48, %v1508_v9 }
 0x5f8   : > { %v9722_v59 = vcombine.high %v1756_v27, %v1764_v62  ;;  %v1844_v48 = vld [vmem:[%s10314_s19 + $0x1dd8] sm:$0xff] }
 0x5fb   : > { %7980 = vmatmul.mubr.bf16.vlgmr.msra.gmra.mrb[12].mxu0 %v10681_v57 }
 0x5fc   : > { %8308 = vmatmul.mubr.bf16.vlgmr.msra.gmra.mrb[28].mxu1 %v10681_v57  ;;  %7989 = vmatpush1.bf16.xpose.msra.mxu0 %v9369_v53  ;;  %v9658_v57 = vcombine.high %v1692_v28, %v1700_v33  ;;  %v9705_v53 = vcombine.low %v1740_v44, %v1748_v47  ;;  %v9721_v28 = vcombine.low %v1756_v27, %v1764_v62 }
 0x5fd   : > { %8020 = vmatprep.mubr.bf16.mxu0 %v10683_v63  ;;  %8317 = vmatpush1.bf16.xpose.msra.mxu1 %v9625_v1  ;;  %v1516_v1 = vld [vmem:[%s10314_s19 + $0x1398] sm:$0xff] }
 0x5fe   : > { %8348 = vmatprep.mubr.bf16.mxu1 %v10683_v63  ;;  %7990 = vmatprep.subr.bf16.mxu0 %v9386_v2  ;;  %v1452_v63 = vld [vmem:[%s10314_s19 + $0x1198] sm:$0xff] }
 0x5ff   : > { %8318 = vmatprep.subr.bf16.mxu1 %v9642_v29  ;;  %v9418_v30 = vcombine.high %v1452_v63, %v1460_v15  ;;  %v9417_v31 = vcombine.low %v1452_v63, %v1460_v15  ;;  %v1524_v2 = vld [vmem:[%s10314_s19 + $0x13d8] sm:$0xff] }
 0x600   : > { %v1772_v29 = vld [vmem:[%s10314_s19 + $0x1b98] sm:$0xff]  ;;  %v9482_v33 = vcombine.high %v1516_v1, %v1524_v2  ;;  %v9481_v15 = vcombine.low %v1516_v1, %v1524_v2 }
 0x601   : > { %v1796_v63 = vld [vmem:[%s10314_s19 + $0x1c58] sm:$0xff]  ;;  %v9737_v8 = vcombine.low %v1772_v29, %v1780_v41 }
 0x602   : > { %v1860_v1 = vld [vmem:[%s10314_s19 + $0x1e58] sm:$0xff] }
 0x604   : > { %7991 = vmatpush1.bf16.xpose.msra.mxu0 %v9385_v10  ;;  %v9738_v10 = vcombine.high %v1772_v29, %v1780_v41 }
 0x605   : > { %8319 = vmatpush1.bf16.xpose.msra.mxu1 %v9641_v13  ;;  %7992 = vmatprep.subr.bf16.mxu0 %v9402_v14  ;;  %v1532_v13 = vld [vmem:[%s10314_s19 + $0x1418] sm:$0xff] }
 0x606   : > { %8320 = vmatprep.subr.bf16.mxu1 %v9658_v57  ;;  %v1540_v14 = vld [vmem:[%s10314_s19 + $0x1458] sm:$0xff] }
 0x607   : > { %v1788_v57 = vld [vmem:[%s10314_s19 + $0x1c18] sm:$0xff]  ;;  %v9498_v16 = vcombine.high %v1532_v13, %v1540_v14  ;;  %v9497_v22 = vcombine.low %v1532_v13, %v1540_v14 }
 0x608   : > { %v9753_v51 = vcombine.low %v1788_v57, %v1796_v63  ;;  %v1876_v13 = vld [vmem:[%s10314_s19 + $0x1ed8] sm:$0xff] }
 0x60c   : > { %7993 = vmatpush1.bf16.xpose.msra.mxu0 %v9401_v17  ;;  %v9754_v17 = vcombine.high %v1788_v57, %v1796_v63 }
 0x60d   : > { %8321 = vmatpush1.bf16.xpose.msra.mxu1 %v9657_v3  ;;  %7994 = vmatprep.subr.bf16.mxu0 %v9418_v30  ;;  %v1548_v3 = vld [vmem:[%s10314_s19 + $0x1498] sm:$0xff] }
 0x60e   : > { %8322 = vmatprep.subr.bf16.mxu1 %v9674_v37  ;;  %v1556_v30 = vld [vmem:[%s10314_s19 + $0x14d8] sm:$0xff] }
 0x60f   : > { %v1804_v37 = vld [vmem:[%s10314_s19 + $0x1c98] sm:$0xff]  ;;  %v9514_v26 = vcombine.high %v1548_v3, %v1556_v30  ;;  %v9513_v5 = vcombine.low %v1548_v3, %v1556_v30 }
 0x610   : > { %v9769_v44 = vcombine.low %v1804_v37, %v1812_v49  ;;  %v1892_v3 = vld [vmem:[%s10314_s19 + $0x1f58] sm:$0xff] }
 0x614   : > { %7995 = vmatpush1.bf16.xpose.msra.mxu0 %v9417_v31  ;;  %v9770_v31 = vcombine.high %v1804_v37, %v1812_v49 }
 0x615   : > { %8323 = vmatpush1.bf16.xpose.msra.mxu1 %v9673_v35  ;;  %7996 = vmatprep.subr.bf16.mxu0 %v9434_v36  ;;  %v1564_v35 = vld [vmem:[%s10314_s19 + $0x1518] sm:$0xff] }
 0x616   : > { %8324 = vmatprep.subr.bf16.mxu1 %v9690_v40  ;;  %v1572_v36 = vld [vmem:[%s10314_s19 + $0x1558] sm:$0xff] }
 0x617   : > { %v1820_v40 = vld [vmem:[%s10314_s19 + $0x1d18] sm:$0xff]  ;;  %v9530_v47 = vcombine.high %v1564_v35, %v1572_v36  ;;  %v9529_v9 = vcombine.low %v1564_v35, %v1572_v36 }
 0x618   : > { %v9785_v27 = vcombine.low %v1820_v40, %v1828_v42  ;;  %v1908_v35 = vld [vmem:[%s10314_s19 + $0x1fd8] sm:$0xff] }
 0x61c   : > { %7997 = vmatpush1.bf16.xpose.msra.mxu0 %v9433_v11  ;;  %v9786_v11 = vcombine.high %v1820_v40, %v1828_v42 }
 0x61d   : > { %8325 = vmatpush1.bf16.xpose.msra.mxu1 %v9689_v60  ;;  %7998 = vmatprep.subr.bf16.mxu0 %v9450_v24  ;;  %v1580_v60 = vld [vmem:[%s10314_s19 + $0x1598] sm:$0xff] }
 0x61e   : > { %8326 = vmatprep.subr.bf16.mxu1 %v9706_v61  ;;  %v1588_v24 = vld [vmem:[%s10314_s19 + $0x15d8] sm:$0xff] }
 0x61f   : > { %v1836_v61 = vld [vmem:[%s10314_s19 + $0x1d98] sm:$0xff]  ;;  %v9546_v62 = vcombine.high %v1580_v60, %v1588_v24  ;;  %v9545_v2 = vcombine.low %v1580_v60, %v1588_v24  ;;  %v1669_v60 = vld [vmem:[%s10314_s19 + $0x1860] sm:$0xff] }
 0x620   : > { %v9801_v29 = vcombine.low %v1836_v61, %v1844_v48 }
 0x624   : > { %7999 = vmatpush1.bf16.xpose.msra.mxu0 %v9449_v52  ;;  %v9802_v52 = vcombine.high %v1836_v61, %v1844_v48 }
 0x625   : > { %8327 = vmatpush1.bf16.xpose.msra.mxu1 %v9705_v53  ;;  %8000 = vmatprep.subr.bf16.mxu0 %v9466_v58  ;;  %v1596_v53 = vld [vmem:[%s10314_s19 + $0x1618] sm:$0xff] }
 0x626   : > { %8328 = vmatprep.subr.bf16.mxu1 %v9722_v59  ;;  %v1604_v58 = vld [vmem:[%s10314_s19 + $0x1658] sm:$0xff] }
 0x627   : > { %v1852_v59 = vld [vmem:[%s10314_s19 + $0x1e18] sm:$0xff]  ;;  %v9562_v41 = vcombine.high %v1596_v53, %v1604_v58  ;;  %v9561_v14 = vcombine.low %v1596_v53, %v1604_v58  ;;  %v1677_v53 = vld [vmem:[%s10314_s19 + $0x18a0] sm:$0xff] }
 0x628   : > { %v9817_v57 = vcombine.low %v1852_v59, %v1860_v1  ;;  %v1685_v58 = vld [vmem:[%s10314_s19 + $0x18e0] sm:$0xff] }
 0x62c   : > { %8001 = vmatpush1.bf16.xpose.msra.mxu0 %v9465_v6  ;;  %v9818_v6 = vcombine.high %v1852_v59, %v1860_v1 }
 0x62d   : > { %8329 = vmatpush1.bf16.xpose.msra.mxu1 %v9721_v28  ;;  %8002 = vmatprep.subr.bf16.mxu0 %v9482_v33  ;;  %v1612_v28 = vld [vmem:[%s10314_s19 + $0x1698] sm:$0xff] }
 0x62e   : > { %8330 = vmatprep.subr.bf16.mxu1 %v9738_v10  ;;  %v1620_v33 = vld [vmem:[%s10314_s19 + $0x16d8] sm:$0xff] }
 0x62f   : > { %v1868_v10 = vld [vmem:[%s10314_s19 + $0x1e98] sm:$0xff]  ;;  %v9578_v63 = vcombine.high %v1612_v28, %v1620_v33  ;;  %v9577_v30 = vcombine.low %v1612_v28, %v1620_v33  ;;  %v1701_v28 = vld [vmem:[%s10314_s19 + $0x1960] sm:$0xff] }
 0x630   : > { %v9833_v37 = vcombine.low %v1868_v10, %v1876_v13 }
 0x634   : > { %8003 = vmatpush1.bf16.xpose.msra.mxu0 %v9481_v15  ;;  %v9834_v15 = vcombine.high %v1868_v10, %v1876_v13  ;;  %v9643_v10 = vcombine.low %v1677_v53, %v1685_v58 }
 0x635   : > { %8331 = vmatpush1.bf16.xpose.msra.mxu1 %v9737_v8  ;;  %8004 = vmatprep.subr.bf16.mxu0 %v9498_v16  ;;  %v1628_v8 = vld [vmem:[%s10314_s19 + $0x1718] sm:$0xff] }
 0x636   : > { %8332 = vmatprep.subr.bf16.mxu1 %v9754_v17  ;;  %v1636_v16 = vld [vmem:[%s10314_s19 + $0x1758] sm:$0xff] }
 0x637   : > { %v1884_v17 = vld [vmem:[%s10314_s19 + $0x1f18] sm:$0xff]  ;;  %v9594_v49 = vcombine.high %v1628_v8, %v1636_v16  ;;  %v9593_v36 = vcombine.low %v1628_v8, %v1636_v16 }
 0x638   : > { %v9849_v40 = vcombine.low %v1884_v17, %v1892_v3 }
 0x63c   : > { %8005 = vmatpush1.bf16.xpose.msra.mxu0 %v9497_v22  ;;  %v9850_v22 = vcombine.high %v1884_v17, %v1892_v3  ;;  %v1469_v3 = vld [vmem:[%s10314_s19 + $0x1220] sm:$0xff] }
 0x63d   : > { %8333 = vmatpush1.bf16.xpose.msra.mxu1 %v9753_v51  ;;  %8006 = vmatprep.subr.bf16.mxu0 %v9514_v26  ;;  %v1644_v51 = vld [vmem:[%s10314_s19 + $0x1798] sm:$0xff] }
 0x63e   : > { %8334 = vmatprep.subr.bf16.mxu1 %v9770_v31  ;;  %v1652_v26 = vld [vmem:[%s10314_s19 + $0x17d8] sm:$0xff] }
 0x63f   : > { %v1900_v31 = vld [vmem:[%s10314_s19 + $0x1f98] sm:$0xff]  ;;  %v9610_v42 = vcombine.high %v1644_v51, %v1652_v26  ;;  %v9609_v24 = vcombine.low %v1644_v51, %v1652_v26 }
 0x640   : > { %v9865_v61 = vcombine.low %v1900_v31, %v1908_v35 }
 0x644   : > { %8007 = vmatpush1.bf16.xpose.msra.mxu0 %v9513_v5  ;;  %v9866_v5 = vcombine.high %v1900_v31, %v1908_v35  ;;  %v1485_v35 = vld [vmem:[%s10314_s19 + $0x12a0] sm:$0xff] }
 0x645   : > { %8335 = vmatpush1.bf16.xpose.msra.mxu1 %v9769_v44  ;;  %8008 = vmatprep.subr.bf16.mxu0 %v9530_v47  ;;  %v1405_v44 = vld [vmem:[%s10314_s19 + $0x1020] sm:$0xff] }
 0x646   : > { %8336 = vmatprep.subr.bf16.mxu1 %v9786_v11  ;;  %v1413_v47 = vld [vmem:[%s10314_s19 + $0x1060] sm:$0xff] }
 0x647   : > { %v1661_v11 = vld [vmem:[%s10314_s19 + $0x1820] sm:$0xff]  ;;  %v9372_v48 = vcombine.high %v1405_v44, %v1413_v47 }
 0x648   : > { %v9627_v59 = vcombine.low %v1661_v11, %v1669_v60 }
 0x64c   : > { %8009 = vmatpush1.bf16.xpose.msra.mxu0 %v9529_v9  ;;  %v9628_v9 = vcombine.high %v1661_v11, %v1669_v60  ;;  %v1501_v60 = vld [vmem:[%s10314_s19 + $0x1320] sm:$0xff] }
 0x64d   : > { %8337 = vmatpush1.bf16.xpose.msra.mxu1 %v9785_v27  ;;  %8010 = vmatprep.subr.bf16.mxu0 %v9546_v62  ;;  %v1421_v27 = vld [vmem:[%s10314_s19 + $0x10a0] sm:$0xff] }
 0x64e   : > { %8338 = vmatprep.subr.bf16.mxu1 %v9802_v52  ;;  %v1429_v62 = vld [vmem:[%s10314_s19 + $0x10e0] sm:$0xff]  ;;  %v9371_v52 = vcombine.low %v1405_v44, %v1413_v47 }
 0x64f   : > { %v9388_v1 = vcombine.high %v1421_v27, %v1429_v62  ;;  %v9387_v33 = vcombine.low %v1421_v27, %v1429_v62 }
 0x654   : > { %8011 = vmatpush1.bf16.xpose.msra.mxu0 %v9545_v2  ;;  %v9644_v2 = vcombine.high %v1677_v53, %v1685_v58  ;;  %v1517_v53 = vld [vmem:[%s10314_s19 + $0x13a0] sm:$0xff] }
 0x655   : > { %8339 = vmatpush1.bf16.xpose.msra.mxu1 %v9801_v29  ;;  %8012 = vmatprep.subr.bf16.mxu0 %v9562_v41  ;;  %v1437_v29 = vld [vmem:[%s10314_s19 + $0x1120] sm:$0xff] }
 0x656   : > { %8340 = vmatprep.subr.bf16.mxu1 %v9818_v6  ;;  %v1445_v41 = vld [vmem:[%s10314_s19 + $0x1160] sm:$0xff] }
 0x657   : > { %v1693_v6 = vld [vmem:[%s10314_s19 + $0x1920] sm:$0xff]  ;;  %v9404_v13 = vcombine.high %v1437_v29, %v1445_v41 }
 0x658   : > { %v9659_v8 = vcombine.low %v1693_v6, %v1701_v28  ;;  %v1525_v58 = vld [vmem:[%s10314_s19 + $0x13e0] sm:$0xff] }
 0x65c   : > { %8013 = vmatpush1.bf16.xpose.msra.mxu0 %v9561_v14  ;;  %v1461_v14 = vld [vmem:[%s10314_s19 + $0x11e0] sm:$0xff] }
 0x65d   : > { %8341 = vmatpush1.bf16.xpose.msra.mxu1 %v9817_v57  ;;  %8014 = vmatprep.subr.bf16.mxu0 %v9578_v63  ;;  %v1709_v57 = vld [vmem:[%s10314_s19 + $0x19a0] sm:$0xff] }
 0x65e   : > { %8342 = vmatprep.subr.bf16.mxu1 %v9834_v15  ;;  %v1717_v63 = vld [vmem:[%s10314_s19 + $0x19e0] sm:$0xff]  ;;  %v9403_v15 = vcombine.low %v1437_v29, %v1445_v41  ;;  %v9484_v41 = vcombine.high %v1517_v53, %v1525_v58 }
 0x65f   : > { %v9676_v17 = vcombine.high %v1709_v57, %v1717_v63  ;;  %v9675_v51 = vcombine.low %v1709_v57, %v1717_v63  ;;  %v1549_v63 = vld [vmem:[%s10314_s19 + $0x14a0] sm:$0xff] }
 0x664   : > { %8015 = vmatpush1.bf16.xpose.msra.mxu0 %v9577_v30  ;;  %v1477_v30 = vld [vmem:[%s10314_s19 + $0x1260] sm:$0xff] }
 0x665   : > { %8343 = vmatpush1.bf16.xpose.msra.mxu1 %v9833_v37  ;;  %8016 = vmatprep.subr.bf16.mxu0 %v9594_v49  ;;  %v1725_v37 = vld [vmem:[%s10314_s19 + $0x1a20] sm:$0xff]  ;;  %v9436_v26 = vcombine.high %v1469_v3, %v1477_v30 }
 0x666   : > { %8344 = vmatprep.subr.bf16.mxu1 %v9850_v22  ;;  %v1733_v49 = vld [vmem:[%s10314_s19 + $0x1a60] sm:$0xff] }
 0x667   : > { %v9692_v31 = vcombine.high %v1725_v37, %v1733_v49  ;;  %v9691_v44 = vcombine.low %v1725_v37, %v1733_v49  ;;  %v1565_v49 = vld [vmem:[%s10314_s19 + $0x1520] sm:$0xff] }
 0x66c   : > { %8017 = vmatpush1.bf16.xpose.msra.mxu0 %v9593_v36  ;;  %v1493_v36 = vld [vmem:[%s10314_s19 + $0x12e0] sm:$0xff] }
 0x66d   : > { %8345 = vmatpush1.bf16.xpose.msra.mxu1 %v9849_v40  ;;  %8018 = vmatprep.subr.bf16.mxu0 %v9610_v42  ;;  %v1741_v40 = vld [vmem:[%s10314_s19 + $0x1aa0] sm:$0xff]  ;;  %v9452_v47 = vcombine.high %v1485_v35, %v1493_v36 }
 0x66e   : > { %8346 = vmatprep.subr.bf16.mxu1 %v9866_v5  ;;  %v1749_v42 = vld [vmem:[%s10314_s19 + $0x1ae0] sm:$0xff]  ;;  %v9435_v5 = vcombine.low %v1469_v3, %v1477_v30 }
 0x66f   : > { %v9708_v11 = vcombine.high %v1741_v40, %v1749_v42  ;;  %v9707_v27 = vcombine.low %v1741_v40, %v1749_v42  ;;  %v1581_v42 = vld [vmem:[%s10314_s19 + $0x15a0] sm:$0xff] }
 0x674   : > { %8019 = vmatpush1.bf16.xpose.msra.mxu0 %v9609_v24  ;;  %v1509_v24 = vld [vmem:[%s10314_s19 + $0x1360] sm:$0xff] }
 0x675   : > { %8347 = vmatpush1.bf16.xpose.msra.mxu1 %v9865_v61  ;;  %8029 = vmatprep.subr.bf16.mxu0 %v9372_v48  ;;  %v1757_v61 = vld [vmem:[%s10314_s19 + $0x1b20] sm:$0xff]  ;;  %v9468_v62 = vcombine.high %v1501_v60, %v1509_v24 }
 0x676   : > { %8357 = vmatprep.subr.bf16.mxu1 %v9628_v9  ;;  %v1765_v48 = vld [vmem:[%s10314_s19 + $0x1b60] sm:$0xff]  ;;  %v9451_v9 = vcombine.low %v1485_v35, %v1493_v36 }
 0x677   : > { %v9723_v29 = vcombine.low %v1757_v61, %v1765_v48 }
 0x67b   : > { %8021 = vmatmul.mubr.bf16.vlgmr.msra.gmra.mrb[12].mxu0 %v10763_v21 }
 0x67c   : > { %8349 = vmatmul.mubr.bf16.vlgmr.msra.gmra.mrb[28].mxu1 %v10763_v21  ;;  %8030 = vmatpush1.bf16.xpose.msra.mxu0 %v9371_v52  ;;  %v9660_v21 = vcombine.high %v1693_v6, %v1701_v28  ;;  %v9724_v52 = vcombine.high %v1757_v61, %v1765_v48  ;;  %v1533_v28 = vld [vmem:[%s10314_s19 + $0x1420] sm:$0xff] }
 0x67d   : > { %8061 = vmatprep.mubr.bf16.mxu0 %v10765_v25  ;;  %8358 = vmatpush1.bf16.xpose.msra.mxu1 %v9627_v59  ;;  %v1773_v59 = vld [vmem:[%s10314_s19 + $0x1ba0] sm:$0xff] }
 0x67e   : > { %8389 = vmatprep.mubr.bf16.mxu1 %v10765_v25  ;;  %8031 = vmatprep.subr.bf16.mxu0 %v9388_v1  ;;  %v1453_v25 = vld [vmem:[%s10314_s19 + $0x11a0] sm:$0xff] }
 0x67f   : > { %8359 = vmatprep.subr.bf16.mxu1 %v9644_v2  ;;  %v9420_v16 = vcombine.high %v1453_v25, %v1461_v14  ;;  %v9419_v22 = vcombine.low %v1453_v25, %v1461_v14  ;;  %v1781_v1 = vld [vmem:[%s10314_s19 + $0x1be0] sm:$0xff]  ;;  %v9467_v2 = vcombine.low %v1501_v60, %v1509_v24 }
 0x680   : > { %v9740_v6 = vcombine.high %v1773_v59, %v1781_v1  ;;  %v9739_v25 = vcombine.low %v1773_v59, %v1781_v1  ;;  %v1597_v48 = vld [vmem:[%s10314_s19 + $0x1620] sm:$0xff] }
 0x681   : > { %v1613_v1 = vld [vmem:[%s10314_s19 + $0x16a0] sm:$0xff] }
 0x684   : > { %8032 = vmatpush1.bf16.xpose.msra.mxu0 %v9387_v33  ;;  %v1541_v33 = vld [vmem:[%s10314_s19 + $0x1460] sm:$0xff] }
 0x685   : > { %8360 = vmatpush1.bf16.xpose.msra.mxu1 %v9643_v10  ;;  %8033 = vmatprep.subr.bf16.mxu0 %v9404_v13  ;;  %v1789_v10 = vld [vmem:[%s10314_s19 + $0x1c20] sm:$0xff]  ;;  %v9500_v14 = vcombine.high %v1533_v28, %v1541_v33 }
 0x686   : > { %8361 = vmatprep.subr.bf16.mxu1 %v9660_v21  ;;  %v1797_v13 = vld [vmem:[%s10314_s19 + $0x1c60] sm:$0xff]  ;;  %v9483_v21 = vcombine.low %v1517_v53, %v1525_v58 }
 0x687   : > { %v9756_v57 = vcombine.high %v1789_v10, %v1797_v13  ;;  %v9755_v3 = vcombine.low %v1789_v10, %v1797_v13  ;;  %v1629_v13 = vld [vmem:[%s10314_s19 + $0x1720] sm:$0xff] }
 0x68c   : > { %8034 = vmatpush1.bf16.xpose.msra.mxu0 %v9403_v15  ;;  %v1557_v15 = vld [vmem:[%s10314_s19 + $0x14e0] sm:$0xff] }
 0x68d   : > { %8362 = vmatpush1.bf16.xpose.msra.mxu1 %v9659_v8  ;;  %8035 = vmatprep.subr.bf16.mxu0 %v9420_v16  ;;  %v1805_v8 = vld [vmem:[%s10314_s19 + $0x1ca0] sm:$0xff]  ;;  %v9516_v30 = vcombine.high %v1549_v63, %v1557_v15 }
 0x68e   : > { %8363 = vmatprep.subr.bf16.mxu1 %v9676_v17  ;;  %v1813_v16 = vld [vmem:[%s10314_s19 + $0x1ce0] sm:$0xff]  ;;  %v9499_v17 = vcombine.low %v1533_v28, %v1541_v33 }
 0x68f   : > { %v9772_v37 = vcombine.high %v1805_v8, %v1813_v16  ;;  %v9771_v35 = vcombine.low %v1805_v8, %v1813_v16  ;;  %v1645_v16 = vld [vmem:[%s10314_s19 + $0x17a0] sm:$0xff] }
 0x694   : > { %8036 = vmatpush1.bf16.xpose.msra.mxu0 %v9419_v22  ;;  %v1573_v22 = vld [vmem:[%s10314_s19 + $0x1560] sm:$0xff] }
 0x695   : > { %8364 = vmatpush1.bf16.xpose.msra.mxu1 %v9675_v51  ;;  %8037 = vmatprep.subr.bf16.mxu0 %v9436_v26  ;;  %v1821_v51 = vld [vmem:[%s10314_s19 + $0x1d20] sm:$0xff]  ;;  %v9532_v36 = vcombine.high %v1565_v49, %v1573_v22 }
 0x696   : > { %8365 = vmatprep.subr.bf16.mxu1 %v9692_v31  ;;  %v1829_v26 = vld [vmem:[%s10314_s19 + $0x1d60] sm:$0xff]  ;;  %v9515_v31 = vcombine.low %v1549_v63, %v1557_v15 }
 0x697   : > { %v9788_v40 = vcombine.high %v1821_v51, %v1829_v26  ;;  %v9787_v60 = vcombine.low %v1821_v51, %v1829_v26  ;;  %v1406_v26 = vld [vmem:[%s10314_s19 + $0x1028] sm:$0xff] }
 0x69c   : > { %8038 = vmatpush1.bf16.xpose.msra.mxu0 %v9435_v5  ;;  %v1589_v5 = vld [vmem:[%s10314_s19 + $0x15e0] sm:$0xff] }
 0x69d   : > { %8366 = vmatpush1.bf16.xpose.msra.mxu1 %v9691_v44  ;;  %8039 = vmatprep.subr.bf16.mxu0 %v9452_v47  ;;  %v1837_v44 = vld [vmem:[%s10314_s19 + $0x1da0] sm:$0xff]  ;;  %v9548_v24 = vcombine.high %v1581_v42, %v1589_v5 }
 0x69e   : > { %8367 = vmatprep.subr.bf16.mxu1 %v9708_v11  ;;  %v1845_v47 = vld [vmem:[%s10314_s19 + $0x1de0] sm:$0xff]  ;;  %v9531_v11 = vcombine.low %v1565_v49, %v1573_v22 }
 0x69f   : > { %v9804_v61 = vcombine.high %v1837_v44, %v1845_v47  ;;  %v9803_v53 = vcombine.low %v1837_v44, %v1845_v47  ;;  %v1422_v47 = vld [vmem:[%s10314_s19 + $0x10a8] sm:$0xff] }
 0x6a4   : > { %8040 = vmatpush1.bf16.xpose.msra.mxu0 %v9451_v9  ;;  %v1605_v9 = vld [vmem:[%s10314_s19 + $0x1660] sm:$0xff] }
 0x6a5   : > { %8368 = vmatpush1.bf16.xpose.msra.mxu1 %v9707_v27  ;;  %8041 = vmatprep.subr.bf16.mxu0 %v9468_v62  ;;  %v1853_v27 = vld [vmem:[%s10314_s19 + $0x1e20] sm:$0xff]  ;;  %v9564_v58 = vcombine.high %v1597_v48, %v1605_v9 }
 0x6a6   : > { %8369 = vmatprep.subr.bf16.mxu1 %v9724_v52  ;;  %v1861_v62 = vld [vmem:[%s10314_s19 + $0x1e60] sm:$0xff]  ;;  %v9547_v52 = vcombine.low %v1581_v42, %v1589_v5 }
 0x6a7   : > { %v9820_v59 = vcombine.high %v1853_v27, %v1861_v62  ;;  %v9819_v28 = vcombine.low %v1853_v27, %v1861_v62  ;;  %v1438_v62 = vld [vmem:[%s10314_s19 + $0x1128] sm:$0xff] }
 0x6ac   : > { %8042 = vmatpush1.bf16.xpose.msra.mxu0 %v9467_v2  ;;  %v1621_v2 = vld [vmem:[%s10314_s19 + $0x16e0] sm:$0xff] }
 0x6ad   : > { %8370 = vmatpush1.bf16.xpose.msra.mxu1 %v9723_v29  ;;  %8043 = vmatprep.subr.bf16.mxu0 %v9484_v41  ;;  %v1869_v29 = vld [vmem:[%s10314_s19 + $0x1ea0] sm:$0xff]  ;;  %v9580_v33 = vcombine.high %v1613_v1, %v1621_v2 }
 0x6ae   : > { %8371 = vmatprep.subr.bf16.mxu1 %v9740_v6  ;;  %v1877_v41 = vld [vmem:[%s10314_s19 + $0x1ee0] sm:$0xff]  ;;  %v9563_v6 = vcombine.low %v1597_v48, %v1605_v9 }
 0x6af   : > { %v9836_v10 = vcombine.high %v1869_v29, %v1877_v41  ;;  %v9835_v63 = vcombine.low %v1869_v29, %v1877_v41  ;;  %v1462_v29 = vld [vmem:[%s10314_s19 + $0x11e8] sm:$0xff] }
 0x6b0   : > { %v1710_v41 = vld [vmem:[%s10314_s19 + $0x19a8] sm:$0xff] }
 0x6b4   : > { %8044 = vmatpush1.bf16.xpose.msra.mxu0 %v9483_v21  ;;  %v1637_v21 = vld [vmem:[%s10314_s19 + $0x1760] sm:$0xff] }
 0x6b5   : > { %8372 = vmatpush1.bf16.xpose.msra.mxu1 %v9739_v25  ;;  %8045 = vmatprep.subr.bf16.mxu0 %v9500_v14  ;;  %v1885_v25 = vld [vmem:[%s10314_s19 + $0x1f20] sm:$0xff]  ;;  %v9596_v15 = vcombine.high %v1629_v13, %v1637_v21 }
 0x6b6   : > { %8373 = vmatprep.subr.bf16.mxu1 %v9756_v57  ;;  %v1893_v14 = vld [vmem:[%s10314_s19 + $0x1f60] sm:$0xff]  ;;  %v9579_v57 = vcombine.low %v1613_v1, %v1621_v2 }
 0x6b7   : > { %v9852_v8 = vcombine.high %v1885_v25, %v1893_v14  ;;  %v9851_v49 = vcombine.low %v1885_v25, %v1893_v14  ;;  %v1478_v25 = vld [vmem:[%s10314_s19 + $0x1268] sm:$0xff] }
 0x6b8   : > { %v1726_v14 = vld [vmem:[%s10314_s19 + $0x1a28] sm:$0xff] }
 0x6bc   : > { %8046 = vmatpush1.bf16.xpose.msra.mxu0 %v9499_v17  ;;  %v1653_v17 = vld [vmem:[%s10314_s19 + $0x17e0] sm:$0xff] }
 0x6bd   : > { %8374 = vmatpush1.bf16.xpose.msra.mxu1 %v9755_v3  ;;  %8047 = vmatprep.subr.bf16.mxu0 %v9516_v30  ;;  %v1901_v3 = vld [vmem:[%s10314_s19 + $0x1fa0] sm:$0xff]  ;;  %v9612_v22 = vcombine.high %v1645_v16, %v1653_v17 }
 0x6be   : > { %8375 = vmatprep.subr.bf16.mxu1 %v9772_v37  ;;  %v1909_v30 = vld [vmem:[%s10314_s19 + $0x1fe0] sm:$0xff]  ;;  %v9595_v37 = vcombine.low %v1629_v13, %v1637_v21  ;;  %v1470_v21 = vld [vmem:[%s10314_s19 + $0x1228] sm:$0xff] }
 0x6bf   : > { %v9868_v51 = vcombine.high %v1901_v3, %v1909_v30  ;;  %v9867_v42 = vcombine.low %v1901_v3, %v1909_v30  ;;  %v1494_v3 = vld [vmem:[%s10314_s19 + $0x12e8] sm:$0xff] }
 0x6c0   : > { %v1742_v30 = vld [vmem:[%s10314_s19 + $0x1aa8] sm:$0xff] }
 0x6c4   : > { %8048 = vmatpush1.bf16.xpose.msra.mxu0 %v9515_v31  ;;  %v1414_v31 = vld [vmem:[%s10314_s19 + $0x1068] sm:$0xff] }
 0x6c5   : > { %8376 = vmatpush1.bf16.xpose.msra.mxu1 %v9771_v35  ;;  %8049 = vmatprep.subr.bf16.mxu0 %v9532_v36  ;;  %v1662_v35 = vld [vmem:[%s10314_s19 + $0x1828] sm:$0xff]  ;;  %v9374_v5 = vcombine.high %v1406_v26, %v1414_v31 }
 0x6c6   : > { %8377 = vmatprep.subr.bf16.mxu1 %v9788_v40  ;;  %v1670_v36 = vld [vmem:[%s10314_s19 + $0x1868] sm:$0xff]  ;;  %v9611_v40 = vcombine.low %v1645_v16, %v1653_v17 }
 0x6c7   : > { %v9630_v44 = vcombine.high %v1662_v35, %v1670_v36  ;;  %v9629_v48 = vcombine.low %v1662_v35, %v1670_v36  ;;  %v1486_v17 = vld [vmem:[%s10314_s19 + $0x12a8] sm:$0xff] }
 0x6c8   : > { %v1510_v35 = vld [vmem:[%s10314_s19 + $0x1368] sm:$0xff] }
 0x6c9   : > { %v1758_v36 = vld [vmem:[%s10314_s19 + $0x1b28] sm:$0xff] }
 0x6cc   : > { %8050 = vmatpush1.bf16.xpose.msra.mxu0 %v9531_v11  ;;  %v1430_v11 = vld [vmem:[%s10314_s19 + $0x10e8] sm:$0xff] }
 0x6cd   : > { %8378 = vmatpush1.bf16.xpose.msra.mxu1 %v9787_v60  ;;  %8051 = vmatprep.subr.bf16.mxu0 %v9548_v24  ;;  %v9373_v60 = vcombine.low %v1406_v26, %v1414_v31  ;;  %v1678_v24 = vld [vmem:[%s10314_s19 + $0x18a8] sm:$0xff]  ;;  %v9390_v9 = vcombine.high %v1422_v47, %v1430_v11 }
 0x6ce   : > { %8379 = vmatprep.subr.bf16.mxu1 %v9804_v61  ;;  %v1686_v61 = vld [vmem:[%s10314_s19 + $0x18e8] sm:$0xff] }
 0x6cf   : > { %v9646_v27 = vcombine.high %v1678_v24, %v1686_v61  ;;  %v9645_v1 = vcombine.low %v1678_v24, %v1686_v61  ;;  %v1502_v31 = vld [vmem:[%s10314_s19 + $0x1328] sm:$0xff] }
 0x6d0   : > { %v1774_v24 = vld [vmem:[%s10314_s19 + $0x1ba8] sm:$0xff] }
 0x6d1   : > { %v1782_v61 = vld [vmem:[%s10314_s19 + $0x1be8] sm:$0xff] }
 0x6d4   : > { %8052 = vmatpush1.bf16.xpose.msra.mxu0 %v9547_v52  ;;  %v1446_v52 = vld [vmem:[%s10314_s19 + $0x1168] sm:$0xff] }
 0x6d5   : > { %8380 = vmatpush1.bf16.xpose.msra.mxu1 %v9803_v53  ;;  %8053 = vmatprep.subr.bf16.mxu0 %v9564_v58  ;;  %v1694_v53 = vld [vmem:[%s10314_s19 + $0x1928] sm:$0xff]  ;;  %v9406_v2 = vcombine.high %v1438_v62, %v1446_v52 }
 0x6d6   : > { %8381 = vmatprep.subr.bf16.mxu1 %v9820_v59  ;;  %v1702_v58 = vld [vmem:[%s10314_s19 + $0x1968] sm:$0xff]  ;;  %v9389_v59 = vcombine.low %v1422_v47, %v1430_v11 }
 0x6d7   : > { %v1518_v11 = vld [vmem:[%s10314_s19 + $0x13a8] sm:$0xff] }
 0x6dc   : > { %8054 = vmatpush1.bf16.xpose.msra.mxu0 %v9563_v6  ;;  %v1718_v6 = vld [vmem:[%s10314_s19 + $0x19e8] sm:$0xff] }
 0x6dd   : > { %8382 = vmatpush1.bf16.xpose.msra.mxu1 %v9819_v28  ;;  %8055 = vmatprep.subr.bf16.mxu0 %v9580_v33  ;;  %v9405_v28 = vcombine.low %v1438_v62, %v1446_v52  ;;  %v9661_v33 = vcombine.low %v1694_v53, %v1702_v58  ;;  %v9678_v13 = vcombine.high %v1710_v41, %v1718_v6  ;;  %v1534_v52 = vld [vmem:[%s10314_s19 + $0x1428] sm:$0xff] }
 0x6de   : > { %8383 = vmatprep.subr.bf16.mxu1 %v9836_v10  ;;  %v9742_v62 = vcombine.high %v1774_v24, %v1782_v61 }
 0x6e4   : > { %8056 = vmatpush1.bf16.xpose.msra.mxu0 %v9579_v57  ;;  %v1734_v57 = vld [vmem:[%s10314_s19 + $0x1a68] sm:$0xff] }
 0x6e5   : > { %8384 = vmatpush1.bf16.xpose.msra.mxu1 %v9835_v63  ;;  %8057 = vmatprep.subr.bf16.mxu0 %v9596_v15  ;;  %v9677_v15 = vcombine.low %v1710_v41, %v1718_v6  ;;  %v9694_v16 = vcombine.high %v1726_v14, %v1734_v57  ;;  %v1558_v41 = vld [vmem:[%s10314_s19 + $0x14e8] sm:$0xff] }
 0x6e6   : > { %8385 = vmatprep.subr.bf16.mxu1 %v9852_v8  ;;  %v9438_v8 = vcombine.high %v1470_v21, %v1478_v25  ;;  %v1806_v6 = vld [vmem:[%s10314_s19 + $0x1ca8] sm:$0xff] }
 0x6ec   : > { %8058 = vmatpush1.bf16.xpose.msra.mxu0 %v9595_v37  ;;  %v1750_v37 = vld [vmem:[%s10314_s19 + $0x1ae8] sm:$0xff] }
 0x6ed   : > { %8386 = vmatpush1.bf16.xpose.msra.mxu1 %v9851_v49  ;;  %8059 = vmatprep.subr.bf16.mxu0 %v9612_v22  ;;  %v9437_v49 = vcombine.low %v1470_v21, %v1478_v25  ;;  %v9693_v22 = vcombine.low %v1726_v14, %v1734_v57  ;;  %v9710_v26 = vcombine.high %v1742_v30, %v1750_v37  ;;  %v1566_v25 = vld [vmem:[%s10314_s19 + $0x1528] sm:$0xff] }
 0x6ee   : > { %8387 = vmatprep.subr.bf16.mxu1 %v9868_v51  ;;  %v9454_v51 = vcombine.high %v1486_v17, %v1494_v3  ;;  %v1574_v14 = vld [vmem:[%s10314_s19 + $0x1568] sm:$0xff] }
 0x6ef   : > { %v1822_v57 = vld [vmem:[%s10314_s19 + $0x1d28] sm:$0xff] }
 0x6f4   : > { %8060 = vmatpush1.bf16.xpose.msra.mxu0 %v9611_v40  ;;  %v1766_v40 = vld [vmem:[%s10314_s19 + $0x1b68] sm:$0xff] }
 0x6f5   : > { %8388 = vmatpush1.bf16.xpose.msra.mxu1 %v9867_v42  ;;  %8070 = vmatprep.subr.bf16.mxu0 %v9374_v5  ;;  %v9453_v42 = vcombine.low %v1486_v17, %v1494_v3  ;;  %v9709_v5 = vcombine.low %v1742_v30, %v1750_v37  ;;  %v9726_v47 = vcombine.high %v1758_v36, %v1766_v40  ;;  %v1582_v3 = vld [vmem:[%s10314_s19 + $0x15a8] sm:$0xff] }
 0x6f6   : > { %8398 = vmatprep.subr.bf16.mxu1 %v9630_v44  ;;  %v9470_v44 = vcombine.high %v1502_v31, %v1510_v35  ;;  %v1590_v30 = vld [vmem:[%s10314_s19 + $0x15e8] sm:$0xff] }
 0x6f7   : > { %v1838_v37 = vld [vmem:[%s10314_s19 + $0x1da8] sm:$0xff] }
 0x6fb   : > { %8062 = vmatmul.mubr.bf16.vlgmr.msra.gmra.mrb[12].mxu0 %v10841_v55 }
 0x6fc   : > { %8390 = vmatmul.mubr.bf16.vlgmr.msra.gmra.mrb[28].mxu1 %v10841_v55  ;;  %8071 = vmatpush1.bf16.xpose.msra.mxu0 %v9373_v60  ;;  %v9662_v55 = vcombine.high %v1694_v53, %v1702_v58  ;;  %v1526_v60 = vld [vmem:[%s10314_s19 + $0x13e8] sm:$0xff] }
 0x6fd   : > { %8102 = vmatprep.mubr.bf16.mxu0 %v10843_v50  ;;  %8399 = vmatpush1.bf16.xpose.msra.mxu1 %v9629_v48  ;;  %v9469_v48 = vcombine.low %v1502_v31, %v1510_v35  ;;  %v1542_v53 = vld [vmem:[%s10314_s19 + $0x1468] sm:$0xff] }
 0x6fe   : > { %8430 = vmatprep.mubr.bf16.mxu1 %v10843_v50  ;;  %8072 = vmatprep.subr.bf16.mxu0 %v9390_v9  ;;  %v1454_v50 = vld [vmem:[%s10314_s19 + $0x11a8] sm:$0xff]  ;;  %v9725_v9 = vcombine.low %v1758_v36, %v1766_v40 }
 0x6ff   : > { %8400 = vmatprep.subr.bf16.mxu1 %v9646_v27  ;;  %v9422_v10 = vcombine.high %v1454_v50, %v1462_v29  ;;  %v9421_v63 = vcombine.low %v1454_v50, %v1462_v29  ;;  %v9486_v27 = vcombine.high %v1518_v11, %v1526_v60  ;;  %v1790_v58 = vld [vmem:[%s10314_s19 + $0x1c28] sm:$0xff] }
 0x700   : > { %v1550_v29 = vld [vmem:[%s10314_s19 + $0x14a8] sm:$0xff] }
 0x701   : > { %v1598_v35 = vld [vmem:[%s10314_s19 + $0x1628] sm:$0xff] }
 0x702   : > { %v1606_v36 = vld [vmem:[%s10314_s19 + $0x1668] sm:$0xff] }
 0x703   : > { %v1854_v40 = vld [vmem:[%s10314_s19 + $0x1e28] sm:$0xff] }
 0x704   : > { %8073 = vmatpush1.bf16.xpose.msra.mxu0 %v9389_v59  ;;  %v1798_v59 = vld [vmem:[%s10314_s19 + $0x1c68] sm:$0xff] }
 0x705   : > { %8401 = vmatpush1.bf16.xpose.msra.mxu1 %v9645_v1  ;;  %8074 = vmatprep.subr.bf16.mxu0 %v9406_v2  ;;  %v9485_v1 = vcombine.low %v1518_v11, %v1526_v60  ;;  %v9741_v2 = vcombine.low %v1774_v24, %v1782_v61  ;;  %v9758_v50 = vcombine.high %v1790_v58, %v1798_v59  ;;  %v1614_v60 = vld [vmem:[%s10314_s19 + $0x16a8] sm:$0xff] }
 0x706   : > { %8402 = vmatprep.subr.bf16.mxu1 %v9662_v55  ;;  %v9502_v55 = vcombine.high %v1534_v52, %v1542_v53  ;;  %v1622_v24 = vld [vmem:[%s10314_s19 + $0x16e8] sm:$0xff] }
 0x707   : > { %v1870_v61 = vld [vmem:[%s10314_s19 + $0x1ea8] sm:$0xff] }
 0x70c   : > { %8075 = vmatpush1.bf16.xpose.msra.mxu0 %v9405_v28  ;;  %v1814_v28 = vld [vmem:[%s10314_s19 + $0x1ce8] sm:$0xff] }
 0x70d   : > { %8403 = vmatpush1.bf16.xpose.msra.mxu1 %v9661_v33  ;;  %8076 = vmatprep.subr.bf16.mxu0 %v9422_v10  ;;  %v9501_v33 = vcombine.low %v1534_v52, %v1542_v53  ;;  %v9757_v10 = vcombine.low %v1790_v58, %v1798_v59  ;;  %v9774_v21 = vcombine.high %v1806_v6, %v1814_v28  ;;  %v1630_v53 = vld [vmem:[%s10314_s19 + $0x1728] sm:$0xff] }
 0x70e   : > { %8404 = vmatprep.subr.bf16.mxu1 %v9678_v13  ;;  %v9518_v13 = vcombine.high %v1550_v29, %v1558_v41  ;;  %v1638_v58 = vld [vmem:[%s10314_s19 + $0x1768] sm:$0xff] }
 0x70f   : > { %v1886_v59 = vld [vmem:[%s10314_s19 + $0x1f28] sm:$0xff] }
 0x714   : > { %8077 = vmatpush1.bf16.xpose.msra.mxu0 %v9421_v63  ;;  %v1830_v63 = vld [vmem:[%s10314_s19 + $0x1d68] sm:$0xff] }
 0x715   : > { %8405 = vmatpush1.bf16.xpose.msra.mxu1 %v9677_v15  ;;  %8078 = vmatprep.subr.bf16.mxu0 %v9438_v8  ;;  %v9517_v15 = vcombine.low %v1550_v29, %v1558_v41  ;;  %v9773_v8 = vcombine.low %v1806_v6, %v1814_v28  ;;  %v9790_v17 = vcombine.high %v1822_v57, %v1830_v63  ;;  %v1646_v41 = vld [vmem:[%s10314_s19 + $0x17a8] sm:$0xff] }
 0x716   : > { %8406 = vmatprep.subr.bf16.mxu1 %v9694_v16  ;;  %v9534_v16 = vcombine.high %v1566_v25, %v1574_v14  ;;  %v1654_v6 = vld [vmem:[%s10314_s19 + $0x17e8] sm:$0xff] }
 0x717   : > { %v1902_v28 = vld [vmem:[%s10314_s19 + $0x1fa8] sm:$0xff] }
 0x71c   : > { %8079 = vmatpush1.bf16.xpose.msra.mxu0 %v9437_v49  ;;  %v1846_v49 = vld [vmem:[%s10314_s19 + $0x1de8] sm:$0xff] }
 0x71d   : > { %8407 = vmatpush1.bf16.xpose.msra.mxu1 %v9693_v22  ;;  %8080 = vmatprep.subr.bf16.mxu0 %v9454_v51  ;;  %v9533_v22 = vcombine.low %v1566_v25, %v1574_v14  ;;  %v9789_v51 = vcombine.low %v1822_v57, %v1830_v63  ;;  %v9806_v31 = vcombine.high %v1838_v37, %v1846_v49  ;;  %v1407_v14 = vld [vmem:[%s10314_s19 + $0x1030] sm:$0xff] }
 0x71e   : > { %8408 = vmatprep.subr.bf16.mxu1 %v9710_v26  ;;  %v9550_v26 = vcombine.high %v1582_v3, %v1590_v30  ;;  %v1415_v57 = vld [vmem:[%s10314_s19 + $0x1070] sm:$0xff] }
 0x71f   : > { %v1663_v63 = vld [vmem:[%s10314_s19 + $0x1830] sm:$0xff] }
 0x724   : > { %8081 = vmatpush1.bf16.xpose.msra.mxu0 %v9453_v42  ;;  %v1862_v42 = vld [vmem:[%s10314_s19 + $0x1e68] sm:$0xff] }
 0x725   : > { %8409 = vmatpush1.bf16.xpose.msra.mxu1 %v9709_v5  ;;  %8082 = vmatprep.subr.bf16.mxu0 %v9470_v44  ;;  %v9549_v5 = vcombine.low %v1582_v3, %v1590_v30  ;;  %v9805_v44 = vcombine.low %v1838_v37, %v1846_v49  ;;  %v9822_v11 = vcombine.high %v1854_v40, %v1862_v42  ;;  %v1423_v30 = vld [vmem:[%s10314_s19 + $0x10b0] sm:$0xff] }
 0x726   : > { %8410 = vmatprep.subr.bf16.mxu1 %v9726_v47  ;;  %v9566_v47 = vcombine.high %v1598_v35, %v1606_v36  ;;  %v1431_v37 = vld [vmem:[%s10314_s19 + $0x10f0] sm:$0xff]  ;;  %v9375_v49 = vcombine.low %v1407_v14, %v1415_v57 }
 0x72c   : > { %8083 = vmatpush1.bf16.xpose.msra.mxu0 %v9469_v48  ;;  %v1878_v48 = vld [vmem:[%s10314_s19 + $0x1ee8] sm:$0xff] }
 0x72d   : > { %8411 = vmatpush1.bf16.xpose.msra.mxu1 %v9725_v9  ;;  %8084 = vmatprep.subr.bf16.mxu0 %v9486_v27  ;;  %v9565_v9 = vcombine.low %v1598_v35, %v1606_v36  ;;  %v9821_v27 = vcombine.low %v1854_v40, %v1862_v42  ;;  %v9838_v52 = vcombine.high %v1870_v61, %v1878_v48  ;;  %v1439_v36 = vld [vmem:[%s10314_s19 + $0x1130] sm:$0xff] }
 0x72e   : > { %8412 = vmatprep.subr.bf16.mxu1 %v9742_v62  ;;  %v9582_v62 = vcombine.high %v1614_v60, %v1622_v24  ;;  %v1447_v40 = vld [vmem:[%s10314_s19 + $0x1170] sm:$0xff] }
 0x72f   : > { %v1695_v42 = vld [vmem:[%s10314_s19 + $0x1930] sm:$0xff] }
 0x734   : > { %8085 = vmatpush1.bf16.xpose.msra.mxu0 %v9485_v1  ;;  %v1894_v1 = vld [vmem:[%s10314_s19 + $0x1f68] sm:$0xff] }
 0x735   : > { %8413 = vmatpush1.bf16.xpose.msra.mxu1 %v9741_v2  ;;  %8086 = vmatprep.subr.bf16.mxu0 %v9502_v55  ;;  %v9581_v2 = vcombine.low %v1614_v60, %v1622_v24  ;;  %v9837_v55 = vcombine.low %v1870_v61, %v1878_v48  ;;  %v9854_v29 = vcombine.high %v1886_v59, %v1894_v1  ;;  %v1463_v60 = vld [vmem:[%s10314_s19 + $0x11f0] sm:$0xff] }
 0x736   : > { %8414 = vmatprep.subr.bf16.mxu1 %v9758_v50  ;;  %v9598_v50 = vcombine.high %v1630_v53, %v1638_v58  ;;  %v1711_v24 = vld [vmem:[%s10314_s19 + $0x19b0] sm:$0xff]  ;;  %v9407_v48 = vcombine.low %v1439_v36, %v1447_v40 }
 0x737   : > { %v1719_v61 = vld [vmem:[%s10314_s19 + $0x19f0] sm:$0xff] }
 0x73c   : > { %8087 = vmatpush1.bf16.xpose.msra.mxu0 %v9501_v33  ;;  %v1910_v33 = vld [vmem:[%s10314_s19 + $0x1fe8] sm:$0xff] }
 0x73d   : > { %8415 = vmatpush1.bf16.xpose.msra.mxu1 %v9757_v10  ;;  %8088 = vmatprep.subr.bf16.mxu0 %v9518_v13  ;;  %v9597_v10 = vcombine.low %v1630_v53, %v1638_v58  ;;  %v9853_v13 = vcombine.low %v1886_v59, %v1894_v1  ;;  %v9870_v25 = vcombine.high %v1902_v28, %v1910_v33  ;;  %v1479_v53 = vld [vmem:[%s10314_s19 + $0x1270] sm:$0xff] }
 0x73e   : > { %8416 = vmatprep.subr.bf16.mxu1 %v9774_v21  ;;  %v9614_v21 = vcombine.high %v1646_v41, %v1654_v6  ;;  %v1727_v58 = vld [vmem:[%s10314_s19 + $0x1a30] sm:$0xff] }
 0x73f   : > { %v1735_v59 = vld [vmem:[%s10314_s19 + $0x1a70] sm:$0xff] }
 0x744   : > { %8089 = vmatpush1.bf16.xpose.msra.mxu0 %v9517_v15  ;;  %v1671_v15 = vld [vmem:[%s10314_s19 + $0x1870] sm:$0xff] }
 0x745   : > { %8417 = vmatpush1.bf16.xpose.msra.mxu1 %v9773_v8  ;;  %8090 = vmatprep.subr.bf16.mxu0 %v9534_v16  ;;  %v9613_v8 = vcombine.low %v1646_v41, %v1654_v6  ;;  %v9869_v16 = vcombine.low %v1902_v28, %v1910_v33  ;;  %v9632_v3 = vcombine.high %v1663_v63, %v1671_v15  ;;  %v1495_v41 = vld [vmem:[%s10314_s19 + $0x12f0] sm:$0xff] }
 0x746   : > { %8418 = vmatprep.subr.bf16.mxu1 %v9790_v17  ;;  %v9376_v17 = vcombine.high %v1407_v14, %v1415_v57  ;;  %v1743_v6 = vld [vmem:[%s10314_s19 + $0x1ab0] sm:$0xff] }
 0x747   : > { %v1751_v28 = vld [vmem:[%s10314_s19 + $0x1af0] sm:$0xff] }
 0x748   : > { %v1511_v14 = vld [vmem:[%s10314_s19 + $0x1370] sm:$0xff] }
 0x749   : > { %v1759_v57 = vld [vmem:[%s10314_s19 + $0x1b30] sm:$0xff] }
 0x74c   : > { %8091 = vmatpush1.bf16.xpose.msra.mxu0 %v9533_v22  ;;  %v1679_v22 = vld [vmem:[%s10314_s19 + $0x18b0] sm:$0xff] }
 0x74d   : > { %8419 = vmatpush1.bf16.xpose.msra.mxu1 %v9789_v51  ;;  %8092 = vmatprep.subr.bf16.mxu0 %v9550_v26  ;;  %v1687_v51 = vld [vmem:[%s10314_s19 + $0x18f0] sm:$0xff]  ;;  %v9631_v26 = vcombine.low %v1663_v63, %v1671_v15 }
 0x74e   : > { %8420 = vmatprep.subr.bf16.mxu1 %v9806_v31  ;;  %v9392_v31 = vcombine.high %v1423_v30, %v1431_v37  ;;  %v9648_v35 = vcombine.high %v1679_v22, %v1687_v51  ;;  %v1767_v63 = vld [vmem:[%s10314_s19 + $0x1b70] sm:$0xff] }
 0x754   : > { %8093 = vmatpush1.bf16.xpose.msra.mxu0 %v9549_v5  ;;  %v1703_v5 = vld [vmem:[%s10314_s19 + $0x1970] sm:$0xff] }
 0x755   : > { %8421 = vmatpush1.bf16.xpose.msra.mxu1 %v9805_v44  ;;  %8094 = vmatprep.subr.bf16.mxu0 %v9566_v47  ;;  %v9391_v44 = vcombine.low %v1423_v30, %v1431_v37  ;;  %v9647_v47 = vcombine.low %v1679_v22, %v1687_v51  ;;  %v1527_v30 = vld [vmem:[%s10314_s19 + $0x13f0] sm:$0xff]  ;;  %v9727_v51 = vcombine.low %v1759_v57, %v1767_v63 }
 0x756   : > { %8422 = vmatprep.subr.bf16.mxu1 %v9822_v11  ;;  %v9408_v11 = vcombine.high %v1439_v36, %v1447_v40  ;;  %v1775_v37 = vld [vmem:[%s10314_s19 + $0x1bb0] sm:$0xff] }
 0x757   : > { %v1543_v36 = vld [vmem:[%s10314_s19 + $0x1470] sm:$0xff] }
 0x758   : > { %v1791_v40 = vld [vmem:[%s10314_s19 + $0x1c30] sm:$0xff] }
 0x75c   : > { %8095 = vmatpush1.bf16.xpose.msra.mxu0 %v9565_v9  ;;  %v9663_v9 = vcombine.low %v1695_v42, %v1703_v5 }
 0x75d   : > { %8423 = vmatpush1.bf16.xpose.msra.mxu1 %v9821_v27  ;;  %8096 = vmatprep.subr.bf16.mxu0 %v9582_v62  ;;  %v9680_v62 = vcombine.high %v1711_v24, %v1719_v61 }
 0x75e   : > { %8424 = vmatprep.subr.bf16.mxu1 %v9838_v52  ;;  %v1471_v52 = vld [vmem:[%s10314_s19 + $0x1230] sm:$0xff] }
 0x75f   : > { %v9439_v33 = vcombine.low %v1471_v52, %v1479_v53 }
 0x764   : > { %8097 = vmatpush1.bf16.xpose.msra.mxu0 %v9581_v2  ;;  %v9679_v2 = vcombine.low %v1711_v24, %v1719_v61  ;;  %v1815_v24 = vld [vmem:[%s10314_s19 + $0x1cf0] sm:$0xff] }
 0x765   : > { %8425 = vmatpush1.bf16.xpose.msra.mxu1 %v9837_v55  ;;  %8098 = vmatprep.subr.bf16.mxu0 %v9598_v50  ;;  %v9440_v55 = vcombine.high %v1471_v52, %v1479_v53  ;;  %v9696_v50 = vcombine.high %v1727_v58, %v1735_v59  ;;  %v1575_v52 = vld [vmem:[%s10314_s19 + $0x1570] sm:$0xff] }
 0x766   : > { %8426 = vmatprep.subr.bf16.mxu1 %v9854_v29  ;;  %v1487_v29 = vld [vmem:[%s10314_s19 + $0x12b0] sm:$0xff] }
 0x767   : > { %v9455_v15 = vcombine.low %v1487_v29, %v1495_v41  ;;  %v1823_v53 = vld [vmem:[%s10314_s19 + $0x1d30] sm:$0xff] }
 0x76c   : > { %8099 = vmatpush1.bf16.xpose.msra.mxu0 %v9597_v10  ;;  %v9695_v10 = vcombine.low %v1727_v58, %v1735_v59  ;;  %v1831_v58 = vld [vmem:[%s10314_s19 + $0x1d70] sm:$0xff] }
 0x76d   : > { %8427 = vmatpush1.bf16.xpose.msra.mxu1 %v9853_v13  ;;  %8100 = vmatprep.subr.bf16.mxu0 %v9614_v21  ;;  %v9456_v13 = vcombine.high %v1487_v29, %v1495_v41  ;;  %v9712_v21 = vcombine.high %v1743_v6, %v1751_v28  ;;  %v1591_v29 = vld [vmem:[%s10314_s19 + $0x15f0] sm:$0xff] }
 0x76e   : > { %8428 = vmatprep.subr.bf16.mxu1 %v9870_v25  ;;  %v1503_v25 = vld [vmem:[%s10314_s19 + $0x1330] sm:$0xff] }
 0x76f   : > { %v9471_v22 = vcombine.low %v1503_v25, %v1511_v14  ;;  %v1839_v41 = vld [vmem:[%s10314_s19 + $0x1db0] sm:$0xff] }
 0x774   : > { %8101 = vmatpush1.bf16.xpose.msra.mxu0 %v9613_v8  ;;  %v9711_v8 = vcombine.low %v1743_v6, %v1751_v28  ;;  %v1847_v6 = vld [vmem:[%s10314_s19 + $0x1df0] sm:$0xff] }
 0x775   : > { %8429 = vmatpush1.bf16.xpose.msra.mxu1 %v9869_v16  ;;  %8111 = vmatprep.subr.bf16.mxu0 %v9376_v17  ;;  %v9472_v16 = vcombine.high %v1503_v25, %v1511_v14  ;;  %v9728_v17 = vcombine.high %v1759_v57, %v1767_v63  ;;  %v1607_v25 = vld [vmem:[%s10314_s19 + $0x1670] sm:$0xff] }
 0x776   : > { %8439 = vmatprep.subr.bf16.mxu1 %v9632_v3  ;;  %v1519_v3 = vld [vmem:[%s10314_s19 + $0x13b0] sm:$0xff] }
 0x777   : > { %v1855_v14 = vld [vmem:[%s10314_s19 + $0x1e30] sm:$0xff] }
 0x778   : > { %v1863_v57 = vld [vmem:[%s10314_s19 + $0x1e70] sm:$0xff] }
 0x77b   : > { %8103 = vmatmul.mubr.bf16.vlgmr.msra.gmra.mrb[12].mxu0 %v10919_v0 }
 0x77c   : > { %8431 = vmatmul.mubr.bf16.vlgmr.msra.gmra.mrb[28].mxu1 %v10919_v0  ;;  %8112 = vmatpush1.bf16.xpose.msra.mxu0 %v9375_v49  ;;  %v9664_v0 = vcombine.high %v1695_v42, %v1703_v5  ;;  %v1783_v49 = vld [vmem:[%s10314_s19 + $0x1bf0] sm:$0xff]  ;;  %v9487_v5 = vcombine.low %v1519_v3, %v1527_v30 }
 0x77d   : > { %8143 = vmatprep.mubr.bf16.mxu0 %v10921_v4  ;;  %8440 = vmatpush1.bf16.xpose.msra.mxu1 %v9631_v26  ;;  %v9488_v26 = vcombine.high %v1519_v3, %v1527_v30  ;;  %v1799_v42 = vld [vmem:[%s10314_s19 + $0x1c70] sm:$0xff] }
 0x77e   : > { %8471 = vmatprep.mubr.bf16.mxu1 %v10921_v4  ;;  %8113 = vmatprep.subr.bf16.mxu0 %v9392_v31  ;;  %v1455_v4 = vld [vmem:[%s10314_s19 + $0x11b0] sm:$0xff]  ;;  %v9744_v31 = vcombine.high %v1775_v37, %v1783_v49 }
 0x77f   : > { %8441 = vmatprep.subr.bf16.mxu1 %v9648_v35  ;;  %v9424_v27 = vcombine.high %v1455_v4, %v1463_v60  ;;  %v9423_v1 = vcombine.low %v1455_v4, %v1463_v60  ;;  %v1535_v35 = vld [vmem:[%s10314_s19 + $0x1430] sm:$0xff] }
 0x780   : > { %v1559_v4 = vld [vmem:[%s10314_s19 + $0x14f0] sm:$0xff]  ;;  %v9503_v61 = vcombine.low %v1535_v35, %v1543_v36 }
 0x781   : > { %v1807_v60 = vld [vmem:[%s10314_s19 + $0x1cb0] sm:$0xff] }
 0x782   : > { %v1623_v3 = vld [vmem:[%s10314_s19 + $0x16f0] sm:$0xff] }
 0x783   : > { %v1871_v30 = vld [vmem:[%s10314_s19 + $0x1eb0] sm:$0xff] }
 0x784   : > { %8114 = vmatpush1.bf16.xpose.msra.mxu0 %v9391_v44  ;;  %v9743_v44 = vcombine.low %v1775_v37, %v1783_v49  ;;  %v1879_v37 = vld [vmem:[%s10314_s19 + $0x1ef0] sm:$0xff] }
 0x785   : > { %8442 = vmatpush1.bf16.xpose.msra.mxu1 %v9647_v47  ;;  %8115 = vmatprep.subr.bf16.mxu0 %v9408_v11  ;;  %v9504_v47 = vcombine.high %v1535_v35, %v1543_v36  ;;  %v9760_v11 = vcombine.high %v1791_v40, %v1799_v42  ;;  %v1639_v35 = vld [vmem:[%s10314_s19 + $0x1770] sm:$0xff] }
 0x786   : > { %8443 = vmatprep.subr.bf16.mxu1 %v9664_v0  ;;  %v1551_v0 = vld [vmem:[%s10314_s19 + $0x14b0] sm:$0xff] }
 0x787   : > { %v9519_v59 = vcombine.low %v1551_v0, %v1559_v4  ;;  %v1887_v36 = vld [vmem:[%s10314_s19 + $0x1f30] sm:$0xff] }
 0x78c   : > { %8116 = vmatpush1.bf16.xpose.msra.mxu0 %v9407_v48  ;;  %v9759_v48 = vcombine.low %v1791_v40, %v1799_v42  ;;  %v1895_v40 = vld [vmem:[%s10314_s19 + $0x1f70] sm:$0xff] }
 0x78d   : > { %8444 = vmatpush1.bf16.xpose.msra.mxu1 %v9663_v9  ;;  %8117 = vmatprep.subr.bf16.mxu0 %v9424_v27  ;;  %v9520_v9 = vcombine.high %v1551_v0, %v1559_v4  ;;  %v9776_v27 = vcombine.high %v1807_v60, %v1815_v24  ;;  %v1655_v0 = vld [vmem:[%s10314_s19 + $0x17f0] sm:$0xff] }
 0x78e   : > { %8445 = vmatprep.subr.bf16.mxu1 %v9680_v62  ;;  %v1567_v62 = vld [vmem:[%s10314_s19 + $0x1530] sm:$0xff] }
 0x78f   : > { %v9535_v28 = vcombine.low %v1567_v62, %v1575_v52  ;;  %v1903_v4 = vld [vmem:[%s10314_s19 + $0x1fb0] sm:$0xff] }
 0x794   : > { %8118 = vmatpush1.bf16.xpose.msra.mxu0 %v9423_v1  ;;  %v9775_v1 = vcombine.low %v1807_v60, %v1815_v24  ;;  %v1911_v60 = vld [vmem:[%s10314_s19 + $0x1ff0] sm:$0xff] }
 0x795   : > { %8446 = vmatpush1.bf16.xpose.msra.mxu1 %v9679_v2  ;;  %8119 = vmatprep.subr.bf16.mxu0 %v9440_v55  ;;  %v9536_v2 = vcombine.high %v1567_v62, %v1575_v52  ;;  %v9792_v55 = vcombine.high %v1823_v53, %v1831_v58  ;;  %v1416_v62 = vld [vmem:[%s10314_s19 + $0x1078] sm:$0xff] }
 0x796   : > { %8447 = vmatprep.subr.bf16.mxu1 %v9696_v50  ;;  %v1583_v50 = vld [vmem:[%s10314_s19 + $0x15b0] sm:$0xff]  ;;  %v1664_v52 = vld [vmem:[%s10314_s19 + $0x1838] sm:$0xff] }
 0x797   : > { %v9551_v63 = vcombine.low %v1583_v50, %v1591_v29 }
 0x79c   : > { %8120 = vmatpush1.bf16.xpose.msra.mxu0 %v9439_v33  ;;  %v9791_v33 = vcombine.low %v1823_v53, %v1831_v58  ;;  %v1672_v53 = vld [vmem:[%s10314_s19 + $0x1878] sm:$0xff] }
 0x79d   : > { %8448 = vmatpush1.bf16.xpose.msra.mxu1 %v9695_v10  ;;  %8121 = vmatprep.subr.bf16.mxu0 %v9456_v13  ;;  %v9552_v10 = vcombine.high %v1583_v50, %v1591_v29  ;;  %v9808_v13 = vcombine.high %v1839_v41, %v1847_v6  ;;  %v1432_v50 = vld [vmem:[%s10314_s19 + $0x10f8] sm:$0xff] }
 0x79e   : > { %8449 = vmatprep.subr.bf16.mxu1 %v9712_v21  ;;  %v1599_v21 = vld [vmem:[%s10314_s19 + $0x1630] sm:$0xff] }
 0x79f   : > { %v9567_v49 = vcombine.low %v1599_v21, %v1607_v25 }
 0x7a4   : > { %8122 = vmatpush1.bf16.xpose.msra.mxu0 %v9455_v15  ;;  %v9807_v15 = vcombine.low %v1839_v41, %v1847_v6  ;;  %v1680_v41 = vld [vmem:[%s10314_s19 + $0x18b8] sm:$0xff] }
 0x7a5   : > { %8450 = vmatpush1.bf16.xpose.msra.mxu1 %v9711_v8  ;;  %8123 = vmatprep.subr.bf16.mxu0 %v9472_v16  ;;  %v9568_v8 = vcombine.high %v1599_v21, %v1607_v25  ;;  %v9824_v16 = vcombine.high %v1855_v14, %v1863_v57  ;;  %v1688_v6 = vld [vmem:[%s10314_s19 + $0x18f8] sm:$0xff] }
 0x7a6   : > { %8451 = vmatprep.subr.bf16.mxu1 %v9728_v17  ;;  %v1615_v17 = vld [vmem:[%s10314_s19 + $0x16b0] sm:$0xff]  ;;  %v1448_v21 = vld [vmem:[%s10314_s19 + $0x1178] sm:$0xff] }
 0x7a7   : > { %v9583_v42 = vcombine.low %v1615_v17, %v1623_v3  ;;  %v1696_v25 = vld [vmem:[%s10314_s19 + $0x1938] sm:$0xff] }
 0x7ac   : > { %8124 = vmatpush1.bf16.xpose.msra.mxu0 %v9471_v22  ;;  %v9823_v22 = vcombine.low %v1855_v14, %v1863_v57  ;;  %v9649_v57 = vcombine.low %v1680_v41, %v1688_v6 }
 0x7ad   : > { %8452 = vmatpush1.bf16.xpose.msra.mxu1 %v9727_v51  ;;  %8125 = vmatprep.subr.bf16.mxu0 %v9488_v26  ;;  %v9584_v51 = vcombine.high %v1615_v17, %v1623_v3  ;;  %v9840_v26 = vcombine.high %v1871_v30, %v1879_v37  ;;  %v1720_v17 = vld [vmem:[%s10314_s19 + $0x19f8] sm:$0xff] }
 0x7ae   : > { %8453 = vmatprep.subr.bf16.mxu1 %v9744_v31  ;;  %v1631_v31 = vld [vmem:[%s10314_s19 + $0x1730] sm:$0xff] }
 0x7af   : > { %v9599_v24 = vcombine.low %v1631_v31, %v1639_v35 }
 0x7b4   : > { %8126 = vmatpush1.bf16.xpose.msra.mxu0 %v9487_v5  ;;  %v9839_v5 = vcombine.low %v1871_v30, %v1879_v37 }
 0x7b5   : > { %8454 = vmatpush1.bf16.xpose.msra.mxu1 %v9743_v44  ;;  %8127 = vmatprep.subr.bf16.mxu0 %v9504_v47  ;;  %v9600_v44 = vcombine.high %v1631_v31, %v1639_v35  ;;  %v9856_v47 = vcombine.high %v1887_v36, %v1895_v40  ;;  %v1736_v31 = vld [vmem:[%s10314_s19 + $0x1a78] sm:$0xff] }
 0x7b6   : > { %8455 = vmatprep.subr.bf16.mxu1 %v9760_v11  ;;  %v1647_v11 = vld [vmem:[%s10314_s19 + $0x17b0] sm:$0xff] }
 0x7b7   : > { %v9615_v58 = vcombine.low %v1647_v11, %v1655_v0 }
 0x7bc   : > { %8128 = vmatpush1.bf16.xpose.msra.mxu0 %v9503_v61  ;;  %v9855_v61 = vcombine.low %v1887_v36, %v1895_v40 }
 0x7bd   : > { %8456 = vmatpush1.bf16.xpose.msra.mxu1 %v9759_v48  ;;  %8129 = vmatprep.subr.bf16.mxu0 %v9520_v9  ;;  %v9616_v48 = vcombine.high %v1647_v11, %v1655_v0  ;;  %v9872_v9 = vcombine.high %v1903_v4, %v1911_v60  ;;  %v1752_v11 = vld [vmem:[%s10314_s19 + $0x1af8] sm:$0xff] }
 0x7be   : > { %8457 = vmatprep.subr.bf16.mxu1 %v9776_v27  ;;  %v1408_v27 = vld [vmem:[%s10314_s19 + $0x1038] sm:$0xff] }
 0x7bf   : > { %v9377_v29 = vcombine.low %v1408_v27, %v1416_v62 }
 0x7c4   : > { %8130 = vmatpush1.bf16.xpose.msra.mxu0 %v9519_v59  ;;  %v9871_v59 = vcombine.low %v1903_v4, %v1911_v60 }
 0x7c5   : > { %8458 = vmatpush1.bf16.xpose.msra.mxu1 %v9775_v1  ;;  %8131 = vmatprep.subr.bf16.mxu0 %v9536_v2  ;;  %v9378_v1 = vcombine.high %v1408_v27, %v1416_v62  ;;  %v9634_v2 = vcombine.high %v1664_v52, %v1672_v53  ;;  %v1768_v27 = vld [vmem:[%s10314_s19 + $0x1b78] sm:$0xff] }
 0x7c6   : > { %8459 = vmatprep.subr.bf16.mxu1 %v9792_v55  ;;  %v1424_v55 = vld [vmem:[%s10314_s19 + $0x10b8] sm:$0xff] }
 0x7c7   : > { %v9393_v14 = vcombine.low %v1424_v55, %v1432_v50 }
 0x7cc   : > { %8132 = vmatpush1.bf16.xpose.msra.mxu0 %v9535_v28  ;;  %v9633_v28 = vcombine.low %v1664_v52, %v1672_v53 }
 0x7cd   : > { %8460 = vmatpush1.bf16.xpose.msra.mxu1 %v9791_v33  ;;  %8133 = vmatprep.subr.bf16.mxu0 %v9552_v10  ;;  %v9394_v33 = vcombine.high %v1424_v55, %v1432_v50  ;;  %v9650_v10 = vcombine.high %v1680_v41, %v1688_v6  ;;  %v1784_v55 = vld [vmem:[%s10314_s19 + $0x1bf8] sm:$0xff] }
 0x7ce   : > { %8461 = vmatprep.subr.bf16.mxu1 %v9808_v13  ;;  %v1440_v13 = vld [vmem:[%s10314_s19 + $0x1138] sm:$0xff] }
 0x7cf   : > { %v9409_v3 = vcombine.low %v1440_v13, %v1448_v21 }
 0x7d4   : > { %8134 = vmatpush1.bf16.xpose.msra.mxu0 %v9551_v63  ;;  %v9410_v63 = vcombine.high %v1440_v13, %v1448_v21  ;;  %v1800_v13 = vld [vmem:[%s10314_s19 + $0x1c78] sm:$0xff] }
 0x7d5   : > { %8462 = vmatpush1.bf16.xpose.msra.mxu1 %v9807_v15  ;;  %8135 = vmatprep.subr.bf16.mxu0 %v9568_v8  ;;  %v1464_v8 = vld [vmem:[%s10314_s19 + $0x11f8] sm:$0xff] }
 0x7d6   : > { %8463 = vmatprep.subr.bf16.mxu1 %v9824_v16  ;;  %v1712_v16 = vld [vmem:[%s10314_s19 + $0x19b8] sm:$0xff] }
 0x7d7   : > { %v9681_v36 = vcombine.low %v1712_v16, %v1720_v17 }
 0x7dc   : > { %8136 = vmatpush1.bf16.xpose.msra.mxu0 %v9567_v49  ;;  %v9682_v49 = vcombine.high %v1712_v16, %v1720_v17 }
 0x7dd   : > { %8464 = vmatpush1.bf16.xpose.msra.mxu1 %v9823_v22  ;;  %8137 = vmatprep.subr.bf16.mxu0 %v9584_v51  ;;  %v1472_v22 = vld [vmem:[%s10314_s19 + $0x1238] sm:$0xff] }
 0x7de   : > { %8465 = vmatprep.subr.bf16.mxu1 %v9840_v26  ;;  %v1480_v51 = vld [vmem:[%s10314_s19 + $0x1278] sm:$0xff] }
 0x7df   : > { %v1728_v26 = vld [vmem:[%s10314_s19 + $0x1a38] sm:$0xff]  ;;  %v9442_v40 = vcombine.high %v1472_v22, %v1480_v51  ;;  %v9441_v0 = vcombine.low %v1472_v22, %v1480_v51 }
 0x7e0   : > { %v9697_v4 = vcombine.low %v1728_v26, %v1736_v31  ;;  %v1832_v22 = vld [vmem:[%s10314_s19 + $0x1d78] sm:$0xff] }
 0x7e4   : > { %8138 = vmatpush1.bf16.xpose.msra.mxu0 %v9583_v42  ;;  %v9698_v42 = vcombine.high %v1728_v26, %v1736_v31 }
 0x7e5   : > { %8466 = vmatpush1.bf16.xpose.msra.mxu1 %v9839_v5  ;;  %8139 = vmatprep.subr.bf16.mxu0 %v9600_v44  ;;  %v1488_v5 = vld [vmem:[%s10314_s19 + $0x12b8] sm:$0xff] }
 0x7e6   : > { %8467 = vmatprep.subr.bf16.mxu1 %v9856_v47  ;;  %v1496_v44 = vld [vmem:[%s10314_s19 + $0x12f8] sm:$0xff] }
 0x7e7   : > { %v1744_v47 = vld [vmem:[%s10314_s19 + $0x1ab8] sm:$0xff]  ;;  %v9458_v60 = vcombine.high %v1488_v5, %v1496_v44  ;;  %v9457_v62 = vcombine.low %v1488_v5, %v1496_v44 }
 0x7e8   : > { %v9713_v52 = vcombine.low %v1744_v47, %v1752_v11  ;;  %v1848_v5 = vld [vmem:[%s10314_s19 + $0x1df8] sm:$0xff] }
 0x7ec   : > { %8140 = vmatpush1.bf16.xpose.msra.mxu0 %v9599_v24  ;;  %v9714_v24 = vcombine.high %v1744_v47, %v1752_v11 }
 0x7ed   : > { %8468 = vmatpush1.bf16.xpose.msra.mxu1 %v9855_v61  ;;  %8141 = vmatprep.subr.bf16.mxu0 %v9616_v48  ;;  %v1504_v61 = vld [vmem:[%s10314_s19 + $0x1338] sm:$0xff] }
 0x7ee   : > { %8469 = vmatprep.subr.bf16.mxu1 %v9872_v9  ;;  %v1512_v48 = vld [vmem:[%s10314_s19 + $0x1378] sm:$0xff] }
 0x7ef   : > { %v1760_v9 = vld [vmem:[%s10314_s19 + $0x1b38] sm:$0xff]  ;;  %v9474_v53 = vcombine.high %v1504_v61, %v1512_v48  ;;  %v9473_v50 = vcombine.low %v1504_v61, %v1512_v48 }
 0x7f0   : > { %v1864_v61 = vld [vmem:[%s10314_s19 + $0x1e78] sm:$0xff] }
 0x7f4   : > { %8142 = vmatpush1.bf16.xpose.msra.mxu0 %v9615_v58  ;;  %v9730_v58 = vcombine.high %v1760_v9, %v1768_v27 }
 0x7f5   : > { %8470 = vmatpush1.bf16.xpose.msra.mxu1 %v9871_v59  ;;  %9909 = vmatprep.subr.msk.bf16.mxu0 %vm7013_vm15, %v9378_v1  ;;  %v1520_v59 = vld [vmem:[%s10314_s19 + $0x13b8] sm:$0xff] }
 0x7f6   : > { %9926 = vmatprep.subr.msk.bf16.mxu1 %vm7013_vm15, %v9634_v2  ;;  %v1528_v1 = vld [vmem:[%s10314_s19 + $0x13f8] sm:$0xff] }
 0x7f7   : > { %v1776_v2 = vld [vmem:[%s10314_s19 + $0x1bb8] sm:$0xff]  ;;  %v9490_v41 = vcombine.high %v1520_v59, %v1528_v1  ;;  %v9489_v21 = vcombine.low %v1520_v59, %v1528_v1 }
 0x7f8   : > { %v9746_v6 = vcombine.high %v1776_v2, %v1784_v55  ;;  %v1880_v59 = vld [vmem:[%s10314_s19 + $0x1ef8] sm:$0xff] }
 0x7fb   : > { %8144 = vmatmul.mubr.bf16.vlgmr.msra.gmra.mrb[12].mxu0 %v10999_v18 }
 0x7fc   : > { %8472 = vmatmul.mubr.bf16.vlgmr.msra.gmra.mrb[28].mxu1 %v10999_v18  ;;  %8153 = vmatpush1.bf16.xpose.msra.mxu0 %v9377_v29  ;;  %v1704_v18 = vld [vmem:[%s10314_s19 + $0x1978] sm:$0xff]  ;;  %v9729_v29 = vcombine.low %v1760_v9, %v1768_v27 }
 0x7fd   : > { %9925 = vmatprep.mubr.msk.bf16.mxu0 %vm7013_vm15, %v11001_v20  ;;  %8481 = vmatpush1.bf16.xpose.msra.mxu1 %v9633_v28  ;;  %v9666_v15 = vcombine.high %v1696_v25, %v1704_v18  ;;  %v9665_v30 = vcombine.low %v1696_v25, %v1704_v18  ;;  %v1536_v28 = vld [vmem:[%s10314_s19 + $0x1438] sm:$0xff]  ;;  %v9745_v25 = vcombine.low %v1776_v2, %v1784_v55 }
 0x7fe   : > { %9942 = vmatprep.mubr.msk.bf16.mxu1 %vm7013_vm15, %v11001_v20  ;;  %9910 = vmatprep.subr.msk.bf16.mxu0 %vm7013_vm15, %v9394_v33  ;;  %v1456_v20 = vld [vmem:[%s10314_s19 + $0x11b8] sm:$0xff] }
 0x7ff   : > { %9927 = vmatprep.subr.msk.bf16.mxu1 %vm7013_vm15, %v9650_v10  ;;  %v9426_v37 = vcombine.high %v1456_v20, %v1464_v8  ;;  %v9425_v35 = vcombine.low %v1456_v20, %v1464_v8  ;;  %v1544_v33 = vld [vmem:[%s10314_s19 + $0x1478] sm:$0xff] }
 0x800   : > { %v1792_v10 = vld [vmem:[%s10314_s19 + $0x1c38] sm:$0xff]  ;;  %v9506_v18 = vcombine.high %v1536_v28, %v1544_v33  ;;  %v9505_v8 = vcombine.low %v1536_v28, %v1544_v33 }
 0x801   : > { %v1816_v20 = vld [vmem:[%s10314_s19 + $0x1cf8] sm:$0xff]  ;;  %v9761_v16 = vcombine.low %v1792_v10, %v1800_v13 }
 0x802   : > { %v1896_v28 = vld [vmem:[%s10314_s19 + $0x1f78] sm:$0xff] }
 0x804   : > { %8155 = vmatpush1.bf16.xpose.msra.mxu0 %v9393_v14  ;;  %v9762_v14 = vcombine.high %v1792_v10, %v1800_v13 }
 0x805   : > { %8483 = vmatpush1.bf16.xpose.msra.mxu1 %v9649_v57  ;;  %9911 = vmatprep.subr.msk.bf16.mxu0 %vm7013_vm15, %v9410_v63  ;;  %v1552_v57 = vld [vmem:[%s10314_s19 + $0x14b8] sm:$0xff] }
 0x806   : > { %9928 = vmatprep.subr.msk.bf16.mxu1 %vm7013_vm15, %v9666_v15  ;;  %v1560_v63 = vld [vmem:[%s10314_s19 + $0x14f8] sm:$0xff] }
 0x807   : > { %v1808_v15 = vld [vmem:[%s10314_s19 + $0x1cb8] sm:$0xff]  ;;  %v9522_v17 = vcombine.high %v1552_v57, %v1560_v63  ;;  %v9521_v51 = vcombine.low %v1552_v57, %v1560_v63 }
 0x808   : > { %v9777_v26 = vcombine.low %v1808_v15, %v1816_v20  ;;  %v1912_v57 = vld [vmem:[%s10314_s19 + $0x1ff8] sm:$0xff] }
 0x80c   : > { %8157 = vmatpush1.bf16.xpose.msra.mxu0 %v9409_v3  ;;  %v9778_v3 = vcombine.high %v1808_v15, %v1816_v20  ;;  %v11689_v15 = vld [vmem:[%s1914_s16] sm:$0xff]  ;;  %s10149_s16 = scalar_lea.vmem %s10148_s15, 64 }
 0x80d   : > { %8485 = vmatpush1.bf16.xpose.msra.mxu1 %v9665_v30  ;;  %9912 = vmatprep.subr.msk.bf16.mxu0 %vm7013_vm15, %v9426_v37  ;;  %v1568_v30 = vld [vmem:[%s10314_s19 + $0x1538] sm:$0xff] }
 0x80e   : > { %9929 = vmatprep.subr.msk.bf16.mxu1 %vm7013_vm15, %v9682_v49  ;;  %v1576_v37 = vld [vmem:[%s10314_s19 + $0x1578] sm:$0xff] }
 0x80f   : > { %v1824_v49 = vld [vmem:[%s10314_s19 + $0x1d38] sm:$0xff]  ;;  %v9538_v31 = vcombine.high %v1568_v30, %v1576_v37  ;;  %v9537_v44 = vcombine.low %v1568_v30, %v1576_v37 }
 0x810   : > { %v9793_v47 = vcombine.low %v1824_v49, %v1832_v22 }
 0x814   : > { %8159 = vmatpush1.bf16.xpose.msra.mxu0 %v9425_v35  ;;  %v9794_v35 = vcombine.high %v1824_v49, %v1832_v22 }
 0x815   : > { %8487 = vmatpush1.bf16.xpose.msra.mxu1 %v9681_v36  ;;  %9913 = vmatprep.subr.msk.bf16.mxu0 %vm7013_vm15, %v9442_v40  ;;  %v1584_v36 = vld [vmem:[%s10314_s19 + $0x15b8] sm:$0xff] }
 0x816   : > { %9930 = vmatprep.subr.msk.bf16.mxu1 %vm7013_vm15, %v9698_v42  ;;  %v1592_v40 = vld [vmem:[%s10314_s19 + $0x15f8] sm:$0xff] }
 0x817   : > { %v1840_v42 = vld [vmem:[%s10314_s19 + $0x1db8] sm:$0xff]  ;;  %v9554_v11 = vcombine.high %v1584_v36, %v1592_v40  ;;  %v9553_v48 = vcombine.low %v1584_v36, %v1592_v40 }
 0x818   : > { %v9809_v9 = vcombine.low %v1840_v42, %v1848_v5 }
 0x81c   : > { %8161 = vmatpush1.bf16.xpose.msra.mxu0 %v9441_v0  ;;  %v9810_v0 = vcombine.high %v1840_v42, %v1848_v5 }
 0x81d   : > { %8489 = vmatpush1.bf16.xpose.msra.mxu1 %v9697_v4  ;;  %9914 = vmatprep.subr.msk.bf16.mxu0 %vm7013_vm15, %v9458_v60  ;;  %v1600_v4 = vld [vmem:[%s10314_s19 + $0x1638] sm:$0xff] }
 0x81e   : > { %9931 = vmatprep.subr.msk.bf16.mxu1 %vm7013_vm15, %v9714_v24  ;;  %v1608_v60 = vld [vmem:[%s10314_s19 + $0x1678] sm:$0xff] }
 0x81f   : > { %v1856_v24 = vld [vmem:[%s10314_s19 + $0x1e38] sm:$0xff]  ;;  %v9570_v27 = vcombine.high %v1600_v4, %v1608_v60  ;;  %v9569_v1 = vcombine.low %v1600_v4, %v1608_v60 }
 0x820   : > { %v9825_v2 = vcombine.low %v1856_v24, %v1864_v61 }
 0x824   : > { %8163 = vmatpush1.bf16.xpose.msra.mxu0 %v9457_v62  ;;  %v9826_v62 = vcombine.high %v1856_v24, %v1864_v61 }
 0x825   : > { %8491 = vmatpush1.bf16.xpose.msra.mxu1 %v9713_v52  ;;  %9915 = vmatprep.subr.msk.bf16.mxu0 %vm7013_vm15, %v9474_v53  ;;  %v1616_v52 = vld [vmem:[%s10314_s19 + $0x16b8] sm:$0xff] }
 0x826   : > { %9932 = vmatprep.subr.msk.bf16.mxu1 %vm7013_vm15, %v9730_v58  ;;  %v1624_v53 = vld [vmem:[%s10314_s19 + $0x16f8] sm:$0xff] }
 0x827   : > { %v1872_v58 = vld [vmem:[%s10314_s19 + $0x1eb8] sm:$0xff]  ;;  %v9586_v55 = vcombine.high %v1616_v52, %v1624_v53  ;;  %v9585_v33 = vcombine.low %v1616_v52, %v1624_v53  ;;  %v1948_v52 = vrot.slane %v11689_v15, %v10536_v38 }
 0x828   : > { %v9841_v10 = vcombine.low %v1872_v58, %v1880_v59 }
 0x82c   : > { %8165 = vmatpush1.bf16.xpose.msra.mxu0 %v9473_v50  ;;  %v9842_v50 = vcombine.high %v1872_v58, %v1880_v59 }
 0x82d   : > { %8493 = vmatpush1.bf16.xpose.msra.mxu1 %v9729_v29  ;;  %9916 = vmatprep.subr.msk.bf16.mxu0 %vm7013_vm15, %v9490_v41  ;;  %v1632_v29 = vld [vmem:[%s10314_s19 + $0x1738] sm:$0xff] }
 0x82e   : > { %9933 = vmatprep.subr.msk.bf16.mxu1 %vm7013_vm15, %v9746_v6  ;;  %v1640_v41 = vld [vmem:[%s10314_s19 + $0x1778] sm:$0xff] }
 0x82f   : > { %v1888_v6 = vld [vmem:[%s10314_s19 + $0x1f38] sm:$0xff]  ;;  %v9602_v13 = vcombine.high %v1632_v29, %v1640_v41  ;;  %v9601_v63 = vcombine.low %v1632_v29, %v1640_v41 }
 0x830   : > { %v9857_v20 = vcombine.low %v1888_v6, %v1896_v28 }
 0x834   : > { %8167 = vmatpush1.bf16.xpose.msra.mxu0 %v9489_v21  ;;  %v9858_v21 = vcombine.high %v1888_v6, %v1896_v28 }
 0x835   : > { %8495 = vmatpush1.bf16.xpose.msra.mxu1 %v9745_v25  ;;  %9917 = vmatprep.subr.msk.bf16.mxu0 %vm7013_vm15, %v9506_v18  ;;  %v1648_v25 = vld [vmem:[%s10314_s19 + $0x17b8] sm:$0xff] }
 0x836   : > { %9934 = vmatprep.subr.msk.bf16.mxu1 %vm7013_vm15, %v9762_v14  ;;  %v1656_v18 = vld [vmem:[%s10314_s19 + $0x17f8] sm:$0xff] }
 0x837   : > { %v1904_v14 = vld [vmem:[%s10314_s19 + $0x1fb8] sm:$0xff]  ;;  %v9617_v37 = vcombine.low %v1648_v25, %v1656_v18  ;;  %s245_s19 = sand.u32 1, %s10197_s22  }
 0x838   : > { %v9873_v49 = vcombine.low %v1904_v14, %v1912_v57  ;;  %s8830_s28 = sshll.u32 %s245_s19, 1  ;;  %s8750_s13 = scalar_lea.sflag [#allocation3], %s245_s19 }
 0x839   : > { %s247_s29 = scalar_lea.vmem [#allocation2], %s8830_s28 }
 0x83a   : > { %s8763_s9 = sshll.u32 %s247_s29, 4  ;;  %s11734_s9 = int_to_ptr.vmem [resolvable:$true] %s8763_s9 }
 0x83b   : > { %s10143_s14 = scalar_lea.vmem %s11734_s9, 32  ;;  %p10150_p0 = scmp.lt.s32.totalorder %s11734_s9, %s10148_s15 }
 0x83c   : > { %8169 = vmatpush1.bf16.xpose.msra.mxu0 %v9505_v8  ;;  %v9618_v8 = vcombine.high %v1648_v25, %v1656_v18  ;;  %p10144_p11 = scmp.ne.s32.totalorder %s11734_s9, %s10143_s14  ;;  %p10151_p1 = scmp.lt.s32.totalorder %s10149_s16, %s10143_s14 }
 0x83d   : > { %8497 = vmatpush1.bf16.xpose.msra.mxu1 %v9761_v16  ;;  %9918 = vmatprep.subr.msk.bf16.mxu0 %vm7013_vm15, %v9522_v17  ;;  %v9874_v16 = vcombine.high %v1904_v14, %v1912_v57  ;;  %v1924_v17 = vrot.slane %v11689_v15, %v10443_v56 }
 0x83e   : > { %9935 = vmatprep.subr.msk.bf16.mxu1 %vm7013_vm15, %v9778_v3  ;;  %v8555_v3 = vld [vmem:[%s11696_s26] sm:$0xff]  ;;  %p10145_p12 = pnand %p10144_p11, %p10283_p5  ;;  %p10152_p2 = por %p10151_p1, %p10150_p0 }
 0x83f   : > { %v9959_v30 = vadd.f32 %v11226_v46, %v1924_v17  ;;  %v9945_v22 = vcombine.high %v8555_v3, %v8555_v3  ;;  %v9944_v46 = vcombine.low %v8555_v3, %v8555_v3 }
 0x840   : > { %p10146_p13 = pneg %p10145_p12 }
 0x841   : > { %v8530_v56 = vmul.f32 0.1, %v9959_v30  ;;  %vm8522_vm3 = vcmp.gt.f32.partialorder %v9959_v30, 0.0 }
 0x842   : > { %p10153_p3 = pnand %p10152_p2, %p10146_p13 }
 0x843   : > { %v8538_v40 = vsel %vm8522_vm3, %v9959_v30, %v8530_v56 }
 0x844   : > { %8171 = vmatpush1.bf16.xpose.msra.mxu0 %v9521_v51  ;;  %v1920_v51 = vrot.slane %v11689_v15, %v10435_v54 }
 0x845   : > { %8499 = vmatpush1.bf16.xpose.msra.mxu1 %v9777_v26  ;;  %9919 = vmatprep.subr.msk.bf16.mxu0 %vm7013_vm15, %v9538_v31  ;;  %v1932_v26 = vrot.slane %v11689_v15, %v10457_v7  ;;  %v8546_v7 = vpack.c.bf16 %v8538_v40, %v8538_v40 }
 0x846   : > { %9936 = vmatprep.subr.msk.bf16.mxu1 %vm7013_vm15, %v9794_v35  ;;  %v9958_v31 = vadd.f32 %v11220_v43, %v1920_v51  ;;  %v8556_v35 = vld [vmem:[%s11696_s26 + $0x8] sm:$0xff] }
 0x847   : > { %v9961_v36 = vadd.f32 %v11230_v32, %v1932_v26  ;;  %v9947_v42 = vcombine.high %v8556_v35, %v8556_v35  ;;  %v1928_v32 = vrot.slane %v11689_v15, %v10517_v12  ;;  %v8558_v12 = vld [vmem:[%s11696_s26 + $0x18] sm:$0xff] }
 0x848   : > { %v8529_v5 = vmul.f32 0.1, %v9958_v31  ;;  %vm8521_vm4 = vcmp.gt.f32.partialorder %v9958_v31, 0.0  ;;  %v9950_v25 = vcombine.low %v8558_v12, %v8558_v12 }
 0x849   : > { %v8532_v54 = vmul.f32 0.1, %v9961_v36  ;;  %vm8524_vm5 = vcmp.gt.f32.partialorder %v9961_v36, 0.0  ;;  %v9960_v60 = vadd.f32 %v11224_v45, %v1928_v32  ;;  %v1940_v45 = vrot.slane %v11689_v15, %v10473_v23 }
 0x84a   : > { %v8537_v43 = vsel %vm8521_vm4, %v9958_v31, %v8529_v5  ;;  %v1944_v23 = vrot.slane %v11689_v15, %v10532_v34 }
 0x84b   : > { %vm8523_vm6 = vcmp.gt.f32.partialorder %v9960_v60, 0.0 }
 0x84c   : > { %8173 = vmatpush1.bf16.xpose.msra.mxu0 %v9537_v44  ;;  %v8557_v44 = vld [vmem:[%s11696_s26 + $0x10] sm:$0xff] }
 0x84d   : > { %8501 = vmatpush1.bf16.xpose.msra.mxu1 %v9793_v47  ;;  %9920 = vmatprep.subr.msk.bf16.mxu0 %vm7013_vm15, %v9554_v11  ;;  %v8540_v47 = vsel %vm8524_vm5, %v9961_v36, %v8532_v54  ;;  %v9946_v11 = vcombine.low %v8556_v35, %v8556_v35  ;;  %v9949_v4 = vcombine.high %v8557_v44, %v8557_v44 }
 0x84e   : > { %9937 = vmatprep.subr.msk.bf16.mxu1 %vm7013_vm15, %v9810_v0  ;;  %v8545_v0 = vpack.c.bf16 %v8537_v43, %v8537_v43  ;;  %v8548_v24 = vpack.c.bf16 %v8540_v47, %v8540_v47 }
 0x854   : > { %8175 = vmatpush1.bf16.xpose.msra.mxu0 %v9553_v48  ;;  %v9948_v48 = vcombine.low %v8557_v44, %v8557_v44 }
 0x855   : > { %8503 = vmatpush1.bf16.xpose.msra.mxu1 %v9809_v9  ;;  %9921 = vmatprep.subr.msk.bf16.mxu0 %vm7013_vm15, %v9570_v27  ;;  %v9951_v27 = vcombine.high %v8558_v12, %v8558_v12 }
 0x856   : > { %9938 = vmatprep.subr.msk.bf16.mxu1 %vm7013_vm15, %v9826_v62  ;;  %v1936_v62 = vrot.slane %v11689_v15, %v10468_v19 }
 0x85c   : > { %8177 = vmatpush1.bf16.xpose.msra.mxu0 %v9569_v1 }
 0x85d   : > { %8505 = vmatpush1.bf16.xpose.msra.mxu1 %v9825_v2  ;;  %9922 = vmatprep.subr.msk.bf16.mxu0 %vm7013_vm15, %v9586_v55 }
 0x85e   : > { %9939 = vmatprep.subr.msk.bf16.mxu1 %vm7013_vm15, %v9842_v50 }
 0x864   : > { %8179 = vmatpush1.bf16.xpose.msra.mxu0 %v9585_v33 }
 0x865   : > { %8507 = vmatpush1.bf16.xpose.msra.mxu1 %v9841_v10  ;;  %9923 = vmatprep.subr.msk.bf16.mxu0 %vm7013_vm15, %v9602_v13 }
 0x866   : > { %9940 = vmatprep.subr.msk.bf16.mxu1 %vm7013_vm15, %v9858_v21 }
 0x86c   : > { %8181 = vmatpush1.bf16.xpose.msra.mxu0 %v9601_v63 }
 0x86d   : > { %8509 = vmatpush1.bf16.xpose.msra.mxu1 %v9857_v20  ;;  %9924 = vmatprep.subr.msk.bf16.mxu0 %vm7013_vm15, %v9618_v8 }
 0x86e   : > { %9941 = vmatprep.subr.msk.bf16.mxu1 %vm7013_vm15, %v9874_v16 }
 0x874   : > { %8183 = vmatpush1.bf16.xpose.msra.mxu0 %v9617_v37 }
 0x875   : > { %8511 = vmatpush1.bf16.xpose.msra.mxu1 %v9873_v49  ;;  %8587 = vmatprep.subr.bf16.mxu0 %v9945_v22 }
 0x87b   : > { %8185 = vmatmul.mubr.bf16.vlgmr.msra.gmra.mrb[12].mxu0 %v11106_v39 }
 0x87c   : > { %8513 = vmatmul.mubr.bf16.vlgmr.msra.gmra.mrb[28].mxu1 %v11106_v39  ;;  %8588 = vmatpush1.bf16.xpose.msra.mxu0 %v9944_v46  ;;  %v8531_v39 = vmul.f32 0.1, %v9960_v60 }
 0x87d   : > { %8619 = vmatprep.mubr.bf16.mxu0 %v8546_v7  ;;  %8627 = vmatprep.subr.bf16.mxu0 %v9947_v42 }
 0x87e   : > { %v8539_v61 = vsel %vm8523_vm6, %v9960_v60, %v8531_v39 }
 0x87f   : > { %v8547_v9 = vpack.c.bf16 %v8539_v61, %v8539_v61 }
 0x883   : > { %8620 = vmatmul.mubr.bf16.vlgmr.msra.gmra.mrb[16].mxu0 %v8545_v0 }
 0x884   : > { %8659 = vmatprep.mubr.bf16.mxu0 %v8548_v24  ;;  %8628 = vmatpush1.bf16.xpose.msra.mxu0 %v9946_v11 }
 0x885   : > { %8667 = vmatprep.subr.bf16.mxu0 %v9949_v4 }
 0x88f   : > { %8660 = vmatmul.mubr.bf16.vlgmr.msra.gmra.mrb[16].mxu0 %v8547_v9 }
 0x890   : > { %8668 = vmatpush1.bf16.xpose.msra.mxu0 %v9948_v48 }
 0x891   : > { %8707 = vmatprep.subr.bf16.mxu0 %v9951_v27 }
 0x94e   : > { %v8186_v53 = vpop.f32.mrb[12].mxu0 }
 0x94f   : > { %v9962_v58 = vadd.f32 %v8186_v53, %v1936_v62  ;;  %v8514_v59 = vpop.f32.mrb[28].mxu1  ;;  %v8188_v1 = vpop.f32.mrb[13].mxu0 }
 0x950   : > { %v9963_v2 = vadd.f32 %v8188_v1, %v1940_v45  ;;  %v8516_v55 = vpop.f32.mrb[29].mxu1  ;;  %v8190_v50 = vpop.f32.mrb[14].mxu0  ;;  %v9964_v57 = vadd.f32 %v8514_v59, %v1944_v23 }
 0x951   : > { %vm8525_vm7 = vcmp.gt.f32.partialorder %v9962_v58, 0.0  ;;  %v8533_v29 = vmul.f32 0.1, %v9962_v58  ;;  %v9965_v41 = vadd.f32 %v8516_v55, %v1948_v52  ;;  %v8518_v6 = vpop.f32.mrb[30].mxu1  ;;  %v8191_v28 = vpop.f32.mrb[15].mxu0 }
 0x952   : > { %vm8526_vm8 = vcmp.gt.f32.partialorder %v9963_v2, 0.0  ;;  %v8534_v19 = vmul.f32 0.1, %v9963_v2  ;;  %v8519_v10 = vpop.f32.mrb[31].mxu1  ;;  %v8535_v20 = vmul.f32 0.1, %v9964_v57 }
 0x953   : > { %v8541_v33 = vsel %vm8525_vm7, %v9962_v58, %v8533_v29  ;;  %vm8528_vm9 = vcmp.gt.f32.partialorder %v9965_v41, 0.0  ;;  %v8536_v38 = vmul.f32 0.1, %v9965_v41  ;;  %vm8527_vm10 = vcmp.gt.f32.partialorder %v9964_v57, 0.0 }
 0x954   : > { %v8542_v13 = vsel %vm8526_vm8, %v9963_v2, %v8534_v19  ;;  %v8549_v14 = vpack.c.bf16 %v8541_v33, %v8541_v33  ;;  %v8543_v8 = vsel %vm8527_vm10, %v9964_v57, %v8535_v20 }
 0x955   : > { %v8550_v21 = vpack.c.bf16 %v8542_v13, %v8542_v13  ;;  %v8544_v18 = vsel %vm8528_vm9, %v9965_v41, %v8536_v38  ;;  %v8551_v34 = vpack.c.bf16 %v8543_v8, %v8543_v8 }
 0x956   : > { %v8552_v63 = vpack.c.bf16 %v8544_v18, %v8544_v18 }
 0x957   : > { %8699 = vmatprep.mubr.bf16.mxu0 %v8550_v21 }
 0x958   : > { %8700 = vmatmul.mubr.bf16.vlgmr.msra.gmra.mrb[16].mxu0 %v8549_v14 }
 0x959   : > { %8708 = vmatpush1.bf16.xpose.msra.mxu0 %v9950_v25  ;;  %8739 = vmatprep.mubr.bf16.mxu0 %v8552_v63 }
 0x964   : > { %8740 = vmatmul.mubr.bf16.vlgmr.msra.gmra.mrb[16].mxu0 %v8551_v34 }
 0xa37   : > { %v8741_v15 = vpop.f32.mrb[16].mxu0 }
 0xa38   : > { %8748 = vst.msk [vmem:[%s247_s29] sm:$0x3] %vm8747_vm11, %v8741_v15  ;;  %v8743_v16 = vpop.f32.mrb[17].mxu0 }
 0xa39   : > { %v8744_v17 = vpop.f32.mrb[18].mxu0 }
 0xa3a   : > { %10156 = shalt.err (!%p10153_p3)
}
 0xa3b   : > { %s10157_s17 = scalar_lea.hbm %s11732_s12, 32  ;;  %s10161_s26 = scalar_lea.hbm %s11780_s6, 64 }
 0xa3c   : > { %p10158_p4 = scmp.ne.s32.totalorder %s11732_s12, %s10157_s17  ;;  %p10162_p9 = scmp.lt.u32.totalorder %s11732_s12, %s11780_s6 }
 0xa3d   : > { %p10163_p10 = scmp.lt.u32.totalorder %s10161_s26, %s10157_s17  ;;  %p10165_p12 = scmp.lt.u32.totalorder %s10157_s17, %s11732_s12 }
 0xa3e   : > { %p10159_p7 = pnand %p10158_p4, %p10283_p5 }
 0xa3f   : > { %p10164_p11 = por %p10163_p10, %p10162_p9 }
 0xa40   : > { %p10160_p8 = pneg %p10159_p7 }
 0xa41   : > { %p10166_p13 = por %p10165_p12, %p10164_p11 }
 0xa43   : > { %p10167_p0 = pnand %p10166_p13, %p10160_p8 }
 0xa45   : > { %10170 = shalt.err (!%p10167_p0)
}
 0xa46   : > { %10090 = dma.vmem_to_hbm [thread:$0]  (%p10283_p5), %s11734_s9, 32, %s11732_s12, %s8750_s13   ;;  %v8745_v3 = vpop.f32.mrb[19].mxu0 }
 0xa47 PF: > { %p10096_p1 = scmp.ge.s32.totalorder %s10205_s24, 2  ;;  %s8775_s29 = sand.u32 1, %s10193_s21  }
 0xa48   : > { %s8776_s10 = scalar_lea.sflag [#allocation3], %s8775_s29 }
 0xa49   : > { %p10093_p2 = pnand %p10096_p1, %p10287_p6 }
 0xa4b   : > { %10188 = dma.done.wait (!%p10093_p2), %s8776_s10, 32  }
 0xa4c   : > { %10190 = vsyncadd (!%p10093_p2), %s8776_s10, 4294967264  ;;  %p16_p3 = scmp.ge.s32.totalorder %s10270_s27, 4   ;;  %s11783_s21 = smov %s10197_s22 }
 0xa4d   : > { %s11784_s22 = smov %s10201_s23  ;;  %s11785_s23 = smov %s10281_s30 }
 0xa4e   : > { %s11786_s24 = smov %s10270_s27  ;;  %18 = sbr.rel (!%p16_p3) target bundleno = 3 (0x3), region = 81 }
 0xa55   :  { %8781 = vsyncpa [#allocation3], 1 }
 0xa56   :  { %8783 = vsyncpa [#allocation3 + $0x1], 1 }

</bundles_post_ra>
